<compile_context>
chip_gen: v7x
topology: tpu7x:2x2x1
jax: 0.10.0
libtpu: 0.0.40
codegen_flags: <defaults>
</compile_context>

<pallas_src>
import math
import functools

import jax
import jax.numpy as jnp
from jax.experimental import pallas as pl
from jax.experimental.pallas import tpu as pltpu


_LAYER_KEYS = ("w_q", "b_q", "w_k", "b_k", "w_v", "b_v", "w_o", "b_o",
               "ln1_g", "ln1_b", "ff1_w", "ff1_b", "ff2_w", "ff2_b", "ln2_g", "ln2_b")


# ----------------------------- Fused Pallas kernel ------------------------------

def _fused_forward_kernel(*refs, Bt, L, H, dh, num_layers):
    """One grid step == one tile of Bt sequences: activations are (Bt*L, d_model)."""
    f32 = jnp.float32
    D = H * dh
    T = Bt * L

    x_in_ref, bias_ref, pe_ref, we_ref, be_ref = refs[:5]
    layer_refs = refs[5:5 + 16 * num_layers]
    fc_w, fc_b, o_ref, attn_sc = refs[5 + 16 * num_layers:]

    # ---- FeatureEmbedder (num_linear folded into w_embed) + positional encoding ----
    x = (jnp.dot(x_in_ref[...], we_ref[...], preferred_element_type=f32)
         + be_ref[...] + pe_ref[...])                                   # (T, D)

    bias = bias_ref[...]                  # (Bt, 1, L): 0 = valid key, -1e30 = padded key
    scale = 1.0 / math.sqrt(dh)

    def layer_norm(z, g_ref, b_ref):
        # Single pass: mean and mean-of-squares (biased variance), eps=1e-5 (PyTorch).
        mu = jnp.mean(z, axis=-1, keepdims=True)
        var = jnp.maximum(jnp.mean(z * z, axis=-1, keepdims=True) - mu * mu, 0.0)
        return (z - mu) * jax.lax.rsqrt(var + 1e-5) * g_ref[...] + b_ref[...]

    for l in range(num_layers):            # post-LN encoder layers, ReLU FFN
        (w_q, b_q, w_k, b_k, w_v, b_v, w_o, b_o, ln1_g, ln1_b,
         ff1_w, ff1_b, ff2_w, ff2_b, ln2_g, ln2_b) = layer_refs[16 * l:16 * (l + 1)]

        # -- multi-head self-attention over the whole (Bt, L) token slab --
        q = (jnp.dot(x, w_q[...], preferred_element_type=f32) + b_q[...]).reshape(Bt, L, D)
        k = (jnp.dot(x, w_k[...], preferred_element_type=f32) + b_k[...]).reshape(Bt, L, D)
        v = (jnp.dot(x, w_v[...], preferred_element_type=f32) + b_v[...]).reshape(Bt, L, D)

        for h in range(H):
            sl = slice(h * dh, (h + 1) * dh)
            # Bt-batched score contraction on dh (no explicit transpose).
            s = jnp.einsum('bqd,bkd->bqk', q[..., sl], k[..., sl],
                           preferred_element_type=f32) * scale + bias     # (Bt, L, L)
            s = s - jnp.max(s, axis=-1, keepdims=True)
            p = jnp.exp(s)
            p = p * pl.reciprocal(jnp.sum(p, axis=-1, keepdims=True), approx=False)
            o_h = jnp.einsum('bqk,bkd->bqd', p, v[..., sl],
                             preferred_element_type=f32)                  # (Bt, L, dh)
            attn_sc[:, sl] = o_h.reshape(T, dh)       # re-flatten heads into (T, D)

        # Single out-proj matmul on the re-flattened heads.
        attn = jnp.dot(attn_sc[...], w_o[...], preferred_element_type=f32) + b_o[...]
        x = layer_norm(x + attn, ln1_g, ln1_b)

        # -- feed-forward (ReLU), f32 accumulation --
        w1 = ff1_w[...]
        w2 = ff2_w[...]
        h1 = jnp.maximum(
            jnp.dot(x.astype(w1.dtype), w1, preferred_element_type=f32) + ff1_b[...], 0.0)
        h2 = jnp.dot(h1.astype(w2.dtype), w2, preferred_element_type=f32) + ff2_b[...]
        # TODO(synk): at production d_model, compute h2 token-major ((dff, T) orientation +
        # one XLU transpose) to make the N=d_model FFN2 output lane-dense on v6e/v7x.
        x = layer_norm(x + h2, ln2_g, ln2_b)

    # ---- fc_out (zero-padded to 128 lanes => unmasked, lane-dense store) ----
    o_ref[...] = jnp.dot(x, fc_w[...], preferred_element_type=f32) + fc_b[...]


def _pick_batch_tile(B, L, target_tokens=256):
    """Bt so that Bt*L >= ~256 rows per grid step (>=128 already saturates v5e)."""
    Bt = max(1, min(B, target_tokens // max(L, 1)))
    while B % Bt:
        Bt -= 1
    return Bt


def fused_transformer(x_in, mask_bias, pe_tiled, w_embed, b_embed, layers,
                      fc_w_pad, fc_b_pad, *, B, L, Bt, H, dh, num_layers):
    """Single pallas_call for the whole post-gather forward pass."""
    assert L % 8 == 0, "sequence length must be sublane aligned (L multiple of 8)"
    assert B % Bt == 0
    d_model = H * dh
    T = Bt * L
    cin = x_in.shape[-1]

    inputs = [x_in, mask_bias, pe_tiled, w_embed, b_embed]
    for lp in layers:
        inputs += [lp[k] for k in _LAYER_KEYS]
    inputs += [fc_w_pad, fc_b_pad]

    def shared(a):
        # Full-array block, constant block index => weight stays resident in VMEM.
        # TODO(synk): at production weight sizes on v7x, add pipeline_mode=pl.Buffered(1)
        # here to avoid double-buffering never-changing weight blocks.
        return pl.BlockSpec(a.shape, lambda g: (0,) * a.ndim)

    in_specs = [
        pl.BlockSpec((T, cin), lambda g: (g, 0)),        # fused [cat_emb | num_x] tokens
        pl.BlockSpec((Bt, 1, L), lambda g: (g, 0, 0)),   # per-sequence key-padding bias
        shared(pe_tiled), shared(w_embed), shared(b_embed),
    ]
    for lp in layers:
        in_specs += [shared(lp[k]) for k in _LAYER_KEYS]
    in_specs += [shared(fc_w_pad), shared(fc_b_pad)]

    out = pl.pallas_call(
        functools.partial(_fused_forward_kernel, Bt=Bt, L=L, H=H, dh=dh,
                          num_layers=num_layers),
        out_shape=jax.ShapeDtypeStruct((B * L, 128), jnp.float32),
        grid=(B // Bt,),
        in_specs=in_specs,
        out_specs=pl.BlockSpec((T, 128), lambda g: (g, 0)),
        scratch_shapes=[pltpu.VMEM((T, d_model), jnp.float32)],   # re-flattened heads
        compiler_params=pltpu.CompilerParams(
            # TODO(synk): on v7x verify the batch-tile axis lands on both TensorCores;
            # switch to pltpu.CORE_PARALLEL if a trace shows one idle core.
            dimension_semantics=("parallel",),
            vmem_limit_bytes=32 * 1024 * 1024),
    )(*inputs)
    return out


# ------------------------------ Parameters ---------------------------------

def make_positional_encoding(max_len, d_model):
    pos = jnp.arange(max_len, dtype=jnp.float32)[:, None]
    div = jnp.exp(jnp.arange(0, d_model, 2, dtype=jnp.float32)
                  * (-math.log(10000.0) / d_model))
    pe = jnp.zeros((max_len, d_model), jnp.float32)
    pe = pe.at[:, 0::2].set(jnp.sin(pos * div))
    if d_model % 2 == 1:
        pe = pe.at[:, 1::2].set(jnp.cos(pos * div[:-1]))
    else:
        pe = pe.at[:, 1::2].set(jnp.cos(pos * div))
    return pe


def init_params(key, cat_unique, cat_cols, num_dim, d_model, num_layers, dff,
                max_seq_len, ffn_dtype=jnp.float32):
    """Parameters in kernel-ready layout (biases (1, N), QKV pre-split)."""
    def emb_dim(u):
        return max(min(16, u // 2 + 1), 4)

    keys = iter(jax.random.split(key, 256))

    def nrm(shape, scale=0.02):
        return (scale * jax.random.normal(next(keys), shape)).astype(jnp.float32)

    params = {"emb": {}, "layers": []}
    for c in cat_cols:
        params["emb"][c] = nrm((cat_unique[c], emb_dim(cat_unique[c])))
    cat_out = sum(emb_dim(cat_unique[c]) for c in cat_cols)

    params["num_w"] = nrm((num_dim, num_dim))
    params["num_b"] = jnp.zeros((1, num_dim), jnp.float32)
    params["out_w"] = nrm((cat_out + num_dim, d_model))
    params["out_b"] = jnp.zeros((1, d_model), jnp.float32)

    for _ in range(num_layers):
        params["layers"].append({
            "w_q": nrm((d_model, d_model)), "b_q": jnp.zeros((1, d_model), jnp.float32),
            "w_k": nrm((d_model, d_model)), "b_k": jnp.zeros((1, d_model), jnp.float32),
            "w_v": nrm((d_model, d_model)), "b_v": jnp.zeros((1, d_model), jnp.float32),
            "w_o": nrm((d_model, d_model)), "b_o": jnp.zeros((1, d_model), jnp.float32),
            "ln1_g": jnp.ones((1, d_model), jnp.float32),
            "ln1_b": jnp.zeros((1, d_model), jnp.float32),
            "ff1_w": nrm((d_model, dff)).astype(ffn_dtype),
            "ff1_b": jnp.zeros((1, dff), jnp.float32),
            "ff2_w": nrm((dff, d_model)).astype(ffn_dtype),
            "ff2_b": jnp.zeros((1, d_model), jnp.float32),
            "ln2_g": jnp.ones((1, d_model), jnp.float32),
            "ln2_b": jnp.zeros((1, d_model), jnp.float32),
        })

    params["fc_w"] = nrm((d_model, 8))
    params["fc_b"] = jnp.zeros((1, 8), jnp.float32)
    params["pe"] = make_positional_encoding(max_seq_len, d_model)
    return params


# ------------------------------ Forward pass --------------------------------

def horse_transformer_forward(params, src, valid_mask, *, cat_cols, num_dim,
                              d_model, nhead, num_layers):
    B, L, _ = src.shape
    H = nhead
    dh = d_model // nhead
    cat_len = len(cat_cols)

    cat_x = src[..., :cat_len].astype(jnp.int32)
    num_x = src[..., cat_len:].astype(jnp.float32).reshape(B * L, num_dim)

    # TODO(synk): embedding-table lookup is a pure gather; done with jnp.take (XLA),
    # not inside the Pallas kernel.
    embs = [jnp.take(params["emb"][c], cat_x[..., i], axis=0)
            for i, c in enumerate(cat_cols)]
    cat_emb = jnp.concatenate(embs, axis=-1).reshape(B * L, -1)
    cat_out = cat_emb.shape[-1]

    # One lane-contiguous kernel input [cat_emb | num_x]  (single DMA per batch tile).
    x_in = jnp.concatenate([cat_emb, num_x], axis=-1)

    # Fold num_linear into out_linear (both linear => exact):
    #   out_linear(cat([cat_emb, num_x @ Wn + bn])) == [cat_emb|num_x] @ W_embed + b_embed
    out_w, out_b = params["out_w"], params["out_b"]
    w_embed = jnp.concatenate([out_w[:cat_out],
                               params["num_w"] @ out_w[cat_out:]], axis=0)
    b_embed = params["num_b"] @ out_w[cat_out:] + out_b

    # Module mask: True=valid. PyTorch key_padding_mask masks True=pad (module passes ~mask).
    mask_bias = jnp.where(valid_mask, 0.0, -1e30).astype(jnp.float32).reshape(B, 1, L)

    # Batch tile + positional table tiled to the token slab of one grid step.
    Bt = _pick_batch_tile(B, L)
    pe_tiled = jnp.tile(params["pe"][:L], (Bt, 1))                     # (Bt*L, d_model)

    # fc_out zero-padded to 128 lanes so the kernel's final store is lane-dense.
    fc_w_pad = jnp.zeros((d_model, 128), jnp.float32).at[:, :8].set(params["fc_w"])
    fc_b_pad = jnp.zeros((1, 128), jnp.float32).at[:, :8].set(params["fc_b"])

    out = fused_transformer(x_in, mask_bias, pe_tiled, w_embed, b_embed,
                            params["layers"], fc_w_pad, fc_b_pad,
                            B=B, L=L, Bt=Bt, H=H, dh=dh, num_layers=num_layers)
    return out[:, :8].reshape(B, L, 8)


# --------------------------------- Main --------------------------------------

if __name__ == "__main__":
    cat_cols = ["horse_id", "jockey_id"]
    cat_unique = {"horse_id": 10, "jockey_id": 6}   # emb dims -> 6 and 4
    num_dim = 6
    d_model = 32
    nhead = 4
    num_layers = 2
    dff = 2048                                      # nn.TransformerEncoderLayer default
    B, L = 2, 8
    max_seq_len = 16

    key = jax.random.PRNGKey(0)
    k_param, k_c0, k_c1, k_num = jax.random.split(key, 4)

    params = init_params(k_param, cat_unique, cat_cols, num_dim, d_model,
                         num_layers, dff, max_seq_len)

    cat0 = jax.random.randint(k_c0, (B, L, 1), 0, cat_unique["horse_id"]).astype(jnp.float32)
    cat1 = jax.random.randint(k_c1, (B, L, 1), 0, cat_unique["jockey_id"]).astype(jnp.float32)
    numf = jax.random.normal(k_num, (B, L, num_dim), jnp.float32)
    src = jnp.concatenate([cat0, cat1, numf], axis=-1)   # (B, L, cat_len + num_dim) = (2, 8, 8)

    valid_mask = jnp.ones((B, L), dtype=bool)
    valid_mask = valid_mask.at[1, -2:].set(False)        # pad last 2 slots of batch 1

    fwd = jax.jit(functools.partial(
        horse_transformer_forward, cat_cols=cat_cols, num_dim=num_dim,
        d_model=d_model, nhead=nhead, num_layers=num_layers))

    out = jax.block_until_ready(fwd(params, src, valid_mask))

    assert out.shape == (B, L, 8), out.shape
    assert bool(jnp.all(jnp.isfinite(out)))
    print("KERNEL_OK")
</pallas_src>

<mosaic_0001>
module attributes {stable_mosaic.version = 11 : i64} {
  func.func @_fused_forward_kernel(%arg0: i32, %arg1: memref<16x16xf32, #tpu.memory_space<vmem>>, %arg2: memref<2x1x8xf32, #tpu.memory_space<vmem>>, %arg3: memref<16x32xf32, #tpu.memory_space<vmem>>, %arg4: memref<16x32xf32, #tpu.memory_space<vmem>>, %arg5: memref<1x32xf32, #tpu.memory_space<vmem>>, %arg6: memref<32x32xf32, #tpu.memory_space<vmem>>, %arg7: memref<1x32xf32, #tpu.memory_space<vmem>>, %arg8: memref<32x32xf32, #tpu.memory_space<vmem>>, %arg9: memref<1x32xf32, #tpu.memory_space<vmem>>, %arg10: memref<32x32xf32, #tpu.memory_space<vmem>>, %arg11: memref<1x32xf32, #tpu.memory_space<vmem>>, %arg12: memref<32x32xf32, #tpu.memory_space<vmem>>, %arg13: memref<1x32xf32, #tpu.memory_space<vmem>>, %arg14: memref<1x32xf32, #tpu.memory_space<vmem>>, %arg15: memref<1x32xf32, #tpu.memory_space<vmem>>, %arg16: memref<32x2048xf32, #tpu.memory_space<vmem>>, %arg17: memref<1x2048xf32, #tpu.memory_space<vmem>>, %arg18: memref<2048x32xf32, #tpu.memory_space<vmem>>, %arg19: memref<1x32xf32, #tpu.memory_space<vmem>>, %arg20: memref<1x32xf32, #tpu.memory_space<vmem>>, %arg21: memref<1x32xf32, #tpu.memory_space<vmem>>, %arg22: memref<32x32xf32, #tpu.memory_space<vmem>>, %arg23: memref<1x32xf32, #tpu.memory_space<vmem>>, %arg24: memref<32x32xf32, #tpu.memory_space<vmem>>, %arg25: memref<1x32xf32, #tpu.memory_space<vmem>>, %arg26: memref<32x32xf32, #tpu.memory_space<vmem>>, %arg27: memref<1x32xf32, #tpu.memory_space<vmem>>, %arg28: memref<32x32xf32, #tpu.memory_space<vmem>>, %arg29: memref<1x32xf32, #tpu.memory_space<vmem>>, %arg30: memref<1x32xf32, #tpu.memory_space<vmem>>, %arg31: memref<1x32xf32, #tpu.memory_space<vmem>>, %arg32: memref<32x2048xf32, #tpu.memory_space<vmem>>, %arg33: memref<1x2048xf32, #tpu.memory_space<vmem>>, %arg34: memref<2048x32xf32, #tpu.memory_space<vmem>>, %arg35: memref<1x32xf32, #tpu.memory_space<vmem>>, %arg36: memref<1x32xf32, #tpu.memory_space<vmem>>, %arg37: memref<1x32xf32, #tpu.memory_space<vmem>>, %arg38: memref<32x128xf32, #tpu.memory_space<vmem>>, %arg39: memref<1x128xf32, #tpu.memory_space<vmem>>, %arg40: memref<16x128xf32, #tpu.memory_space<vmem>>, %arg41: memref<16x32xf32, #tpu.memory_space<vmem>>) attributes {dimension_semantics = [#tpu.dimension_semantics<parallel>], iteration_bounds = array<i64: 1>, scalar_prefetch = 0 : i64, scratch_operands = 1 : i64, tpu.core_type = #tpu.core_type<tc>, window_params = [{transform_indices = @transform_0, window_bounds = array<i64: 16, 16>}, {transform_indices = @transform_1, window_bounds = array<i64: 2, 1, 8>}, {pipeline_mode = #tpu.pipeline_mode<synchronous>, transform_indices = @transform_2, window_bounds = array<i64: 16, 32>}, {pipeline_mode = #tpu.pipeline_mode<synchronous>, transform_indices = @transform_3, window_bounds = array<i64: 16, 32>}, {pipeline_mode = #tpu.pipeline_mode<synchronous>, transform_indices = @transform_4, window_bounds = array<i64: 1, 32>}, {pipeline_mode = #tpu.pipeline_mode<synchronous>, transform_indices = @transform_5, window_bounds = array<i64: 32, 32>}, {pipeline_mode = #tpu.pipeline_mode<synchronous>, transform_indices = @transform_6, window_bounds = array<i64: 1, 32>}, {pipeline_mode = #tpu.pipeline_mode<synchronous>, transform_indices = @transform_7, window_bounds = array<i64: 32, 32>}, {pipeline_mode = #tpu.pipeline_mode<synchronous>, transform_indices = @transform_8, window_bounds = array<i64: 1, 32>}, {pipeline_mode = #tpu.pipeline_mode<synchronous>, transform_indices = @transform_9, window_bounds = array<i64: 32, 32>}, {pipeline_mode = #tpu.pipeline_mode<synchronous>, transform_indices = @transform_10, window_bounds = array<i64: 1, 32>}, {pipeline_mode = #tpu.pipeline_mode<synchronous>, transform_indices = @transform_11, window_bounds = array<i64: 32, 32>}, {pipeline_mode = #tpu.pipeline_mode<synchronous>, transform_indices = @transform_12, window_bounds = array<i64: 1, 32>}, {pipeline_mode = #tpu.pipeline_mode<synchronous>, transform_indices = @transform_13, window_bounds = array<i64: 1, 32>}, {pipeline_mode = #tpu.pipeline_mode<synchronous>, transform_indices = @transform_14, window_bounds = array<i64: 1, 32>}, {pipeline_mode = #tpu.pipeline_mode<synchronous>, transform_indices = @transform_15, window_bounds = array<i64: 32, 2048>}, {pipeline_mode = #tpu.pipeline_mode<synchronous>, transform_indices = @transform_16, window_bounds = array<i64: 1, 2048>}, {pipeline_mode = #tpu.pipeline_mode<synchronous>, transform_indices = @transform_17, window_bounds = array<i64: 2048, 32>}, {pipeline_mode = #tpu.pipeline_mode<synchronous>, transform_indices = @transform_18, window_bounds = array<i64: 1, 32>}, {pipeline_mode = #tpu.pipeline_mode<synchronous>, transform_indices = @transform_19, window_bounds = array<i64: 1, 32>}, {pipeline_mode = #tpu.pipeline_mode<synchronous>, transform_indices = @transform_20, window_bounds = array<i64: 1, 32>}, {pipeline_mode = #tpu.pipeline_mode<synchronous>, transform_indices = @transform_21, window_bounds = array<i64: 32, 32>}, {pipeline_mode = #tpu.pipeline_mode<synchronous>, transform_indices = @transform_22, window_bounds = array<i64: 1, 32>}, {pipeline_mode = #tpu.pipeline_mode<synchronous>, transform_indices = @transform_23, window_bounds = array<i64: 32, 32>}, {pipeline_mode = #tpu.pipeline_mode<synchronous>, transform_indices = @transform_24, window_bounds = array<i64: 1, 32>}, {pipeline_mode = #tpu.pipeline_mode<synchronous>, transform_indices = @transform_25, window_bounds = array<i64: 32, 32>}, {pipeline_mode = #tpu.pipeline_mode<synchronous>, transform_indices = @transform_26, window_bounds = array<i64: 1, 32>}, {pipeline_mode = #tpu.pipeline_mode<synchronous>, transform_indices = @transform_27, window_bounds = array<i64: 32, 32>}, {pipeline_mode = #tpu.pipeline_mode<synchronous>, transform_indices = @transform_28, window_bounds = array<i64: 1, 32>}, {pipeline_mode = #tpu.pipeline_mode<synchronous>, transform_indices = @transform_29, window_bounds = array<i64: 1, 32>}, {pipeline_mode = #tpu.pipeline_mode<synchronous>, transform_indices = @transform_30, window_bounds = array<i64: 1, 32>}, {pipeline_mode = #tpu.pipeline_mode<synchronous>, transform_indices = @transform_31, window_bounds = array<i64: 32, 2048>}, {pipeline_mode = #tpu.pipeline_mode<synchronous>, transform_indices = @transform_32, window_bounds = array<i64: 1, 2048>}, {pipeline_mode = #tpu.pipeline_mode<synchronous>, transform_indices = @transform_33, window_bounds = array<i64: 2048, 32>}, {pipeline_mode = #tpu.pipeline_mode<synchronous>, transform_indices = @transform_34, window_bounds = array<i64: 1, 32>}, {pipeline_mode = #tpu.pipeline_mode<synchronous>, transform_indices = @transform_35, window_bounds = array<i64: 1, 32>}, {pipeline_mode = #tpu.pipeline_mode<synchronous>, transform_indices = @transform_36, window_bounds = array<i64: 1, 32>}, {pipeline_mode = #tpu.pipeline_mode<synchronous>, transform_indices = @transform_37, window_bounds = array<i64: 32, 128>}, {pipeline_mode = #tpu.pipeline_mode<synchronous>, transform_indices = @transform_38, window_bounds = array<i64: 1, 128>}, {transform_indices = @transform_39, window_bounds = array<i64: 16, 128>}]} {
    %c0 = arith.constant 0 : index
    %c0_0 = arith.constant 0 : index
    %0 = vector.load %arg1[%c0, %c0_0] : memref<16x16xf32, #tpu.memory_space<vmem>>, vector<16x16xf32>
    %c0_1 = arith.constant 0 : index
    %c0_2 = arith.constant 0 : index
    %1 = vector.load %arg4[%c0_1, %c0_2] : memref<16x32xf32, #tpu.memory_space<vmem>>, vector<16x32xf32>
    %cst = arith.constant dense<0.000000e+00> : vector<16x32xf32>
    %2 = tpu.matmul %0, %1, %cst {dimension_numbers = #tpu.dot_dimension_numbers<[1], [0], [0], [1], [0, 0, 1, 1], [], []>} : vector<16x16xf32>, vector<16x32xf32>, vector<16x32xf32> -> vector<16x32xf32>
    %c0_3 = arith.constant 0 : index
    %c0_4 = arith.constant 0 : index
    %3 = vector.load %arg5[%c0_3, %c0_4] : memref<1x32xf32, #tpu.memory_space<vmem>>, vector<1x32xf32>
    %4 = vector.broadcast %3 : vector<1x32xf32> to vector<16x32xf32>
    %5 = arith.addf %2, %4 : vector<16x32xf32>
    %c0_5 = arith.constant 0 : index
    %c0_6 = arith.constant 0 : index
    %6 = vector.load %arg3[%c0_5, %c0_6] : memref<16x32xf32, #tpu.memory_space<vmem>>, vector<16x32xf32>
    %7 = arith.addf %5, %6 : vector<16x32xf32>
    %c0_7 = arith.constant 0 : index
    %c0_8 = arith.constant 0 : index
    %c0_9 = arith.constant 0 : index
    %8 = vector.load %arg2[%c0_7, %c0_8, %c0_9] : memref<2x1x8xf32, #tpu.memory_space<vmem>>, vector<2x1x8xf32>
    %c0_10 = arith.constant 0 : index
    %c0_11 = arith.constant 0 : index
    %9 = vector.load %arg6[%c0_10, %c0_11] : memref<32x32xf32, #tpu.memory_space<vmem>>, vector<32x32xf32>
    %cst_12 = arith.constant dense<0.000000e+00> : vector<16x32xf32>
    %10 = tpu.matmul %7, %9, %cst_12 {dimension_numbers = #tpu.dot_dimension_numbers<[1], [0], [0], [1], [0, 0, 1, 1], [], []>} : vector<16x32xf32>, vector<32x32xf32>, vector<16x32xf32> -> vector<16x32xf32>
    %c0_13 = arith.constant 0 : index
    %c0_14 = arith.constant 0 : index
    %11 = vector.load %arg7[%c0_13, %c0_14] : memref<1x32xf32, #tpu.memory_space<vmem>>, vector<1x32xf32>
    %12 = vector.broadcast %11 : vector<1x32xf32> to vector<16x32xf32>
    %13 = arith.addf %10, %12 : vector<16x32xf32>
    %14 = vector.shape_cast %13 : vector<16x32xf32> to vector<2x8x32xf32>
    %c0_15 = arith.constant 0 : index
    %c0_16 = arith.constant 0 : index
    %15 = vector.load %arg8[%c0_15, %c0_16] : memref<32x32xf32, #tpu.memory_space<vmem>>, vector<32x32xf32>
    %cst_17 = arith.constant dense<0.000000e+00> : vector<16x32xf32>
    %16 = tpu.matmul %7, %15, %cst_17 {dimension_numbers = #tpu.dot_dimension_numbers<[1], [0], [0], [1], [0, 0, 1, 1], [], []>} : vector<16x32xf32>, vector<32x32xf32>, vector<16x32xf32> -> vector<16x32xf32>
    %c0_18 = arith.constant 0 : index
    %c0_19 = arith.constant 0 : index
    %17 = vector.load %arg9[%c0_18, %c0_19] : memref<1x32xf32, #tpu.memory_space<vmem>>, vector<1x32xf32>
    %18 = vector.broadcast %17 : vector<1x32xf32> to vector<16x32xf32>
    %19 = arith.addf %16, %18 : vector<16x32xf32>
    %20 = vector.shape_cast %19 : vector<16x32xf32> to vector<2x8x32xf32>
    %c0_20 = arith.constant 0 : index
    %c0_21 = arith.constant 0 : index
    %21 = vector.load %arg10[%c0_20, %c0_21] : memref<32x32xf32, #tpu.memory_space<vmem>>, vector<32x32xf32>
    %cst_22 = arith.constant dense<0.000000e+00> : vector<16x32xf32>
    %22 = tpu.matmul %7, %21, %cst_22 {dimension_numbers = #tpu.dot_dimension_numbers<[1], [0], [0], [1], [0, 0, 1, 1], [], []>} : vector<16x32xf32>, vector<32x32xf32>, vector<16x32xf32> -> vector<16x32xf32>
    %c0_23 = arith.constant 0 : index
    %c0_24 = arith.constant 0 : index
    %23 = vector.load %arg11[%c0_23, %c0_24] : memref<1x32xf32, #tpu.memory_space<vmem>>, vector<1x32xf32>
    %24 = vector.broadcast %23 : vector<1x32xf32> to vector<16x32xf32>
    %25 = arith.addf %22, %24 : vector<16x32xf32>
    %26 = vector.shape_cast %25 : vector<16x32xf32> to vector<2x8x32xf32>
    %27 = vector.extract_strided_slice %14 {offsets = [0, 0, 0], sizes = [2, 8, 8], strides = [1, 1, 1]} : vector<2x8x32xf32> to vector<2x8x8xf32>
    %28 = vector.extract_strided_slice %20 {offsets = [0, 0, 0], sizes = [2, 8, 8], strides = [1, 1, 1]} : vector<2x8x32xf32> to vector<2x8x8xf32>
    "tpu.trace_start"() <{level = 10 : i32, message = "bqd,bkd->bqk"}> : () -> ()
    %cst_25 = arith.constant dense<0.000000e+00> : vector<2x8x8xf32>
    %29 = tpu.matmul %27, %28, %cst_25 {dimension_numbers = #tpu.dot_dimension_numbers<[2], [2], [1], [1], [0, 0, 0, 1, 1, 1], [0], [0]>} : vector<2x8x8xf32>, vector<2x8x8xf32>, vector<2x8x8xf32> -> vector<2x8x8xf32>
    "tpu.trace_stop"() : () -> ()
    %cst_26 = arith.constant 0.353553385 : f32
    %30 = vector.broadcast %cst_26 : f32 to vector<2x8x8xf32>
    %31 = arith.mulf %29, %30 : vector<2x8x8xf32>
    %32 = vector.broadcast %8 : vector<2x1x8xf32> to vector<2x8x8xf32>
    %33 = arith.addf %31, %32 : vector<2x8x8xf32>
    %cst_27 = arith.constant dense<0xFF800000> : vector<2x8xf32>
    %34 = vector.multi_reduction <maximumf>, %33, %cst_27 [2] : vector<2x8x8xf32> to vector<2x8xf32>
    %35 = vector.shape_cast %34 : vector<2x8xf32> to vector<2x8x1xf32>
    %36 = vector.broadcast %35 : vector<2x8x1xf32> to vector<2x8x8xf32>
    %37 = arith.subf %33, %36 : vector<2x8x8xf32>
    %38 = math.exp %37 : vector<2x8x8xf32>
    %cst_28 = arith.constant dense<0.000000e+00> : vector<2x8xf32>
    %39 = vector.multi_reduction <add>, %38, %cst_28 [2] : vector<2x8x8xf32> to vector<2x8xf32>
    %40 = vector.shape_cast %39 : vector<2x8xf32> to vector<2x8x1xf32>
    %41 = tpu.reciprocal %40 : vector<2x8x1xf32> -> vector<2x8x1xf32>
    %42 = vector.broadcast %41 : vector<2x8x1xf32> to vector<2x8x8xf32>
    %43 = arith.mulf %38, %42 : vector<2x8x8xf32>
    %44 = vector.extract_strided_slice %26 {offsets = [0, 0, 0], sizes = [2, 8, 8], strides = [1, 1, 1]} : vector<2x8x32xf32> to vector<2x8x8xf32>
    "tpu.trace_start"() <{level = 10 : i32, message = "bqk,bkd->bqd"}> : () -> ()
    %cst_29 = arith.constant dense<0.000000e+00> : vector<2x8x8xf32>
    %45 = tpu.matmul %43, %44, %cst_29 {dimension_numbers = #tpu.dot_dimension_numbers<[2], [1], [1], [2], [0, 0, 0, 1, 1, 2], [0], [0]>} : vector<2x8x8xf32>, vector<2x8x8xf32>, vector<2x8x8xf32> -> vector<2x8x8xf32>
    "tpu.trace_stop"() : () -> ()
    %46 = vector.shape_cast %45 : vector<2x8x8xf32> to vector<16x8xf32>
    %c0_30 = arith.constant 0 : index
    %c0_31 = arith.constant 0 : index
    %47 = vector.load %arg41[%c0_30, %c0_31] : memref<16x32xf32, #tpu.memory_space<vmem>>, vector<16x8xf32>
    tpu.vector_store %arg41[%c0_30, %c0_31], %46 {strides = array<i32>} : memref<16x32xf32, #tpu.memory_space<vmem>>, vector<16x8xf32>,
    %48 = vector.extract_strided_slice %14 {offsets = [0, 0, 8], sizes = [2, 8, 8], strides = [1, 1, 1]} : vector<2x8x32xf32> to vector<2x8x8xf32>
    %49 = vector.extract_strided_slice %20 {offsets = [0, 0, 8], sizes = [2, 8, 8], strides = [1, 1, 1]} : vector<2x8x32xf32> to vector<2x8x8xf32>
    "tpu.trace_start"() <{level = 10 : i32, message = "bqd,bkd->bqk"}> : () -> ()
    %cst_32 = arith.constant dense<0.000000e+00> : vector<2x8x8xf32>
    %50 = tpu.matmul %48, %49, %cst_32 {dimension_numbers = #tpu.dot_dimension_numbers<[2], [2], [1], [1], [0, 0, 0, 1, 1, 1], [0], [0]>} : vector<2x8x8xf32>, vector<2x8x8xf32>, vector<2x8x8xf32> -> vector<2x8x8xf32>
    "tpu.trace_stop"() : () -> ()
    %cst_33 = arith.constant 0.353553385 : f32
    %51 = vector.broadcast %cst_33 : f32 to vector<2x8x8xf32>
    %52 = arith.mulf %50, %51 : vector<2x8x8xf32>
    %53 = vector.broadcast %8 : vector<2x1x8xf32> to vector<2x8x8xf32>
    %54 = arith.addf %52, %53 : vector<2x8x8xf32>
    %cst_34 = arith.constant dense<0xFF800000> : vector<2x8xf32>
    %55 = vector.multi_reduction <maximumf>, %54, %cst_34 [2] : vector<2x8x8xf32> to vector<2x8xf32>
    %56 = vector.shape_cast %55 : vector<2x8xf32> to vector<2x8x1xf32>
    %57 = vector.broadcast %56 : vector<2x8x1xf32> to vector<2x8x8xf32>
    %58 = arith.subf %54, %57 : vector<2x8x8xf32>
    %59 = math.exp %58 : vector<2x8x8xf32>
    %cst_35 = arith.constant dense<0.000000e+00> : vector<2x8xf32>
    %60 = vector.multi_reduction <add>, %59, %cst_35 [2] : vector<2x8x8xf32> to vector<2x8xf32>
    %61 = vector.shape_cast %60 : vector<2x8xf32> to vector<2x8x1xf32>
    %62 = tpu.reciprocal %61 : vector<2x8x1xf32> -> vector<2x8x1xf32>
    %63 = vector.broadcast %62 : vector<2x8x1xf32> to vector<2x8x8xf32>
    %64 = arith.mulf %59, %63 : vector<2x8x8xf32>
    %65 = vector.extract_strided_slice %26 {offsets = [0, 0, 8], sizes = [2, 8, 8], strides = [1, 1, 1]} : vector<2x8x32xf32> to vector<2x8x8xf32>
    "tpu.trace_start"() <{level = 10 : i32, message = "bqk,bkd->bqd"}> : () -> ()
    %cst_36 = arith.constant dense<0.000000e+00> : vector<2x8x8xf32>
    %66 = tpu.matmul %64, %65, %cst_36 {dimension_numbers = #tpu.dot_dimension_numbers<[2], [1], [1], [2], [0, 0, 0, 1, 1, 2], [0], [0]>} : vector<2x8x8xf32>, vector<2x8x8xf32>, vector<2x8x8xf32> -> vector<2x8x8xf32>
    "tpu.trace_stop"() : () -> ()
    %67 = vector.shape_cast %66 : vector<2x8x8xf32> to vector<16x8xf32>
    %c0_37 = arith.constant 0 : index
    %c8 = arith.constant 8 : index
    %68 = vector.load %arg41[%c0_37, %c8] : memref<16x32xf32, #tpu.memory_space<vmem>>, vector<16x8xf32>
    tpu.vector_store %arg41[%c0_37, %c8], %67 {strides = array<i32>} : memref<16x32xf32, #tpu.memory_space<vmem>>, vector<16x8xf32>,
    %69 = vector.extract_strided_slice %14 {offsets = [0, 0, 16], sizes = [2, 8, 8], strides = [1, 1, 1]} : vector<2x8x32xf32> to vector<2x8x8xf32>
    %70 = vector.extract_strided_slice %20 {offsets = [0, 0, 16], sizes = [2, 8, 8], strides = [1, 1, 1]} : vector<2x8x32xf32> to vector<2x8x8xf32>
    "tpu.trace_start"() <{level = 10 : i32, message = "bqd,bkd->bqk"}> : () -> ()
    %cst_38 = arith.constant dense<0.000000e+00> : vector<2x8x8xf32>
    %71 = tpu.matmul %69, %70, %cst_38 {dimension_numbers = #tpu.dot_dimension_numbers<[2], [2], [1], [1], [0, 0, 0, 1, 1, 1], [0], [0]>} : vector<2x8x8xf32>, vector<2x8x8xf32>, vector<2x8x8xf32> -> vector<2x8x8xf32>
    "tpu.trace_stop"() : () -> ()
    %cst_39 = arith.constant 0.353553385 : f32
    %72 = vector.broadcast %cst_39 : f32 to vector<2x8x8xf32>
    %73 = arith.mulf %71, %72 : vector<2x8x8xf32>
    %74 = vector.broadcast %8 : vector<2x1x8xf32> to vector<2x8x8xf32>
    %75 = arith.addf %73, %74 : vector<2x8x8xf32>
    %cst_40 = arith.constant dense<0xFF800000> : vector<2x8xf32>
    %76 = vector.multi_reduction <maximumf>, %75, %cst_40 [2] : vector<2x8x8xf32> to vector<2x8xf32>
    %77 = vector.shape_cast %76 : vector<2x8xf32> to vector<2x8x1xf32>
    %78 = vector.broadcast %77 : vector<2x8x1xf32> to vector<2x8x8xf32>
    %79 = arith.subf %75, %78 : vector<2x8x8xf32>
    %80 = math.exp %79 : vector<2x8x8xf32>
    %cst_41 = arith.constant dense<0.000000e+00> : vector<2x8xf32>
    %81 = vector.multi_reduction <add>, %80, %cst_41 [2] : vector<2x8x8xf32> to vector<2x8xf32>
    %82 = vector.shape_cast %81 : vector<2x8xf32> to vector<2x8x1xf32>
    %83 = tpu.reciprocal %82 : vector<2x8x1xf32> -> vector<2x8x1xf32>
    %84 = vector.broadcast %83 : vector<2x8x1xf32> to vector<2x8x8xf32>
    %85 = arith.mulf %80, %84 : vector<2x8x8xf32>
    %86 = vector.extract_strided_slice %26 {offsets = [0, 0, 16], sizes = [2, 8, 8], strides = [1, 1, 1]} : vector<2x8x32xf32> to vector<2x8x8xf32>
    "tpu.trace_start"() <{level = 10 : i32, message = "bqk,bkd->bqd"}> : () -> ()
    %cst_42 = arith.constant dense<0.000000e+00> : vector<2x8x8xf32>
    %87 = tpu.matmul %85, %86, %cst_42 {dimension_numbers = #tpu.dot_dimension_numbers<[2], [1], [1], [2], [0, 0, 0, 1, 1, 2], [0], [0]>} : vector<2x8x8xf32>, vector<2x8x8xf32>, vector<2x8x8xf32> -> vector<2x8x8xf32>
    "tpu.trace_stop"() : () -> ()
    %88 = vector.shape_cast %87 : vector<2x8x8xf32> to vector<16x8xf32>
    %c0_43 = arith.constant 0 : index
    %c16 = arith.constant 16 : index
    %89 = vector.load %arg41[%c0_43, %c16] : memref<16x32xf32, #tpu.memory_space<vmem>>, vector<16x8xf32>
    tpu.vector_store %arg41[%c0_43, %c16], %88 {strides = array<i32>} : memref<16x32xf32, #tpu.memory_space<vmem>>, vector<16x8xf32>,
    %90 = vector.extract_strided_slice %14 {offsets = [0, 0, 24], sizes = [2, 8, 8], strides = [1, 1, 1]} : vector<2x8x32xf32> to vector<2x8x8xf32>
    %91 = vector.extract_strided_slice %20 {offsets = [0, 0, 24], sizes = [2, 8, 8], strides = [1, 1, 1]} : vector<2x8x32xf32> to vector<2x8x8xf32>
    "tpu.trace_start"() <{level = 10 : i32, message = "bqd,bkd->bqk"}> : () -> ()
    %cst_44 = arith.constant dense<0.000000e+00> : vector<2x8x8xf32>
    %92 = tpu.matmul %90, %91, %cst_44 {dimension_numbers = #tpu.dot_dimension_numbers<[2], [2], [1], [1], [0, 0, 0, 1, 1, 1], [0], [0]>} : vector<2x8x8xf32>, vector<2x8x8xf32>, vector<2x8x8xf32> -> vector<2x8x8xf32>
    "tpu.trace_stop"() : () -> ()
    %cst_45 = arith.constant 0.353553385 : f32
    %93 = vector.broadcast %cst_45 : f32 to vector<2x8x8xf32>
    %94 = arith.mulf %92, %93 : vector<2x8x8xf32>
    %95 = vector.broadcast %8 : vector<2x1x8xf32> to vector<2x8x8xf32>
    %96 = arith.addf %94, %95 : vector<2x8x8xf32>
    %cst_46 = arith.constant dense<0xFF800000> : vector<2x8xf32>
    %97 = vector.multi_reduction <maximumf>, %96, %cst_46 [2] : vector<2x8x8xf32> to vector<2x8xf32>
    %98 = vector.shape_cast %97 : vector<2x8xf32> to vector<2x8x1xf32>
    %99 = vector.broadcast %98 : vector<2x8x1xf32> to vector<2x8x8xf32>
    %100 = arith.subf %96, %99 : vector<2x8x8xf32>
    %101 = math.exp %100 : vector<2x8x8xf32>
    %cst_47 = arith.constant dense<0.000000e+00> : vector<2x8xf32>
    %102 = vector.multi_reduction <add>, %101, %cst_47 [2] : vector<2x8x8xf32> to vector<2x8xf32>
    %103 = vector.shape_cast %102 : vector<2x8xf32> to vector<2x8x1xf32>
    %104 = tpu.reciprocal %103 : vector<2x8x1xf32> -> vector<2x8x1xf32>
    %105 = vector.broadcast %104 : vector<2x8x1xf32> to vector<2x8x8xf32>
    %106 = arith.mulf %101, %105 : vector<2x8x8xf32>
    %107 = vector.extract_strided_slice %26 {offsets = [0, 0, 24], sizes = [2, 8, 8], strides = [1, 1, 1]} : vector<2x8x32xf32> to vector<2x8x8xf32>
    "tpu.trace_start"() <{level = 10 : i32, message = "bqk,bkd->bqd"}> : () -> ()
    %cst_48 = arith.constant dense<0.000000e+00> : vector<2x8x8xf32>
    %108 = tpu.matmul %106, %107, %cst_48 {dimension_numbers = #tpu.dot_dimension_numbers<[2], [1], [1], [2], [0, 0, 0, 1, 1, 2], [0], [0]>} : vector<2x8x8xf32>, vector<2x8x8xf32>, vector<2x8x8xf32> -> vector<2x8x8xf32>
    "tpu.trace_stop"() : () -> ()
    %109 = vector.shape_cast %108 : vector<2x8x8xf32> to vector<16x8xf32>
    %c0_49 = arith.constant 0 : index
    %c24 = arith.constant 24 : index
    %110 = vector.load %arg41[%c0_49, %c24] : memref<16x32xf32, #tpu.memory_space<vmem>>, vector<16x8xf32>
    tpu.vector_store %arg41[%c0_49, %c24], %109 {strides = array<i32>} : memref<16x32xf32, #tpu.memory_space<vmem>>, vector<16x8xf32>,
    %c0_50 = arith.constant 0 : index
    %c0_51 = arith.constant 0 : index
    %111 = vector.load %arg41[%c0_50, %c0_51] : memref<16x32xf32, #tpu.memory_space<vmem>>, vector<16x32xf32>
    %c0_52 = arith.constant 0 : index
    %c0_53 = arith.constant 0 : index
    %112 = vector.load %arg12[%c0_52, %c0_53] : memref<32x32xf32, #tpu.memory_space<vmem>>, vector<32x32xf32>
    %cst_54 = arith.constant dense<0.000000e+00> : vector<16x32xf32>
    %113 = tpu.matmul %111, %112, %cst_54 {dimension_numbers = #tpu.dot_dimension_numbers<[1], [0], [0], [1], [0, 0, 1, 1], [], []>} : vector<16x32xf32>, vector<32x32xf32>, vector<16x32xf32> -> vector<16x32xf32>
    %c0_55 = arith.constant 0 : index
    %c0_56 = arith.constant 0 : index
    %114 = vector.load %arg13[%c0_55, %c0_56] : memref<1x32xf32, #tpu.memory_space<vmem>>, vector<1x32xf32>
    %115 = vector.broadcast %114 : vector<1x32xf32> to vector<16x32xf32>
    %116 = arith.addf %113, %115 : vector<16x32xf32>
    %117 = arith.addf %7, %116 : vector<16x32xf32>
    %cst_57 = arith.constant dense<0.000000e+00> : vector<16xf32>
    %118 = vector.multi_reduction <add>, %117, %cst_57 [1] : vector<16x32xf32> to vector<16xf32>
    %119 = vector.shape_cast %118 : vector<16xf32> to vector<16x1xf32>
    %cst_58 = arith.constant 3.200000e+01 : f32
    %120 = vector.broadcast %cst_58 : f32 to vector<16x1xf32>
    %121 = arith.divf %119, %120 : vector<16x1xf32>
    %122 = arith.mulf %117, %117 : vector<16x32xf32>
    %cst_59 = arith.constant dense<0.000000e+00> : vector<16xf32>
    %123 = vector.multi_reduction <add>, %122, %cst_59 [1] : vector<16x32xf32> to vector<16xf32>
    %124 = vector.shape_cast %123 : vector<16xf32> to vector<16x1xf32>
    %cst_60 = arith.constant 3.200000e+01 : f32
    %125 = vector.broadcast %cst_60 : f32 to vector<16x1xf32>
    %126 = arith.divf %124, %125 : vector<16x1xf32>
    %127 = arith.mulf %121, %121 : vector<16x1xf32>
    %128 = arith.subf %126, %127 : vector<16x1xf32>
    %cst_61 = arith.constant 0.000000e+00 : f32
    %129 = vector.broadcast %cst_61 : f32 to vector<16x1xf32>
    %130 = arith.maximumf %128, %129 : vector<16x1xf32>
    %131 = vector.broadcast %121 : vector<16x1xf32> to vector<16x32xf32>
    %132 = arith.subf %117, %131 : vector<16x32xf32>
    %cst_62 = arith.constant 9.99999974E-6 : f32
    %133 = vector.broadcast %cst_62 : f32 to vector<16x1xf32>
    %134 = arith.addf %130, %133 : vector<16x1xf32>
    %135 = math.rsqrt %134 : vector<16x1xf32>
    %136 = vector.broadcast %135 : vector<16x1xf32> to vector<16x32xf32>
    %137 = arith.mulf %132, %136 : vector<16x32xf32>
    %c0_63 = arith.constant 0 : index
    %c0_64 = arith.constant 0 : index
    %138 = vector.load %arg14[%c0_63, %c0_64] : memref<1x32xf32, #tpu.memory_space<vmem>>, vector<1x32xf32>
    %139 = vector.broadcast %138 : vector<1x32xf32> to vector<16x32xf32>
    %140 = arith.mulf %137, %139 : vector<16x32xf32>
    %c0_65 = arith.constant 0 : index
    %c0_66 = arith.constant 0 : index
    %141 = vector.load %arg15[%c0_65, %c0_66] : memref<1x32xf32, #tpu.memory_space<vmem>>, vector<1x32xf32>
    %142 = vector.broadcast %141 : vector<1x32xf32> to vector<16x32xf32>
    %143 = arith.addf %140, %142 : vector<16x32xf32>
    %c0_67 = arith.constant 0 : index
    %c0_68 = arith.constant 0 : index
    %144 = vector.load %arg16[%c0_67, %c0_68] : memref<32x2048xf32, #tpu.memory_space<vmem>>, vector<32x2048xf32>
    %c0_69 = arith.constant 0 : index
    %c0_70 = arith.constant 0 : index
    %145 = vector.load %arg18[%c0_69, %c0_70] : memref<2048x32xf32, #tpu.memory_space<vmem>>, vector<2048x32xf32>
    %cst_71 = arith.constant dense<0.000000e+00> : vector<16x2048xf32>
    %146 = tpu.matmul %143, %144, %cst_71 {dimension_numbers = #tpu.dot_dimension_numbers<[1], [0], [0], [1], [0, 0, 1, 1], [], []>} : vector<16x32xf32>, vector<32x2048xf32>, vector<16x2048xf32> -> vector<16x2048xf32>
    %c0_72 = arith.constant 0 : index
    %c0_73 = arith.constant 0 : index
    %147 = vector.load %arg17[%c0_72, %c0_73] : memref<1x2048xf32, #tpu.memory_space<vmem>>, vector<1x2048xf32>
    %148 = vector.broadcast %147 : vector<1x2048xf32> to vector<16x2048xf32>
    %149 = arith.addf %146, %148 : vector<16x2048xf32>
    %cst_74 = arith.constant 0.000000e+00 : f32
    %150 = vector.broadcast %cst_74 : f32 to vector<16x2048xf32>
    %151 = arith.maximumf %149, %150 : vector<16x2048xf32>
    %cst_75 = arith.constant dense<0.000000e+00> : vector<16x32xf32>
    %152 = tpu.matmul %151, %145, %cst_75 {dimension_numbers = #tpu.dot_dimension_numbers<[1], [0], [0], [1], [0, 0, 1, 1], [], []>} : vector<16x2048xf32>, vector<2048x32xf32>, vector<16x32xf32> -> vector<16x32xf32>
    %c0_76 = arith.constant 0 : index
    %c0_77 = arith.constant 0 : index
    %153 = vector.load %arg19[%c0_76, %c0_77] : memref<1x32xf32, #tpu.memory_space<vmem>>, vector<1x32xf32>
    %154 = vector.broadcast %153 : vector<1x32xf32> to vector<16x32xf32>
    %155 = arith.addf %152, %154 : vector<16x32xf32>
    %156 = arith.addf %143, %155 : vector<16x32xf32>
    %cst_78 = arith.constant dense<0.000000e+00> : vector<16xf32>
    %157 = vector.multi_reduction <add>, %156, %cst_78 [1] : vector<16x32xf32> to vector<16xf32>
    %158 = vector.shape_cast %157 : vector<16xf32> to vector<16x1xf32>
    %cst_79 = arith.constant 3.200000e+01 : f32
    %159 = vector.broadcast %cst_79 : f32 to vector<16x1xf32>
    %160 = arith.divf %158, %159 : vector<16x1xf32>
    %161 = arith.mulf %156, %156 : vector<16x32xf32>
    %cst_80 = arith.constant dense<0.000000e+00> : vector<16xf32>
    %162 = vector.multi_reduction <add>, %161, %cst_80 [1] : vector<16x32xf32> to vector<16xf32>
    %163 = vector.shape_cast %162 : vector<16xf32> to vector<16x1xf32>
    %cst_81 = arith.constant 3.200000e+01 : f32
    %164 = vector.broadcast %cst_81 : f32 to vector<16x1xf32>
    %165 = arith.divf %163, %164 : vector<16x1xf32>
    %166 = arith.mulf %160, %160 : vector<16x1xf32>
    %167 = arith.subf %165, %166 : vector<16x1xf32>
    %cst_82 = arith.constant 0.000000e+00 : f32
    %168 = vector.broadcast %cst_82 : f32 to vector<16x1xf32>
    %169 = arith.maximumf %167, %168 : vector<16x1xf32>
    %170 = vector.broadcast %160 : vector<16x1xf32> to vector<16x32xf32>
    %171 = arith.subf %156, %170 : vector<16x32xf32>
    %cst_83 = arith.constant 9.99999974E-6 : f32
    %172 = vector.broadcast %cst_83 : f32 to vector<16x1xf32>
    %173 = arith.addf %169, %172 : vector<16x1xf32>
    %174 = math.rsqrt %173 : vector<16x1xf32>
    %175 = vector.broadcast %174 : vector<16x1xf32> to vector<16x32xf32>
    %176 = arith.mulf %171, %175 : vector<16x32xf32>
    %c0_84 = arith.constant 0 : index
    %c0_85 = arith.constant 0 : index
    %177 = vector.load %arg20[%c0_84, %c0_85] : memref<1x32xf32, #tpu.memory_space<vmem>>, vector<1x32xf32>
    %178 = vector.broadcast %177 : vector<1x32xf32> to vector<16x32xf32>
    %179 = arith.mulf %176, %178 : vector<16x32xf32>
    %c0_86 = arith.constant 0 : index
    %c0_87 = arith.constant 0 : index
    %180 = vector.load %arg21[%c0_86, %c0_87] : memref<1x32xf32, #tpu.memory_space<vmem>>, vector<1x32xf32>
    %181 = vector.broadcast %180 : vector<1x32xf32> to vector<16x32xf32>
    %182 = arith.addf %179, %181 : vector<16x32xf32>
    %c0_88 = arith.constant 0 : index
    %c0_89 = arith.constant 0 : index
    %183 = vector.load %arg22[%c0_88, %c0_89] : memref<32x32xf32, #tpu.memory_space<vmem>>, vector<32x32xf32>
    %cst_90 = arith.constant dense<0.000000e+00> : vector<16x32xf32>
    %184 = tpu.matmul %182, %183, %cst_90 {dimension_numbers = #tpu.dot_dimension_numbers<[1], [0], [0], [1], [0, 0, 1, 1], [], []>} : vector<16x32xf32>, vector<32x32xf32>, vector<16x32xf32> -> vector<16x32xf32>
    %c0_91 = arith.constant 0 : index
    %c0_92 = arith.constant 0 : index
    %185 = vector.load %arg23[%c0_91, %c0_92] : memref<1x32xf32, #tpu.memory_space<vmem>>, vector<1x32xf32>
    %186 = vector.broadcast %185 : vector<1x32xf32> to vector<16x32xf32>
    %187 = arith.addf %184, %186 : vector<16x32xf32>
    %188 = vector.shape_cast %187 : vector<16x32xf32> to vector<2x8x32xf32>
    %c0_93 = arith.constant 0 : index
    %c0_94 = arith.constant 0 : index
    %189 = vector.load %arg24[%c0_93, %c0_94] : memref<32x32xf32, #tpu.memory_space<vmem>>, vector<32x32xf32>
    %cst_95 = arith.constant dense<0.000000e+00> : vector<16x32xf32>
    %190 = tpu.matmul %182, %189, %cst_95 {dimension_numbers = #tpu.dot_dimension_numbers<[1], [0], [0], [1], [0, 0, 1, 1], [], []>} : vector<16x32xf32>, vector<32x32xf32>, vector<16x32xf32> -> vector<16x32xf32>
    %c0_96 = arith.constant 0 : index
    %c0_97 = arith.constant 0 : index
    %191 = vector.load %arg25[%c0_96, %c0_97] : memref<1x32xf32, #tpu.memory_space<vmem>>, vector<1x32xf32>
    %192 = vector.broadcast %191 : vector<1x32xf32> to vector<16x32xf32>
    %193 = arith.addf %190, %192 : vector<16x32xf32>
    %194 = vector.shape_cast %193 : vector<16x32xf32> to vector<2x8x32xf32>
    %c0_98 = arith.constant 0 : index
    %c0_99 = arith.constant 0 : index
    %195 = vector.load %arg26[%c0_98, %c0_99] : memref<32x32xf32, #tpu.memory_space<vmem>>, vector<32x32xf32>
    %cst_100 = arith.constant dense<0.000000e+00> : vector<16x32xf32>
    %196 = tpu.matmul %182, %195, %cst_100 {dimension_numbers = #tpu.dot_dimension_numbers<[1], [0], [0], [1], [0, 0, 1, 1], [], []>} : vector<16x32xf32>, vector<32x32xf32>, vector<16x32xf32> -> vector<16x32xf32>
    %c0_101 = arith.constant 0 : index
    %c0_102 = arith.constant 0 : index
    %197 = vector.load %arg27[%c0_101, %c0_102] : memref<1x32xf32, #tpu.memory_space<vmem>>, vector<1x32xf32>
    %198 = vector.broadcast %197 : vector<1x32xf32> to vector<16x32xf32>
    %199 = arith.addf %196, %198 : vector<16x32xf32>
    %200 = vector.shape_cast %199 : vector<16x32xf32> to vector<2x8x32xf32>
    %201 = vector.extract_strided_slice %188 {offsets = [0, 0, 0], sizes = [2, 8, 8], strides = [1, 1, 1]} : vector<2x8x32xf32> to vector<2x8x8xf32>
    %202 = vector.extract_strided_slice %194 {offsets = [0, 0, 0], sizes = [2, 8, 8], strides = [1, 1, 1]} : vector<2x8x32xf32> to vector<2x8x8xf32>
    "tpu.trace_start"() <{level = 10 : i32, message = "bqd,bkd->bqk"}> : () -> ()
    %cst_103 = arith.constant dense<0.000000e+00> : vector<2x8x8xf32>
    %203 = tpu.matmul %201, %202, %cst_103 {dimension_numbers = #tpu.dot_dimension_numbers<[2], [2], [1], [1], [0, 0, 0, 1, 1, 1], [0], [0]>} : vector<2x8x8xf32>, vector<2x8x8xf32>, vector<2x8x8xf32> -> vector<2x8x8xf32>
    "tpu.trace_stop"() : () -> ()
    %cst_104 = arith.constant 0.353553385 : f32
    %204 = vector.broadcast %cst_104 : f32 to vector<2x8x8xf32>
    %205 = arith.mulf %203, %204 : vector<2x8x8xf32>
    %206 = vector.broadcast %8 : vector<2x1x8xf32> to vector<2x8x8xf32>
    %207 = arith.addf %205, %206 : vector<2x8x8xf32>
    %cst_105 = arith.constant dense<0xFF800000> : vector<2x8xf32>
    %208 = vector.multi_reduction <maximumf>, %207, %cst_105 [2] : vector<2x8x8xf32> to vector<2x8xf32>
    %209 = vector.shape_cast %208 : vector<2x8xf32> to vector<2x8x1xf32>
    %210 = vector.broadcast %209 : vector<2x8x1xf32> to vector<2x8x8xf32>
    %211 = arith.subf %207, %210 : vector<2x8x8xf32>
    %212 = math.exp %211 : vector<2x8x8xf32>
    %cst_106 = arith.constant dense<0.000000e+00> : vector<2x8xf32>
    %213 = vector.multi_reduction <add>, %212, %cst_106 [2] : vector<2x8x8xf32> to vector<2x8xf32>
    %214 = vector.shape_cast %213 : vector<2x8xf32> to vector<2x8x1xf32>
    %215 = tpu.reciprocal %214 : vector<2x8x1xf32> -> vector<2x8x1xf32>
    %216 = vector.broadcast %215 : vector<2x8x1xf32> to vector<2x8x8xf32>
    %217 = arith.mulf %212, %216 : vector<2x8x8xf32>
    %218 = vector.extract_strided_slice %200 {offsets = [0, 0, 0], sizes = [2, 8, 8], strides = [1, 1, 1]} : vector<2x8x32xf32> to vector<2x8x8xf32>
    "tpu.trace_start"() <{level = 10 : i32, message = "bqk,bkd->bqd"}> : () -> ()
    %cst_107 = arith.constant dense<0.000000e+00> : vector<2x8x8xf32>
    %219 = tpu.matmul %217, %218, %cst_107 {dimension_numbers = #tpu.dot_dimension_numbers<[2], [1], [1], [2], [0, 0, 0, 1, 1, 2], [0], [0]>} : vector<2x8x8xf32>, vector<2x8x8xf32>, vector<2x8x8xf32> -> vector<2x8x8xf32>
    "tpu.trace_stop"() : () -> ()
    %220 = vector.shape_cast %219 : vector<2x8x8xf32> to vector<16x8xf32>
    %c0_108 = arith.constant 0 : index
    %c0_109 = arith.constant 0 : index
    %221 = vector.load %arg41[%c0_108, %c0_109] : memref<16x32xf32, #tpu.memory_space<vmem>>, vector<16x8xf32>
    tpu.vector_store %arg41[%c0_108, %c0_109], %220 {strides = array<i32>} : memref<16x32xf32, #tpu.memory_space<vmem>>, vector<16x8xf32>,
    %222 = vector.extract_strided_slice %188 {offsets = [0, 0, 8], sizes = [2, 8, 8], strides = [1, 1, 1]} : vector<2x8x32xf32> to vector<2x8x8xf32>
    %223 = vector.extract_strided_slice %194 {offsets = [0, 0, 8], sizes = [2, 8, 8], strides = [1, 1, 1]} : vector<2x8x32xf32> to vector<2x8x8xf32>
    "tpu.trace_start"() <{level = 10 : i32, message = "bqd,bkd->bqk"}> : () -> ()
    %cst_110 = arith.constant dense<0.000000e+00> : vector<2x8x8xf32>
    %224 = tpu.matmul %222, %223, %cst_110 {dimension_numbers = #tpu.dot_dimension_numbers<[2], [2], [1], [1], [0, 0, 0, 1, 1, 1], [0], [0]>} : vector<2x8x8xf32>, vector<2x8x8xf32>, vector<2x8x8xf32> -> vector<2x8x8xf32>
    "tpu.trace_stop"() : () -> ()
    %cst_111 = arith.constant 0.353553385 : f32
    %225 = vector.broadcast %cst_111 : f32 to vector<2x8x8xf32>
    %226 = arith.mulf %224, %225 : vector<2x8x8xf32>
    %227 = vector.broadcast %8 : vector<2x1x8xf32> to vector<2x8x8xf32>
    %228 = arith.addf %226, %227 : vector<2x8x8xf32>
    %cst_112 = arith.constant dense<0xFF800000> : vector<2x8xf32>
    %229 = vector.multi_reduction <maximumf>, %228, %cst_112 [2] : vector<2x8x8xf32> to vector<2x8xf32>
    %230 = vector.shape_cast %229 : vector<2x8xf32> to vector<2x8x1xf32>
    %231 = vector.broadcast %230 : vector<2x8x1xf32> to vector<2x8x8xf32>
    %232 = arith.subf %228, %231 : vector<2x8x8xf32>
    %233 = math.exp %232 : vector<2x8x8xf32>
    %cst_113 = arith.constant dense<0.000000e+00> : vector<2x8xf32>
    %234 = vector.multi_reduction <add>, %233, %cst_113 [2] : vector<2x8x8xf32> to vector<2x8xf32>
    %235 = vector.shape_cast %234 : vector<2x8xf32> to vector<2x8x1xf32>
    %236 = tpu.reciprocal %235 : vector<2x8x1xf32> -> vector<2x8x1xf32>
    %237 = vector.broadcast %236 : vector<2x8x1xf32> to vector<2x8x8xf32>
    %238 = arith.mulf %233, %237 : vector<2x8x8xf32>
    %239 = vector.extract_strided_slice %200 {offsets = [0, 0, 8], sizes = [2, 8, 8], strides = [1, 1, 1]} : vector<2x8x32xf32> to vector<2x8x8xf32>
    "tpu.trace_start"() <{level = 10 : i32, message = "bqk,bkd->bqd"}> : () -> ()
    %cst_114 = arith.constant dense<0.000000e+00> : vector<2x8x8xf32>
    %240 = tpu.matmul %238, %239, %cst_114 {dimension_numbers = #tpu.dot_dimension_numbers<[2], [1], [1], [2], [0, 0, 0, 1, 1, 2], [0], [0]>} : vector<2x8x8xf32>, vector<2x8x8xf32>, vector<2x8x8xf32> -> vector<2x8x8xf32>
    "tpu.trace_stop"() : () -> ()
    %241 = vector.shape_cast %240 : vector<2x8x8xf32> to vector<16x8xf32>
    %c0_115 = arith.constant 0 : index
    %c8_116 = arith.constant 8 : index
    %242 = vector.load %arg41[%c0_115, %c8_116] : memref<16x32xf32, #tpu.memory_space<vmem>>, vector<16x8xf32>
    tpu.vector_store %arg41[%c0_115, %c8_116], %241 {strides = array<i32>} : memref<16x32xf32, #tpu.memory_space<vmem>>, vector<16x8xf32>,
    %243 = vector.extract_strided_slice %188 {offsets = [0, 0, 16], sizes = [2, 8, 8], strides = [1, 1, 1]} : vector<2x8x32xf32> to vector<2x8x8xf32>
    %244 = vector.extract_strided_slice %194 {offsets = [0, 0, 16], sizes = [2, 8, 8], strides = [1, 1, 1]} : vector<2x8x32xf32> to vector<2x8x8xf32>
    "tpu.trace_start"() <{level = 10 : i32, message = "bqd,bkd->bqk"}> : () -> ()
    %cst_117 = arith.constant dense<0.000000e+00> : vector<2x8x8xf32>
    %245 = tpu.matmul %243, %244, %cst_117 {dimension_numbers = #tpu.dot_dimension_numbers<[2], [2], [1], [1], [0, 0, 0, 1, 1, 1], [0], [0]>} : vector<2x8x8xf32>, vector<2x8x8xf32>, vector<2x8x8xf32> -> vector<2x8x8xf32>
    "tpu.trace_stop"() : () -> ()
    %cst_118 = arith.constant 0.353553385 : f32
    %246 = vector.broadcast %cst_118 : f32 to vector<2x8x8xf32>
    %247 = arith.mulf %245, %246 : vector<2x8x8xf32>
    %248 = vector.broadcast %8 : vector<2x1x8xf32> to vector<2x8x8xf32>
    %249 = arith.addf %247, %248 : vector<2x8x8xf32>
    %cst_119 = arith.constant dense<0xFF800000> : vector<2x8xf32>
    %250 = vector.multi_reduction <maximumf>, %249, %cst_119 [2] : vector<2x8x8xf32> to vector<2x8xf32>
    %251 = vector.shape_cast %250 : vector<2x8xf32> to vector<2x8x1xf32>
    %252 = vector.broadcast %251 : vector<2x8x1xf32> to vector<2x8x8xf32>
    %253 = arith.subf %249, %252 : vector<2x8x8xf32>
    %254 = math.exp %253 : vector<2x8x8xf32>
    %cst_120 = arith.constant dense<0.000000e+00> : vector<2x8xf32>
    %255 = vector.multi_reduction <add>, %254, %cst_120 [2] : vector<2x8x8xf32> to vector<2x8xf32>
    %256 = vector.shape_cast %255 : vector<2x8xf32> to vector<2x8x1xf32>
    %257 = tpu.reciprocal %256 : vector<2x8x1xf32> -> vector<2x8x1xf32>
    %258 = vector.broadcast %257 : vector<2x8x1xf32> to vector<2x8x8xf32>
    %259 = arith.mulf %254, %258 : vector<2x8x8xf32>
    %260 = vector.extract_strided_slice %200 {offsets = [0, 0, 16], sizes = [2, 8, 8], strides = [1, 1, 1]} : vector<2x8x32xf32> to vector<2x8x8xf32>
    "tpu.trace_start"() <{level = 10 : i32, message = "bqk,bkd->bqd"}> : () -> ()
    %cst_121 = arith.constant dense<0.000000e+00> : vector<2x8x8xf32>
    %261 = tpu.matmul %259, %260, %cst_121 {dimension_numbers = #tpu.dot_dimension_numbers<[2], [1], [1], [2], [0, 0, 0, 1, 1, 2], [0], [0]>} : vector<2x8x8xf32>, vector<2x8x8xf32>, vector<2x8x8xf32> -> vector<2x8x8xf32>
    "tpu.trace_stop"() : () -> ()
    %262 = vector.shape_cast %261 : vector<2x8x8xf32> to vector<16x8xf32>
    %c0_122 = arith.constant 0 : index
    %c16_123 = arith.constant 16 : index
    %263 = vector.load %arg41[%c0_122, %c16_123] : memref<16x32xf32, #tpu.memory_space<vmem>>, vector<16x8xf32>
    tpu.vector_store %arg41[%c0_122, %c16_123], %262 {strides = array<i32>} : memref<16x32xf32, #tpu.memory_space<vmem>>, vector<16x8xf32>,
    %264 = vector.extract_strided_slice %188 {offsets = [0, 0, 24], sizes = [2, 8, 8], strides = [1, 1, 1]} : vector<2x8x32xf32> to vector<2x8x8xf32>
    %265 = vector.extract_strided_slice %194 {offsets = [0, 0, 24], sizes = [2, 8, 8], strides = [1, 1, 1]} : vector<2x8x32xf32> to vector<2x8x8xf32>
    "tpu.trace_start"() <{level = 10 : i32, message = "bqd,bkd->bqk"}> : () -> ()
    %cst_124 = arith.constant dense<0.000000e+00> : vector<2x8x8xf32>
    %266 = tpu.matmul %264, %265, %cst_124 {dimension_numbers = #tpu.dot_dimension_numbers<[2], [2], [1], [1], [0, 0, 0, 1, 1, 1], [0], [0]>} : vector<2x8x8xf32>, vector<2x8x8xf32>, vector<2x8x8xf32> -> vector<2x8x8xf32>
    "tpu.trace_stop"() : () -> ()
    %cst_125 = arith.constant 0.353553385 : f32
    %267 = vector.broadcast %cst_125 : f32 to vector<2x8x8xf32>
    %268 = arith.mulf %266, %267 : vector<2x8x8xf32>
    %269 = vector.broadcast %8 : vector<2x1x8xf32> to vector<2x8x8xf32>
    %270 = arith.addf %268, %269 : vector<2x8x8xf32>
    %cst_126 = arith.constant dense<0xFF800000> : vector<2x8xf32>
    %271 = vector.multi_reduction <maximumf>, %270, %cst_126 [2] : vector<2x8x8xf32> to vector<2x8xf32>
    %272 = vector.shape_cast %271 : vector<2x8xf32> to vector<2x8x1xf32>
    %273 = vector.broadcast %272 : vector<2x8x1xf32> to vector<2x8x8xf32>
    %274 = arith.subf %270, %273 : vector<2x8x8xf32>
    %275 = math.exp %274 : vector<2x8x8xf32>
    %cst_127 = arith.constant dense<0.000000e+00> : vector<2x8xf32>
    %276 = vector.multi_reduction <add>, %275, %cst_127 [2] : vector<2x8x8xf32> to vector<2x8xf32>
    %277 = vector.shape_cast %276 : vector<2x8xf32> to vector<2x8x1xf32>
    %278 = tpu.reciprocal %277 : vector<2x8x1xf32> -> vector<2x8x1xf32>
    %279 = vector.broadcast %278 : vector<2x8x1xf32> to vector<2x8x8xf32>
    %280 = arith.mulf %275, %279 : vector<2x8x8xf32>
    %281 = vector.extract_strided_slice %200 {offsets = [0, 0, 24], sizes = [2, 8, 8], strides = [1, 1, 1]} : vector<2x8x32xf32> to vector<2x8x8xf32>
    "tpu.trace_start"() <{level = 10 : i32, message = "bqk,bkd->bqd"}> : () -> ()
    %cst_128 = arith.constant dense<0.000000e+00> : vector<2x8x8xf32>
    %282 = tpu.matmul %280, %281, %cst_128 {dimension_numbers = #tpu.dot_dimension_numbers<[2], [1], [1], [2], [0, 0, 0, 1, 1, 2], [0], [0]>} : vector<2x8x8xf32>, vector<2x8x8xf32>, vector<2x8x8xf32> -> vector<2x8x8xf32>
    "tpu.trace_stop"() : () -> ()
    %283 = vector.shape_cast %282 : vector<2x8x8xf32> to vector<16x8xf32>
    %c0_129 = arith.constant 0 : index
    %c24_130 = arith.constant 24 : index
    %284 = vector.load %arg41[%c0_129, %c24_130] : memref<16x32xf32, #tpu.memory_space<vmem>>, vector<16x8xf32>
    tpu.vector_store %arg41[%c0_129, %c24_130], %283 {strides = array<i32>} : memref<16x32xf32, #tpu.memory_space<vmem>>, vector<16x8xf32>,
    %c0_131 = arith.constant 0 : index
    %c0_132 = arith.constant 0 : index
    %285 = vector.load %arg41[%c0_131, %c0_132] : memref<16x32xf32, #tpu.memory_space<vmem>>, vector<16x32xf32>
    %c0_133 = arith.constant 0 : index
    %c0_134 = arith.constant 0 : index
    %286 = vector.load %arg28[%c0_133, %c0_134] : memref<32x32xf32, #tpu.memory_space<vmem>>, vector<32x32xf32>
    %cst_135 = arith.constant dense<0.000000e+00> : vector<16x32xf32>
    %287 = tpu.matmul %285, %286, %cst_135 {dimension_numbers = #tpu.dot_dimension_numbers<[1], [0], [0], [1], [0, 0, 1, 1], [], []>} : vector<16x32xf32>, vector<32x32xf32>, vector<16x32xf32> -> vector<16x32xf32>
    %c0_136 = arith.constant 0 : index
    %c0_137 = arith.constant 0 : index
    %288 = vector.load %arg29[%c0_136, %c0_137] : memref<1x32xf32, #tpu.memory_space<vmem>>, vector<1x32xf32>
    %289 = vector.broadcast %288 : vector<1x32xf32> to vector<16x32xf32>
    %290 = arith.addf %287, %289 : vector<16x32xf32>
    %291 = arith.addf %182, %290 : vector<16x32xf32>
    %cst_138 = arith.constant dense<0.000000e+00> : vector<16xf32>
    %292 = vector.multi_reduction <add>, %291, %cst_138 [1] : vector<16x32xf32> to vector<16xf32>
    %293 = vector.shape_cast %292 : vector<16xf32> to vector<16x1xf32>
    %cst_139 = arith.constant 3.200000e+01 : f32
    %294 = vector.broadcast %cst_139 : f32 to vector<16x1xf32>
    %295 = arith.divf %293, %294 : vector<16x1xf32>
    %296 = arith.mulf %291, %291 : vector<16x32xf32>
    %cst_140 = arith.constant dense<0.000000e+00> : vector<16xf32>
    %297 = vector.multi_reduction <add>, %296, %cst_140 [1] : vector<16x32xf32> to vector<16xf32>
    %298 = vector.shape_cast %297 : vector<16xf32> to vector<16x1xf32>
    %cst_141 = arith.constant 3.200000e+01 : f32
    %299 = vector.broadcast %cst_141 : f32 to vector<16x1xf32>
    %300 = arith.divf %298, %299 : vector<16x1xf32>
    %301 = arith.mulf %295, %295 : vector<16x1xf32>
    %302 = arith.subf %300, %301 : vector<16x1xf32>
    %cst_142 = arith.constant 0.000000e+00 : f32
    %303 = vector.broadcast %cst_142 : f32 to vector<16x1xf32>
    %304 = arith.maximumf %302, %303 : vector<16x1xf32>
    %305 = vector.broadcast %295 : vector<16x1xf32> to vector<16x32xf32>
    %306 = arith.subf %291, %305 : vector<16x32xf32>
    %cst_143 = arith.constant 9.99999974E-6 : f32
    %307 = vector.broadcast %cst_143 : f32 to vector<16x1xf32>
    %308 = arith.addf %304, %307 : vector<16x1xf32>
    %309 = math.rsqrt %308 : vector<16x1xf32>
    %310 = vector.broadcast %309 : vector<16x1xf32> to vector<16x32xf32>
    %311 = arith.mulf %306, %310 : vector<16x32xf32>
    %c0_144 = arith.constant 0 : index
    %c0_145 = arith.constant 0 : index
    %312 = vector.load %arg30[%c0_144, %c0_145] : memref<1x32xf32, #tpu.memory_space<vmem>>, vector<1x32xf32>
    %313 = vector.broadcast %312 : vector<1x32xf32> to vector<16x32xf32>
    %314 = arith.mulf %311, %313 : vector<16x32xf32>
    %c0_146 = arith.constant 0 : index
    %c0_147 = arith.constant 0 : index
    %315 = vector.load %arg31[%c0_146, %c0_147] : memref<1x32xf32, #tpu.memory_space<vmem>>, vector<1x32xf32>
    %316 = vector.broadcast %315 : vector<1x32xf32> to vector<16x32xf32>
    %317 = arith.addf %314, %316 : vector<16x32xf32>
    %c0_148 = arith.constant 0 : index
    %c0_149 = arith.constant 0 : index
    %318 = vector.load %arg32[%c0_148, %c0_149] : memref<32x2048xf32, #tpu.memory_space<vmem>>, vector<32x2048xf32>
    %c0_150 = arith.constant 0 : index
    %c0_151 = arith.constant 0 : index
    %319 = vector.load %arg34[%c0_150, %c0_151] : memref<2048x32xf32, #tpu.memory_space<vmem>>, vector<2048x32xf32>
    %cst_152 = arith.constant dense<0.000000e+00> : vector<16x2048xf32>
    %320 = tpu.matmul %317, %318, %cst_152 {dimension_numbers = #tpu.dot_dimension_numbers<[1], [0], [0], [1], [0, 0, 1, 1], [], []>} : vector<16x32xf32>, vector<32x2048xf32>, vector<16x2048xf32> -> vector<16x2048xf32>
    %c0_153 = arith.constant 0 : index
    %c0_154 = arith.constant 0 : index
    %321 = vector.load %arg33[%c0_153, %c0_154] : memref<1x2048xf32, #tpu.memory_space<vmem>>, vector<1x2048xf32>
    %322 = vector.broadcast %321 : vector<1x2048xf32> to vector<16x2048xf32>
    %323 = arith.addf %320, %322 : vector<16x2048xf32>
    %cst_155 = arith.constant 0.000000e+00 : f32
    %324 = vector.broadcast %cst_155 : f32 to vector<16x2048xf32>
    %325 = arith.maximumf %323, %324 : vector<16x2048xf32>
    %cst_156 = arith.constant dense<0.000000e+00> : vector<16x32xf32>
    %326 = tpu.matmul %325, %319, %cst_156 {dimension_numbers = #tpu.dot_dimension_numbers<[1], [0], [0], [1], [0, 0, 1, 1], [], []>} : vector<16x2048xf32>, vector<2048x32xf32>, vector<16x32xf32> -> vector<16x32xf32>
    %c0_157 = arith.constant 0 : index
    %c0_158 = arith.constant 0 : index
    %327 = vector.load %arg35[%c0_157, %c0_158] : memref<1x32xf32, #tpu.memory_space<vmem>>, vector<1x32xf32>
    %328 = vector.broadcast %327 : vector<1x32xf32> to vector<16x32xf32>
    %329 = arith.addf %326, %328 : vector<16x32xf32>
    %330 = arith.addf %317, %329 : vector<16x32xf32>
    %cst_159 = arith.constant dense<0.000000e+00> : vector<16xf32>
    %331 = vector.multi_reduction <add>, %330, %cst_159 [1] : vector<16x32xf32> to vector<16xf32>
    %332 = vector.shape_cast %331 : vector<16xf32> to vector<16x1xf32>
    %cst_160 = arith.constant 3.200000e+01 : f32
    %333 = vector.broadcast %cst_160 : f32 to vector<16x1xf32>
    %334 = arith.divf %332, %333 : vector<16x1xf32>
    %335 = arith.mulf %330, %330 : vector<16x32xf32>
    %cst_161 = arith.constant dense<0.000000e+00> : vector<16xf32>
    %336 = vector.multi_reduction <add>, %335, %cst_161 [1] : vector<16x32xf32> to vector<16xf32>
    %337 = vector.shape_cast %336 : vector<16xf32> to vector<16x1xf32>
    %cst_162 = arith.constant 3.200000e+01 : f32
    %338 = vector.broadcast %cst_162 : f32 to vector<16x1xf32>
    %339 = arith.divf %337, %338 : vector<16x1xf32>
    %340 = arith.mulf %334, %334 : vector<16x1xf32>
    %341 = arith.subf %339, %340 : vector<16x1xf32>
    %cst_163 = arith.constant 0.000000e+00 : f32
    %342 = vector.broadcast %cst_163 : f32 to vector<16x1xf32>
    %343 = arith.maximumf %341, %342 : vector<16x1xf32>
    %344 = vector.broadcast %334 : vector<16x1xf32> to vector<16x32xf32>
    %345 = arith.subf %330, %344 : vector<16x32xf32>
    %cst_164 = arith.constant 9.99999974E-6 : f32
    %346 = vector.broadcast %cst_164 : f32 to vector<16x1xf32>
    %347 = arith.addf %343, %346 : vector<16x1xf32>
    %348 = math.rsqrt %347 : vector<16x1xf32>
    %349 = vector.broadcast %348 : vector<16x1xf32> to vector<16x32xf32>
    %350 = arith.mulf %345, %349 : vector<16x32xf32>
    %c0_165 = arith.constant 0 : index
    %c0_166 = arith.constant 0 : index
    %351 = vector.load %arg36[%c0_165, %c0_166] : memref<1x32xf32, #tpu.memory_space<vmem>>, vector<1x32xf32>
    %352 = vector.broadcast %351 : vector<1x32xf32> to vector<16x32xf32>
    %353 = arith.mulf %350, %352 : vector<16x32xf32>
    %c0_167 = arith.constant 0 : index
    %c0_168 = arith.constant 0 : index
    %354 = vector.load %arg37[%c0_167, %c0_168] : memref<1x32xf32, #tpu.memory_space<vmem>>, vector<1x32xf32>
    %355 = vector.broadcast %354 : vector<1x32xf32> to vector<16x32xf32>
    %356 = arith.addf %353, %355 : vector<16x32xf32>
    %c0_169 = arith.constant 0 : index
    %c0_170 = arith.constant 0 : index
    %357 = vector.load %arg38[%c0_169, %c0_170] : memref<32x128xf32, #tpu.memory_space<vmem>>, vector<32x128xf32>
    %cst_171 = arith.constant dense<0.000000e+00> : vector<16x128xf32>
    %358 = tpu.matmul %356, %357, %cst_171 {dimension_numbers = #tpu.dot_dimension_numbers<[1], [0], [0], [1], [0, 0, 1, 1], [], []>} : vector<16x32xf32>, vector<32x128xf32>, vector<16x128xf32> -> vector<16x128xf32>
    %c0_172 = arith.constant 0 : index
    %c0_173 = arith.constant 0 : index
    %359 = vector.load %arg39[%c0_172, %c0_173] : memref<1x128xf32, #tpu.memory_space<vmem>>, vector<1x128xf32>
    %360 = vector.broadcast %359 : vector<1x128xf32> to vector<16x128xf32>
    %361 = arith.addf %358, %360 : vector<16x128xf32>
    %c0_174 = arith.constant 0 : index
    %c0_175 = arith.constant 0 : index
    %362 = vector.load %arg40[%c0_174, %c0_175] : memref<16x128xf32, #tpu.memory_space<vmem>>, vector<16x128xf32>
    tpu.vector_store %arg40[%c0_174, %c0_175], %361 {strides = array<i32>} : memref<16x128xf32, #tpu.memory_space<vmem>>, vector<16x128xf32>,
    return
  }
  func.func @transform_0(%arg0: i32) -> (i32, i32) {
    %c0_i32 = arith.constant 0 : i32
    %c0_i32_0 = arith.constant 0 : i32
    return %arg0, %c0_i32 : i32, i32
  }
  func.func @transform_1(%arg0: i32) -> (i32, i32, i32) {
    %c0_i32 = arith.constant 0 : i32
    %c0_i32_0 = arith.constant 0 : i32
    %c0_i32_1 = arith.constant 0 : i32
    return %arg0, %c0_i32, %c0_i32_0 : i32, i32, i32
  }
  func.func @transform_2(%arg0: i32) -> (i32, i32) {
    %c0_i32 = arith.constant 0 : i32
    %c0_i32_0 = arith.constant 0 : i32
    %c0_i32_1 = arith.constant 0 : i32
    return %c0_i32, %c0_i32_0 : i32, i32
  }
  func.func @transform_3(%arg0: i32) -> (i32, i32) {
    %c0_i32 = arith.constant 0 : i32
    %c0_i32_0 = arith.constant 0 : i32
    %c0_i32_1 = arith.constant 0 : i32
    return %c0_i32, %c0_i32_0 : i32, i32
  }
  func.func @transform_4(%arg0: i32) -> (i32, i32) {
    %c0_i32 = arith.constant 0 : i32
    %c0_i32_0 = arith.constant 0 : i32
    %c0_i32_1 = arith.constant 0 : i32
    return %c0_i32, %c0_i32_0 : i32, i32
  }
  func.func @transform_5(%arg0: i32) -> (i32, i32) {
    %c0_i32 = arith.constant 0 : i32
    %c0_i32_0 = arith.constant 0 : i32
    %c0_i32_1 = arith.constant 0 : i32
    return %c0_i32, %c0_i32_0 : i32, i32
  }
  func.func @transform_6(%arg0: i32) -> (i32, i32) {
    %c0_i32 = arith.constant 0 : i32
    %c0_i32_0 = arith.constant 0 : i32
    %c0_i32_1 = arith.constant 0 : i32
    return %c0_i32, %c0_i32_0 : i32, i32
  }
  func.func @transform_7(%arg0: i32) -> (i32, i32) {
    %c0_i32 = arith.constant 0 : i32
    %c0_i32_0 = arith.constant 0 : i32
    %c0_i32_1 = arith.constant 0 : i32
    return %c0_i32, %c0_i32_0 : i32, i32
  }
  func.func @transform_8(%arg0: i32) -> (i32, i32) {
    %c0_i32 = arith.constant 0 : i32
    %c0_i32_0 = arith.constant 0 : i32
    %c0_i32_1 = arith.constant 0 : i32
    return %c0_i32, %c0_i32_0 : i32, i32
  }
  func.func @transform_9(%arg0: i32) -> (i32, i32) {
    %c0_i32 = arith.constant 0 : i32
    %c0_i32_0 = arith.constant 0 : i32
    %c0_i32_1 = arith.constant 0 : i32
    return %c0_i32, %c0_i32_0 : i32, i32
  }
  func.func @transform_10(%arg0: i32) -> (i32, i32) {
    %c0_i32 = arith.constant 0 : i32
    %c0_i32_0 = arith.constant 0 : i32
    %c0_i32_1 = arith.constant 0 : i32
    return %c0_i32, %c0_i32_0 : i32, i32
  }
  func.func @transform_11(%arg0: i32) -> (i32, i32) {
    %c0_i32 = arith.constant 0 : i32
    %c0_i32_0 = arith.constant 0 : i32
    %c0_i32_1 = arith.constant 0 : i32
    return %c0_i32, %c0_i32_0 : i32, i32
  }
  func.func @transform_12(%arg0: i32) -> (i32, i32) {
    %c0_i32 = arith.constant 0 : i32
    %c0_i32_0 = arith.constant 0 : i32
    %c0_i32_1 = arith.constant 0 : i32
    return %c0_i32, %c0_i32_0 : i32, i32
  }
  func.func @transform_13(%arg0: i32) -> (i32, i32) {
    %c0_i32 = arith.constant 0 : i32
    %c0_i32_0 = arith.constant 0 : i32
    %c0_i32_1 = arith.constant 0 : i32
    return %c0_i32, %c0_i32_0 : i32, i32
  }
  func.func @transform_14(%arg0: i32) -> (i32, i32) {
    %c0_i32 = arith.constant 0 : i32
    %c0_i32_0 = arith.constant 0 : i32
    %c0_i32_1 = arith.constant 0 : i32
    return %c0_i32, %c0_i32_0 : i32, i32
  }
  func.func @transform_15(%arg0: i32) -> (i32, i32) {
    %c0_i32 = arith.constant 0 : i32
    %c0_i32_0 = arith.constant 0 : i32
    %c0_i32_1 = arith.constant 0 : i32
    return %c0_i32, %c0_i32_0 : i32, i32
  }
  func.func @transform_16(%arg0: i32) -> (i32, i32) {
    %c0_i32 = arith.constant 0 : i32
    %c0_i32_0 = arith.constant 0 : i32
    %c0_i32_1 = arith.constant 0 : i32
    return %c0_i32, %c0_i32_0 : i32, i32
  }
  func.func @transform_17(%arg0: i32) -> (i32, i32) {
    %c0_i32 = arith.constant 0 : i32
    %c0_i32_0 = arith.constant 0 : i32
    %c0_i32_1 = arith.constant 0 : i32
    return %c0_i32, %c0_i32_0 : i32, i32
  }
  func.func @transform_18(%arg0: i32) -> (i32, i32) {
    %c0_i32 = arith.constant 0 : i32
    %c0_i32_0 = arith.constant 0 : i32
    %c0_i32_1 = arith.constant 0 : i32
    return %c0_i32, %c0_i32_0 : i32, i32
  }
  func.func @transform_19(%arg0: i32) -> (i32, i32) {
    %c0_i32 = arith.constant 0 : i32
    %c0_i32_0 = arith.constant 0 : i32
    %c0_i32_1 = arith.constant 0 : i32
    return %c0_i32, %c0_i32_0 : i32, i32
  }
  func.func @transform_20(%arg0: i32) -> (i32, i32) {
    %c0_i32 = arith.constant 0 : i32
    %c0_i32_0 = arith.constant 0 : i32
    %c0_i32_1 = arith.constant 0 : i32
    return %c0_i32, %c0_i32_0 : i32, i32
  }
  func.func @transform_21(%arg0: i32) -> (i32, i32) {
    %c0_i32 = arith.constant 0 : i32
    %c0_i32_0 = arith.constant 0 : i32
    %c0_i32_1 = arith.constant 0 : i32
    return %c0_i32, %c0_i32_0 : i32, i32
  }
  func.func @transform_22(%arg0: i32) -> (i32, i32) {
    %c0_i32 = arith.constant 0 : i32
    %c0_i32_0 = arith.constant 0 : i32
    %c0_i32_1 = arith.constant 0 : i32
    return %c0_i32, %c0_i32_0 : i32, i32
  }
  func.func @transform_23(%arg0: i32) -> (i32, i32) {
    %c0_i32 = arith.constant 0 : i32
    %c0_i32_0 = arith.constant 0 : i32
    %c0_i32_1 = arith.constant 0 : i32
    return %c0_i32, %c0_i32_0 : i32, i32
  }
  func.func @transform_24(%arg0: i32) -> (i32, i32) {
    %c0_i32 = arith.constant 0 : i32
    %c0_i32_0 = arith.constant 0 : i32
    %c0_i32_1 = arith.constant 0 : i32
    return %c0_i32, %c0_i32_0 : i32, i32
  }
  func.func @transform_25(%arg0: i32) -> (i32, i32) {
    %c0_i32 = arith.constant 0 : i32
    %c0_i32_0 = arith.constant 0 : i32
    %c0_i32_1 = arith.constant 0 : i32
    return %c0_i32, %c0_i32_0 : i32, i32
  }
  func.func @transform_26(%arg0: i32) -> (i32, i32) {
    %c0_i32 = arith.constant 0 : i32
    %c0_i32_0 = arith.constant 0 : i32
    %c0_i32_1 = arith.constant 0 : i32
    return %c0_i32, %c0_i32_0 : i32, i32
  }
  func.func @transform_27(%arg0: i32) -> (i32, i32) {
    %c0_i32 = arith.constant 0 : i32
    %c0_i32_0 = arith.constant 0 : i32
    %c0_i32_1 = arith.constant 0 : i32
    return %c0_i32, %c0_i32_0 : i32, i32
  }
  func.func @transform_28(%arg0: i32) -> (i32, i32) {
    %c0_i32 = arith.constant 0 : i32
    %c0_i32_0 = arith.constant 0 : i32
    %c0_i32_1 = arith.constant 0 : i32
    return %c0_i32, %c0_i32_0 : i32, i32
  }
  func.func @transform_29(%arg0: i32) -> (i32, i32) {
    %c0_i32 = arith.constant 0 : i32
    %c0_i32_0 = arith.constant 0 : i32
    %c0_i32_1 = arith.constant 0 : i32
    return %c0_i32, %c0_i32_0 : i32, i32
  }
  func.func @transform_30(%arg0: i32) -> (i32, i32) {
    %c0_i32 = arith.constant 0 : i32
    %c0_i32_0 = arith.constant 0 : i32
    %c0_i32_1 = arith.constant 0 : i32
    return %c0_i32, %c0_i32_0 : i32, i32
  }
  func.func @transform_31(%arg0: i32) -> (i32, i32) {
    %c0_i32 = arith.constant 0 : i32
    %c0_i32_0 = arith.constant 0 : i32
    %c0_i32_1 = arith.constant 0 : i32
    return %c0_i32, %c0_i32_0 : i32, i32
  }
  func.func @transform_32(%arg0: i32) -> (i32, i32) {
    %c0_i32 = arith.constant 0 : i32
    %c0_i32_0 = arith.constant 0 : i32
    %c0_i32_1 = arith.constant 0 : i32
    return %c0_i32, %c0_i32_0 : i32, i32
  }
  func.func @transform_33(%arg0: i32) -> (i32, i32) {
    %c0_i32 = arith.constant 0 : i32
    %c0_i32_0 = arith.constant 0 : i32
    %c0_i32_1 = arith.constant 0 : i32
    return %c0_i32, %c0_i32_0 : i32, i32
  }
  func.func @transform_34(%arg0: i32) -> (i32, i32) {
    %c0_i32 = arith.constant 0 : i32
    %c0_i32_0 = arith.constant 0 : i32
    %c0_i32_1 = arith.constant 0 : i32
    return %c0_i32, %c0_i32_0 : i32, i32
  }
  func.func @transform_35(%arg0: i32) -> (i32, i32) {
    %c0_i32 = arith.constant 0 : i32
    %c0_i32_0 = arith.constant 0 : i32
    %c0_i32_1 = arith.constant 0 : i32
    return %c0_i32, %c0_i32_0 : i32, i32
  }
  func.func @transform_36(%arg0: i32) -> (i32, i32) {
    %c0_i32 = arith.constant 0 : i32
    %c0_i32_0 = arith.constant 0 : i32
    %c0_i32_1 = arith.constant 0 : i32
    return %c0_i32, %c0_i32_0 : i32, i32
  }
  func.func @transform_37(%arg0: i32) -> (i32, i32) {
    %c0_i32 = arith.constant 0 : i32
    %c0_i32_0 = arith.constant 0 : i32
    %c0_i32_1 = arith.constant 0 : i32
    return %c0_i32, %c0_i32_0 : i32, i32
  }
  func.func @transform_38(%arg0: i32) -> (i32, i32) {
    %c0_i32 = arith.constant 0 : i32
    %c0_i32_0 = arith.constant 0 : i32
    %c0_i32_1 = arith.constant 0 : i32
    return %c0_i32, %c0_i32_0 : i32, i32
  }
  func.func @transform_39(%arg0: i32) -> (i32, i32) {
    %c0_i32 = arith.constant 0 : i32
    %c0_i32_0 = arith.constant 0 : i32
    return %arg0, %c0_i32 : i32, i32
  }
}

</mosaic_0001>

<bundles_post_ra>
// kernel: horse_transformer_forward.1
= control target key start
LH: loop header
LB: loop body
LE: loop exit
PB: predicated region body
PF: predicated region fallthrough
CT: control target
= control target key end

     0   :  { %s9350_s3 = smov 3   ;;  %s9351_s10 = smov 5   ;;  %vm173_vm0 = vcmask 130048   ;;  %vm272_vm1 = vcmask 261120   ;;  %v9356_v32 = vmov 0.0   ;;  %vm9357_vm2 = vmmov 0   ;;  %s11020_s0 = inlined_call_operand.smem [shape: u32[40], index: -1, kind: input, shape index: {}] }
   0x1   :  { %s7353_s6 = sld [smem:[%s11020_s0 + %s9350_s3]]   ;;  %s9352_s14 = smov 7   ;;  %vm526_vm3 = vcmask 64512   ;;  %vm1209_vm4 = vcmask 130112   ;;  %vm1554_vm5 = vcmask 195712   ;;  %vm1899_vm6 = vcmask 261312  }
   0x2   :  { %s1_s9 = sld [smem:[%s11020_s0]]   ;;  %s9353_s18 = smov 9  }
   0x3   :  { %s7355_s13 = sld [smem:[%s11020_s0 + %s9351_s10]]   ;;  %s9354_s22 = smov 4  }
   0x4   :  { %s7357_s17 = sld [smem:[%s11020_s0 + %s9352_s14]]   ;;  %s9355_s26 = smov 2  }
   0x5   :  { %s7359_s21 = sld [smem:[%s11020_s0 + %s9353_s18]]   ;;  %s9358_s30 = smov 8  }
   0x6   :  { %s7354_s25 = sld [smem:[%s11020_s0 + %s9354_s22]]   ;;  %s9359_s4 = smov 6  }
   0x7   :  { %v164_v0 = vld [vmem:[%s7353_s6] sm:$0xff]  ;;  %v165_v1 = vld [vmem:[%s7353_s6 + $0x8] sm:$0xff]  ;;  %s7352_s29 = sld [smem:[%s11020_s0 + %s9355_s26]]   ;;  %s9360_s8 = smov 10  }
   0x8   :  { %v162_v2 = vld [vmem:[%s1_s9] sm:$0xff]  ;;  %v8508_v3 = vpack.c.bf16 %v165_v1, %v164_v0  ;;  %v163_v10 = vld [vmem:[%s1_s9 + $0x8] sm:$0xff]  ;;  %s7358_s3 = sld [smem:[%s11020_s0 + %s9358_s30]]   ;;  %s9361_s12 = smov 120  }
   0x9   :  { %8246 = vmatprep.mubr.msk.f32.mxu0 %vm173_vm0, %v162_v2  ;;  %v261_v4 = vld [vmem:[%s7355_s13] sm:$0xff]  ;;  %v262_v5 = vld [vmem:[%s7355_s13 + $0x8] sm:$0xff]  ;;  %v263_v11 = vld [vmem:[%s7355_s13 + $0x10] sm:$0xff]  ;;  %s7356_s7 = sld [smem:[%s11020_s0 + %s9359_s4]]   ;;  %s9364_s18 = smov 104  }
   0xa   :  { %v8512_v6 = vpack.c.bf16 %v262_v5, %v261_v4  ;;  %v354_v7 = vld [vmem:[%s7357_s17] sm:$0xff]  ;;  %v355_v8 = vld [vmem:[%s7357_s17 + $0x8] sm:$0xff]  ;;  %8509 = vmatprep.subr.bf16.mxu0 %v8508_v3  ;;  %v264_v12 = vld [vmem:[%s7355_s13 + $0x18] sm:$0xff]  ;;  %s7360_s11 = sld [smem:[%s11020_s0 + %s9360_s8]]   ;;  %s9362_s13 = smov 1  }
   0xb   :  { %v8520_v9 = vpack.c.bf16 %v355_v8, %v354_v7  ;;  %8511 = vmatpush3.bf16.msra.mxu0 %v8508_v3  ;;  %v8516_v13 = vpack.c.bf16 %v264_v12, %v263_v11  ;;  %v356_v14 = vld [vmem:[%s7357_s17 + $0x10] sm:$0xff]  ;;  %v357_v15 = vld [vmem:[%s7357_s17 + $0x18] sm:$0xff]  ;;  %v440_v17 = vld [vmem:[%s7359_s21] sm:$0xff]  ;;  %s9491_s16 = sld [smem:[%s11020_s0 + %s9362_s13]]   ;;  %s9363_s17 = smov 112  }
   0xc   :  { %8513 = vmatprep.subr.bf16.mxu1 %v8512_v6  ;;  %v8524_v16 = vpack.c.bf16 %v357_v15, %v356_v14  ;;  %v441_v18 = vld [vmem:[%s7359_s21 + $0x8] sm:$0xff]  ;;  %v7390_v20 = vld [vmem:[%s7354_s25] ss:$0 sm:$0xff]  ;;  %v442_v27 = vld [vmem:[%s7359_s21 + $0x10] sm:$0xff]  ;;  %s9365_s19 = smov 16   ;;  %s9366_s20 = smov 11  }
   0xd   :  { %8515 = vmatpush3.bf16.msra.mxu1 %v8512_v6  ;;  %8521 = vmatprep.subr.bf16.mxu0 %v8520_v9  ;;  %v8528_v19 = vpack.c.bf16 %v441_v18, %v440_v17  ;;  %v255_v24 = vld [vmem:[%s7352_s29] sm:$0xff]  ;;  %v256_v25 = vld [vmem:[%s7352_s29 + $0x8] sm:$0xff]  ;;  %v443_v28 = vld [vmem:[%s7359_s21 + $0x18] sm:$0xff]  ;;  %s7361_s23 = sld [smem:[%s11020_s0 + %s9366_s20]]   ;;  %s9367_s24 = smov 24  }
   0xe   :  { %8247 = vmatmul.mubr.msk.f32.vlgmr.msra.gmra.mrb[0].mxu0 %vm173_vm0, %v163_v10  ;;  %8517 = vmatprep.subr.bf16.mxu1 %v8516_v13  ;;  %v8532_v31 = vpack.c.bf16 %v443_v28, %v442_v27  ;;  %v7396_v33 = vld [vmem:[%s7358_s3] ss:$0 sm:$0xff]  ;;  %s9368_s25 = smov 12   ;;  %s9369_s29 = smov 15  }
   0xf   :  { %8523 = vmatpush3.bf16.msra.mxu0 %v8520_v9  ;;  %v7393_v39 = vld [vmem:[%s7356_s7] ss:$0 sm:$0xff]  ;;  %s7362_s28 = sld [smem:[%s11020_s0 + %s9368_s25]]   ;;  %s9370_s4 = smov 13  }
  0x10   :  { %8525 = vmatprep.subr.bf16.mxu0 %v8524_v16  ;;  %v7399_v42 = vld [vmem:[%s7360_s11] ss:$0 sm:$0xff]  ;;  %s9658_s3 = sld [smem:[%s11020_s0 + %s9369_s29]]   ;;  %s9371_s8 = smov 14  }
  0x11   :  { %8519 = vmatpush3.bf16.msra.mxu1 %v8516_v13  ;;  %v9494_v49 = vld [vmem:[%s9491_s16] ss:$0 sm:$0xff]  ;;  %v9498_v54 = vld [vmem:[%s9491_s16 + $0x1] ss:$0 sm:$0xff]  ;;  %s7363_s7 = sld [smem:[%s11020_s0 + %s9370_s4]]   ;;  %s9372_s13 = smov 17  }
  0x12   :  { %8529 = vmatprep.subr.bf16.mxu1 %v8528_v19  ;;  %s7364_s11 = sld [smem:[%s11020_s0 + %s9371_s8]]   ;;  %s9373_s25 = smov 18  }
  0x13   :  { %8527 = vmatpush3.bf16.msra.mxu0 %v8524_v16  ;;  %s9736_s20 = sld [smem:[%s11020_s0 + %s9372_s13]]   ;;  %s9374_s29 = smov 21  }
  0x14   :  { %8282 = vmatprep.subr.mxu0 %v9356_v32  ;;  %s9375_s4 = smov 23   ;;  %s9376_s8 = smov 25  }
  0x15   :  { %s9377_s13 = smov 19   ;;  %s9378_s21 = smov 20  }
  0x16   :  { %s9383_s9 = smov 31   ;;  %s9384_s14 = smov 29  }
  0x17   :  { %s9385_s22 = smov 30   ;;  %s9386_s27 = smov 33  }
  0x18   :  { %s7380_s26 = sld [smem:[%s11020_s0 + %s9385_s22]]   ;;  %s9387_s2 = smov 32  }
  0x19   :  { %s10554_s1 = sld [smem:[%s11020_s0 + %s9386_s27]]   ;;  %s9388_s6 = smov 34  }
  0x1a   :  { %s10676_s5 = sld [smem:[%s11020_s0 + %s9387_s2]]  }
  0xe1   :  { %v8248_v21 = vpop.f32.mrb[0].mxu0 }
  0xe2   :  { %v252_v22 = vadd.f32 %v8248_v21, %v7390_v20  ;;  %v246_v23 = vpop.f32.mrb[1].mxu0 }
  0xe3   :  { %v247_v26 = vadd.f32 %v7390_v20, %v246_v23 }
  0xe4   :  { %v9424_v30 = vadd.f32 %v256_v25, %v252_v22 }
  0xe5   :  { %v9422_v29 = vadd.f32 %v255_v24, %v247_v26 }
  0xe7   :  { %8257 = vmatprep.mubr.msk.f32.mxu1 %vm272_vm1, %v9422_v29  ;;  %8268 = vmatprep.mubr.msk.f32.mxu0 %vm272_vm1, %v9422_v29 }
  0xe8   :  { %8258 = vmatmul.mubr.msk.f32.vlgmr.msra.gmra.mrb[0].mxu1 %vm272_vm1, %v9424_v30  ;;  %8269 = vmatmul.mubr.msk.f32.vlgmr.msra.gmra.mrb[2].mxu0 %vm272_vm1, %v9424_v30 }
  0xe9   :  { %8531 = vmatpush3.bf16.msra.mxu1 %v8528_v19  ;;  %8279 = vmatprep.mubr.msk.f32.mxu1 %vm272_vm1, %v9422_v29 }
  0xea   :  { %8533 = vmatprep.subr.bf16.mxu1 %v8532_v31  ;;  %8284 = vmatprep.mubr.msk.f32.mxu0 %vm9357_vm2, %v9356_v32 }
  0xed   :  { %8535 = vmatpush3.bf16.msra.mxu1 %v8532_v31 }
  0xee   :  { %8292 = vmatprep.subr.mxu1 %v9356_v32 }
  0xf0   :  { %8280 = vmatmul.mubr.msk.f32.vlgmr.msra.gmra.mrb[2].mxu1 %vm272_vm1, %v9424_v30 }
  0xf1   :  { %8294 = vmatprep.mubr.msk.f32.mxu1 %vm9357_vm2, %v9356_v32 }
 0x1bb   :  { %v8259_v34 = vpop.f32.mrb[0].mxu1  ;;  %v8270_v35 = vpop.f32.mrb[2].mxu0 }
 0x1bc   :  { %v9454_v36 = vadd.f32 %v8270_v35, %v7396_v33  ;;  %v345_v37 = vpop.f32.mrb[1].mxu1  ;;  %v431_v38 = vpop.f32.mrb[3].mxu0  ;;  %v9473_v44 = vadd.f32 %v8259_v34, %v7393_v39 }
 0x1bd   :  { %v9456_v40 = vadd.f32 %v7396_v33, %v431_v38  ;;  %v9462_v41 = vadd.f32 %v7393_v39, %v345_v37 }
 0x1be   :  { %945 = vrot.lane.b32.xlu1 %v9454_v36, %s9361_s12 }
 0x1bf   :  { %8283 = vmatpush3.xpose.msk.msra.mxu0 %vm526_vm3, %v9456_v40 }
 0x1c0   :  { %8287 = vmatprep.subr.mxu0 %v9356_v32 }
 0x1c2   :  { %865 = vrot.lane.b32.xlu1 %v9462_v41, %s9361_s12  ;;  %8285 = vmatmul.mubr.msk.f32.vlgmr.msra.gmra.mrb[4].mxu0 %vm526_vm3, %v9462_v41 }
 0x1c3   :  { %v8281_v43 = vpop.f32.mrb[2].mxu1  ;;  %8288 = vmatpush3.xpose.msk.msra.mxu0 %vm526_vm3, %v9454_v36  ;;  %8289 = vmatprep.mubr.msk.f32.mxu0 %vm9357_vm2, %v9356_v32 }
 0x1c4   :  { %v517_v45 = vpop.f32.mrb[3].mxu1  ;;  %8297 = vmatprep.subr.mxu0 %v9356_v32  ;;  %v9476_v46 = vadd.f32 %v8281_v43, %v7399_v42 }
 0x1c5   :  { %v9478_v47 = vadd.f32 %v7399_v42, %v517_v45 }
 0x1c6   :  { %8290 = vmatmul.mubr.msk.f32.vlgmr.msra.gmra.mrb[6].mxu0 %vm526_vm3, %v9473_v44 }
 0x1c7   :  { %8293 = vmatpush3.msra.mxu1 %v9478_v47  ;;  %8298 = vmatpush3.msra.mxu0 %v9476_v46 }
 0x1c8   :  { %8302 = vmatprep.subr.mxu1 %v9356_v32  ;;  %8299 = vmatprep.mubr.msk.f32.mxu0 %vm9357_vm2, %v9356_v32 }
 0x1c9   :  { %8307 = vmatprep.subr.mxu0 %v9356_v32 }
 0x230   :  { %v946_v6 = vpop.permute.xlu1 %945 }
 0x234   :  { %v866_v7 = vpop.permute.xlu1 %865 }
 0x295   :  { %v599_v48 = vpop.f32.mrb[4].mxu0 }
 0x296   :  { %v679_v50 = vmul.f32 0.35355338, %v599_v48  ;;  %v8286_v51 = vpop.f32.mrb[5].mxu0 }
 0x298   :  { %v693_v52 = vadd.f32 %v9494_v49, %v679_v50 }
 0x299   :  { %v675_v53 = vpop.f32.mrb[6].mxu0 }
 0x29a   :  { %v680_v55 = vmul.f32 0.35355338, %v675_v53  ;;  %v8291_v56 = vpop.f32.mrb[7].mxu0  ;;  %v695_v57 = vsel %vm526_vm3, %v693_v52, -inf }
 0x29b   :  { %696 = vmax.xlane.f32.xlu0 %v695_v57 }
 0x29c   :  { %v694_v58 = vadd.f32 %v9498_v54, %v680_v55 }
 0x29e   :  { %v698_v59 = vsel %vm526_vm3, %v694_v58, -inf }
 0x29f   :  { %699 = vmax.xlane.f32.xlu0 %v698_v59 }
 0x2b5   :  { %867 = vrot.lane.b32.xlu0 %v9456_v40, %s9361_s12 }
 0x328   :  { %v697_v60 = vpop.xlane.xlu0 %696 }
 0x329   :  { %v701_v61 = vsub.f32 %v693_v52, %v697_v60 }
 0x32b   :  { %v703_v62 = vmul.f32 1.442695, %v701_v61 }
 0x32c   :  { %v700_v63 = vpop.xlane.xlu0 %699 }
 0x32d   :  { %9268 = vpow2.f32 %v703_v62  ;;  %v702_v0 = vsub.f32 %v694_v58, %v700_v63 }
 0x32f   :  { %v705_v1 = vmul.f32 1.442695, %v702_v0 }
 0x330   :  { %v868_v12 = vpop.permute.xlu0 %867 }
 0x331   :  { %9270 = vpow2.f32 %v705_v1 }
 0x337   :  { %v9269_v2 = vpop.eup %9268 }
 0x338   :  { %v707_v3 = vsel %vm526_vm3, %v9269_v2, 0.0 }
 0x339   :  { %708 = vadd.xlane.f32.xlu1 %v707_v3 }
 0x33b   :  { %v9271_v4 = vpop.eup %9270 }
 0x33c   :  { %v710_v5 = vsel %vm526_vm3, %v9271_v4, 0.0 }
 0x33d   :  { %711 = vadd.xlane.f32.xlu1 %v710_v5 }
 0x34e   :  { %943 = vrot.lane.b32.xlu1 %v9473_v44, %s9361_s12 }
 0x3c6   :  { %v709_v8 = vpop.xlane.xlu1 %708 }
 0x3c7   :  { %9272 = vrcp.f32 %v709_v8 }
 0x3ca   :  { %v712_v9 = vpop.xlane.xlu1 %711 }
 0x3cb   :  { %9274 = vrcp.f32 %v712_v9 }
 0x3ce   :  { %v944_v15 = vpop.permute.xlu1 %943 }
 0x3d1   :  { %v9273_v10 = vpop.eup %9272 }
 0x3d2   :  { %v715_v11 = vmul.f32 %v9273_v10, %v9269_v2 }
 0x3d4   :  { %8295 = vmatmul.mubr.msk.f32.vlgmr.msra.gmra.mrb[4].mxu1 %vm526_vm3, %v715_v11 }
 0x3d5   :  { %v9275_v13 = vpop.eup %9274  ;;  %8303 = vmatpush3.xpose.msk.msra.mxu1 %vm526_vm3, %v868_v12  ;;  %8304 = vmatprep.mubr.msk.f32.mxu1 %vm9357_vm2, %v9356_v32 }
 0x3d6   :  { %v716_v14 = vmul.f32 %v9275_v13, %v9271_v4  ;;  %8312 = vmatprep.subr.mxu1 %v9356_v32 }
 0x3d8   :  { %8300 = vmatmul.mubr.msk.f32.vlgmr.msra.gmra.mrb[8].mxu0 %vm526_vm3, %v716_v14  ;;  %8305 = vmatmul.mubr.msk.f32.vlgmr.msra.gmra.mrb[6].mxu1 %vm526_vm3, %v866_v7 }
 0x3d9   :  { %8308 = vmatpush3.xpose.msk.msra.mxu0 %vm526_vm3, %v946_v6  ;;  %8309 = vmatprep.mubr.msk.f32.mxu0 %vm9357_vm2, %v9356_v32 }
 0x3da   :  { %8317 = vmatprep.subr.mxu0 %v9356_v32  ;;  %8314 = vmatprep.mubr.msk.f32.mxu1 %vm9357_vm2, %v9356_v32 }
 0x3dc   :  { %8310 = vmatmul.mubr.msk.f32.vlgmr.msra.gmra.mrb[10].mxu0 %vm526_vm3, %v944_v15 }
 0x3dd   :  { %8319 = vmatprep.mubr.msk.f32.mxu0 %vm9357_vm2, %v9356_v32 }
 0x4a7   :  { %v786_v16 = vpop.f32.mrb[4].mxu1 }
 0x4a8   :  { %863 = vst.msk [vmem:[#allocation2] sm:$0xff] %vm526_vm3, %v786_v16  ;;  %v8296_v17 = vpop.f32.mrb[5].mxu1 }
 0x4ab   :  { %v859_v18 = vpop.f32.mrb[8].mxu0  ;;  %v939_v19 = vpop.f32.mrb[6].mxu1 }
 0x4ac   :  { %864 = vst.msk [vmem:[#allocation2 + $0x8] sm:$0xff] %vm526_vm3, %v859_v18  ;;  %v1021_v20 = vmul.f32 0.35355338, %v939_v19  ;;  %v8301_v21 = vpop.f32.mrb[9].mxu0  ;;  %v8306_v22 = vpop.f32.mrb[7].mxu1 }
 0x4ae   :  { %v1023_v23 = vadd.f32 %v9494_v49, %v1021_v20 }
 0x4af   :  { %v1017_v24 = vpop.f32.mrb[10].mxu0 }
 0x4b0   :  { %v1022_v25 = vmul.f32 0.35355338, %v1017_v24  ;;  %v8311_v26 = vpop.f32.mrb[11].mxu0  ;;  %v1025_v27 = vsel %vm526_vm3, %v1023_v23, -inf }
 0x4b1   :  { %1026 = vmax.xlane.f32.xlu0 %v1025_v27 }
 0x4b2   :  { %v1024_v28 = vadd.f32 %v9498_v54, %v1022_v25 }
 0x4b4   :  { %v1028_v31 = vsel %vm526_vm3, %v1024_v28, -inf }
 0x4b5   :  { %1029 = vmax.xlane.f32.xlu1 %v1028_v31 }
 0x4c6   :  { %1125 = vrot.lane.b32.xlu1 %v9476_v46, %s9361_s12 }
 0x4c7   :  { %1048 = vrot.lane.b32.xlu0 %v9478_v47, %s9361_s12 }
 0x4ca   :  { %1214 = vrot.lane.b32.xlu1 %v9456_v40, %s9363_s17 }
 0x4ce   :  { %1292 = vrot.lane.b32.xlu1 %v9454_v36, %s9363_s17 }
 0x4d2   :  { %1290 = vrot.lane.b32.xlu1 %v9473_v44, %s9363_s17 }
 0x53e   :  { %v1027_v33 = vpop.xlane.xlu0 %1026 }
 0x53f   :  { %v1031_v34 = vsub.f32 %v1023_v23, %v1027_v33 }
 0x541   :  { %v1033_v35 = vmul.f32 1.442695, %v1031_v34 }
 0x542   :  { %v1049_v37 = vpop.permute.xlu0 %1048  ;;  %v1030_v38 = vpop.xlane.xlu1 %1029 }
 0x543   :  { %9276 = vpow2.f32 %v1033_v35  ;;  %v1032_v39 = vsub.f32 %v1024_v28, %v1030_v38  ;;  %8313 = vmatpush3.msra.mxu1 %v1049_v37 }
 0x544   :  { %8322 = vmatprep.subr.mxu1 %v9356_v32 }
 0x545   :  { %v1035_v42 = vmul.f32 1.442695, %v1032_v39 }
 0x546   :  { %v1126_v43 = vpop.permute.xlu1 %1125 }
 0x547   :  { %9278 = vpow2.f32 %v1035_v42  ;;  %8318 = vmatpush3.msra.mxu0 %v1126_v43 }
 0x548   :  { %8327 = vmatprep.subr.mxu0 %v9356_v32 }
 0x54a   :  { %v1215_v55 = vpop.permute.xlu1 %1214 }
 0x54d   :  { %v9277_v45 = vpop.eup %9276 }
 0x54e   :  { %v1037_v48 = vsel %vm526_vm3, %v9277_v45, 0.0  ;;  %v1293_v59 = vpop.permute.xlu1 %1292 }
 0x54f   :  { %1038 = vadd.xlane.f32.xlu0 %v1037_v48 }
 0x551   :  { %v9279_v50 = vpop.eup %9278 }
 0x552   :  { %v1040_v51 = vsel %vm526_vm3, %v9279_v50, 0.0  ;;  %v1291_v62 = vpop.permute.xlu1 %1290 }
 0x553   :  { %1041 = vadd.xlane.f32.xlu0 %v1040_v51 }
 0x569   :  { %1212 = vrot.lane.b32.xlu0 %v9462_v41, %s9363_s17 }
 0x5dc   :  { %v1039_v52 = vpop.xlane.xlu0 %1038 }
 0x5dd   :  { %9280 = vrcp.f32 %v1039_v52 }
 0x5e0   :  { %v1042_v53 = vpop.xlane.xlu0 %1041 }
 0x5e1   :  { %9282 = vrcp.f32 %v1042_v53 }
 0x5e4   :  { %v1213_v61 = vpop.permute.xlu0 %1212 }
 0x5e7   :  { %v9281_v56 = vpop.eup %9280 }
 0x5e8   :  { %v1045_v57 = vmul.f32 %v9281_v56, %v9277_v45 }
 0x5ea   :  { %8315 = vmatmul.mubr.msk.f32.vlgmr.msra.gmra.mrb[8].mxu1 %vm526_vm3, %v1045_v57 }
 0x5eb   :  { %v9283_v58 = vpop.eup %9282  ;;  %8323 = vmatpush3.xpose.msk.msra.mxu1 %vm526_vm3, %v1215_v55  ;;  %8324 = vmatprep.mubr.msk.f32.mxu1 %vm9357_vm2, %v9356_v32 }
 0x5ec   :  { %v1046_v60 = vmul.f32 %v9283_v58, %v9279_v50  ;;  %8332 = vmatprep.subr.mxu1 %v9356_v32 }
 0x5ee   :  { %8320 = vmatmul.mubr.msk.f32.vlgmr.msra.gmra.mrb[12].mxu0 %vm526_vm3, %v1046_v60  ;;  %8325 = vmatmul.mubr.msk.f32.vlgmr.msra.gmra.mrb[10].mxu1 %vm526_vm3, %v1213_v61 }
 0x5ef   :  { %8328 = vmatpush3.xpose.msk.msra.mxu0 %vm526_vm3, %v1293_v59  ;;  %8329 = vmatprep.mubr.msk.f32.mxu0 %vm9357_vm2, %v9356_v32 }
 0x5f0   :  { %8337 = vmatprep.subr.mxu0 %v9356_v32  ;;  %8334 = vmatprep.mubr.msk.f32.mxu1 %vm9357_vm2, %v9356_v32 }
 0x5f2   :  { %8330 = vmatmul.mubr.msk.f32.vlgmr.msra.gmra.mrb[14].mxu0 %vm526_vm3, %v1291_v62 }
 0x5f3   :  { %8339 = vmatprep.mubr.msk.f32.mxu0 %vm9357_vm2, %v9356_v32 }
 0x6bd   :  { %v9563_v63 = vpop.f32.mrb[8].mxu1 }
 0x6be   :  { %v8316_v0 = vpop.f32.mrb[9].mxu1 }
 0x6c1   :  { %v9565_v1 = vpop.f32.mrb[12].mxu0  ;;  %v1286_v2 = vpop.f32.mrb[10].mxu1 }
 0x6c2   :  { %v1368_v3 = vmul.f32 0.35355338, %v1286_v2  ;;  %v8321_v4 = vpop.f32.mrb[13].mxu0  ;;  %v8326_v5 = vpop.f32.mrb[11].mxu1 }
 0x6c4   :  { %v1370_v6 = vadd.f32 %v9494_v49, %v1368_v3 }
 0x6c5   :  { %v1364_v7 = vpop.f32.mrb[14].mxu0 }
 0x6c6   :  { %v1369_v8 = vmul.f32 0.35355338, %v1364_v7  ;;  %v8331_v9 = vpop.f32.mrb[15].mxu0  ;;  %v1372_v10 = vsel %vm526_vm3, %v1370_v6, -inf }
 0x6c7   :  { %1373 = vmax.xlane.f32.xlu0 %v1372_v10 }
 0x6c8   :  { %v1371_v11 = vadd.f32 %v9498_v54, %v1369_v8 }
 0x6ca   :  { %v1375_v12 = vsel %vm526_vm3, %v1371_v11, -inf }
 0x6cb   :  { %1376 = vmax.xlane.f32.xlu1 %v1375_v12 }
 0x6dc   :  { %1470 = vrot.lane.b32.xlu1 %v9476_v46, %s9363_s17 }
 0x6dd   :  { %1394 = vrot.lane.b32.xlu0 %v9478_v47, %s9363_s17 }
 0x6e0   :  { %1559 = vrot.lane.b32.xlu1 %v9456_v40, %s9364_s18 }
 0x6e4   :  { %1637 = vrot.lane.b32.xlu1 %v9454_v36, %s9364_s18 }
 0x6e8   :  { %1635 = vrot.lane.b32.xlu1 %v9473_v44, %s9364_s18 }
 0x754   :  { %v1374_v13 = vpop.xlane.xlu0 %1373 }
 0x755   :  { %v1378_v14 = vsub.f32 %v1370_v6, %v1374_v13  ;;  %v1906_v13 = vld [vmem:[%s7361_s23 + $0x10] sm:$0xff] }
 0x757   :  { %v1380_v15 = vmul.f32 1.442695, %v1378_v14  ;;  %v1907_v14 = vld [vmem:[%s7361_s23 + $0x18] sm:$0xff] }
 0x758   :  { %v1395_v16 = vpop.permute.xlu0 %1394  ;;  %v1377_v17 = vpop.xlane.xlu1 %1376 }
 0x759   :  { %9284 = vpow2.f32 %v1380_v15  ;;  %v1379_v18 = vsub.f32 %v1371_v11, %v1377_v17  ;;  %8333 = vmatpush3.msra.mxu1 %v1395_v16  ;;  %v1905_v11 = vld [vmem:[%s7361_s23 + $0x8] sm:$0xff]  ;;  %v8540_v15 = vpack.c.bf16 %v1907_v14, %v1906_v13 }
 0x75a   :  { %8342 = vmatprep.subr.mxu1 %v9356_v32 }
 0x75b   :  { %v1382_v19 = vmul.f32 1.442695, %v1379_v18 }
 0x75c   :  { %v1471_v20 = vpop.permute.xlu1 %1470 }
 0x75d   :  { %9286 = vpow2.f32 %v1382_v19  ;;  %8338 = vmatpush3.msra.mxu0 %v1471_v20 }
 0x75e   :  { %8347 = vmatprep.subr.mxu0 %v9356_v32 }
 0x760   :  { %v1560_v24 = vpop.permute.xlu1 %1559 }
 0x763   :  { %v9285_v36 = vpop.eup %9284 }
 0x764   :  { %v1384_v40 = vsel %vm526_vm3, %v9285_v36, 0.0  ;;  %v1638_v28 = vpop.permute.xlu1 %1637 }
 0x765   :  { %1385 = vadd.xlane.f32.xlu0 %v1384_v40 }
 0x767   :  { %v9287_v44 = vpop.eup %9286 }
 0x768   :  { %v1387_v21 = vsel %vm526_vm3, %v9287_v44, 0.0  ;;  %v1636_v33 = vpop.permute.xlu1 %1635 }
 0x769   :  { %1388 = vadd.xlane.f32.xlu0 %v1387_v21  ;;  %v7428_v21 = vld [vmem:[%s7362_s28] ss:$0 sm:$0xff]  ;;  %s7368_s28 = sld [smem:[%s11020_s0 + %s9373_s25]]  }
 0x76a   :  { %s7370_s25 = sld [smem:[%s11020_s0 + %s9378_s21]]  }
 0x76b   :  { %s7379_s21 = sld [smem:[%s11020_s0 + %s9384_s14]]  }
 0x77f   :  { %1557 = vrot.lane.b32.xlu0 %v9462_v41, %s9364_s18 }
 0x7f2   :  { %v1386_v22 = vpop.xlane.xlu0 %1385 }
 0x7f3   :  { %9288 = vrcp.f32 %v1386_v22 }
 0x7f6   :  { %v1389_v23 = vpop.xlane.xlu0 %1388 }
 0x7f7   :  { %9290 = vrcp.f32 %v1389_v23 }
 0x7fa   :  { %v1558_v41 = vpop.permute.xlu0 %1557 }
 0x7fd   :  { %v9289_v25 = vpop.eup %9288 }
 0x7fe   :  { %v1392_v26 = vmul.f32 %v9289_v25, %v9285_v36 }
 0x800   :  { %8335 = vmatmul.mubr.msk.f32.vlgmr.msra.gmra.mrb[12].mxu1 %vm526_vm3, %v1392_v26 }
 0x801   :  { %v9291_v27 = vpop.eup %9290  ;;  %8343 = vmatpush3.xpose.msk.msra.mxu1 %vm526_vm3, %v1560_v24  ;;  %8344 = vmatprep.mubr.msk.f32.mxu1 %vm9357_vm2, %v9356_v32 }
 0x802   :  { %v1393_v31 = vmul.f32 %v9291_v27, %v9287_v44  ;;  %8352 = vmatprep.subr.mxu1 %v9356_v32 }
 0x804   :  { %8340 = vmatmul.mubr.msk.f32.vlgmr.msra.gmra.mrb[16].mxu0 %vm526_vm3, %v1393_v31  ;;  %8345 = vmatmul.mubr.msk.f32.vlgmr.msra.gmra.mrb[14].mxu1 %vm526_vm3, %v1558_v41 }
 0x805   :  { %8348 = vmatpush3.xpose.msk.msra.mxu0 %vm526_vm3, %v1638_v28  ;;  %8349 = vmatprep.mubr.msk.f32.mxu0 %vm9357_vm2, %v9356_v32 }
 0x806   :  { %8357 = vmatprep.subr.mxu0 %v9356_v32  ;;  %8354 = vmatprep.mubr.msk.f32.mxu1 %vm9357_vm2, %v9356_v32 }
 0x808   :  { %8350 = vmatmul.mubr.msk.f32.vlgmr.msra.gmra.mrb[18].mxu0 %vm526_vm3, %v1636_v33 }
 0x809   :  { %8359 = vmatprep.mubr.msk.f32.mxu0 %vm9357_vm2, %v9356_v32 }
 0x8d3   :  { %v1466_v34 = vpop.f32.mrb[12].mxu1 }
 0x8d4   :  { %v8336_v35 = vpop.f32.mrb[13].mxu1 }
 0x8d5   :  { %v2066_v35 = vld [vmem:[%s9658_s3 + $0x88] sm:$0xff] }
 0x8d7   :  { %v1542_v37 = vpop.f32.mrb[16].mxu0  ;;  %v1631_v38 = vpop.f32.mrb[14].mxu1 }
 0x8d8   :  { %v1713_v39 = vmul.f32 0.35355338, %v1631_v38  ;;  %v8341_v42 = vpop.f32.mrb[17].mxu0  ;;  %v8346_v43 = vpop.f32.mrb[15].mxu1 }
 0x8d9   :  { %v2049_v42 = vld [vmem:[%s9658_s3] sm:$0xff] }
 0x8da   :  { %v1715_v45 = vadd.f32 %v9494_v49, %v1713_v39  ;;  %v2068_v39 = vld [vmem:[%s9658_s3 + $0x98] sm:$0xff]  ;;  %v2065_v43 = vld [vmem:[%s9658_s3 + $0x80] sm:$0xff] }
 0x8db   :  { %v1709_v48 = vpop.f32.mrb[18].mxu0 }
 0x8dc   :  { %v1714_v50 = vmul.f32 0.35355338, %v1709_v48  ;;  %v8351_v51 = vpop.f32.mrb[19].mxu0  ;;  %v1717_v52 = vsel %vm526_vm3, %v1715_v45, -inf  ;;  %v8546_v48 = vpack.c.bf16 %v2065_v43, %v2049_v42  ;;  %v2103_v42 = vld [vmem:[%s9658_s3 + $0x1b0] sm:$0xff] }
 0x8dd   :  { %1718 = vmax.xlane.f32.xlu0 %v1717_v52  ;;  %v2067_v51 = vld [vmem:[%s9658_s3 + $0x90] sm:$0xff] }
 0x8de   :  { %v1716_v53 = vadd.f32 %v9498_v54, %v1714_v50  ;;  %v2051_v50 = vld [vmem:[%s9658_s3 + $0x10] sm:$0xff] }
 0x8df   :  { %v8554_v52 = vpack.c.bf16 %v2067_v51, %v2051_v50  ;;  %v2058_v51 = vld [vmem:[%s9658_s3 + $0x48] sm:$0xff] }
 0x8e0   :  { %v1720_v55 = vsel %vm526_vm3, %v1716_v53, -inf }
 0x8e1   :  { %1721 = vmax.xlane.f32.xlu1 %v1720_v55  ;;  %v2098_v55 = vld [vmem:[%s9658_s3 + $0x188] sm:$0xff] }
 0x8f2   :  { %1815 = vrot.lane.b32.xlu1 %v9476_v46, %s9364_s18 }
 0x8f6   :  { %1203 = vrot.lane.b32.xlu1 %v9563_v63, %s9358_s30 }
 0x8fa   :  { %1205 = vrot.lane.b32.xlu1 %v9565_v1, %s9358_s30 }
 0x8fe   :  { %1550 = vrot.lane.b32.xlu1 %v1542_v37, %s9365_s19  ;;  %v2052_v37 = vld [vmem:[%s9658_s3 + $0x18] sm:$0xff] }
 0x96a   :  { %v1719_v49 = vpop.xlane.xlu0 %1718 }
 0x96b   :  { %v1723_v56 = vsub.f32 %v1715_v45, %v1719_v49  ;;  %v8552_v45 = vpack.c.bf16 %v2068_v39, %v2052_v37  ;;  %v2084_v49 = vld [vmem:[%s9658_s3 + $0x118] sm:$0xff]  ;;  %v2087_v39 = vld [vmem:[%s9658_s3 + $0x130] sm:$0xff] }
 0x96d   :  { %v1725_v57 = vmul.f32 1.442695, %v1723_v56 }
 0x96e   :  { %v1722_v58 = vpop.xlane.xlu1 %1721 }
 0x96f   :  { %9292 = vpow2.f32 %v1725_v57  ;;  %v1724_v54 = vsub.f32 %v1716_v53, %v1722_v58  ;;  %v2082_v53 = vld [vmem:[%s9658_s3 + $0x108] sm:$0xff]  ;;  %v2100_v57 = vld [vmem:[%s9658_s3 + $0x198] sm:$0xff]  ;;  %v2081_v58 = vld [vmem:[%s9658_s3 + $0x100] sm:$0xff] }
 0x970   :  { %v8548_v56 = vpack.c.bf16 %v2098_v55, %v2082_v53  ;;  %v2074_v53 = vld [vmem:[%s9658_s3 + $0xc8] sm:$0xff]  ;;  %v2060_v55 = vld [vmem:[%s9658_s3 + $0x58] sm:$0xff] }
 0x971   :  { %v1727_v59 = vmul.f32 1.442695, %v1724_v54  ;;  %v2097_v54 = vld [vmem:[%s9658_s3 + $0x180] sm:$0xff] }
 0x972   :  { %v1816_v60 = vpop.permute.xlu1 %1815 }
 0x973   :  { %9294 = vpow2.f32 %v1727_v59  ;;  %8358 = vmatpush3.msra.mxu0 %v1816_v60  ;;  %v8556_v59 = vpack.c.bf16 %v2100_v57, %v2084_v49  ;;  %v8550_v60 = vpack.c.bf16 %v2097_v54, %v2081_v58  ;;  %v2076_v49 = vld [vmem:[%s9658_s3 + $0xd8] sm:$0xff]  ;;  %v2057_v57 = vld [vmem:[%s9658_s3 + $0x40] sm:$0xff]  ;;  %v8576_v54 = vpack.c.bf16 %v2074_v53, %v2058_v51  ;;  %v2131_v51 = vld [vmem:[%s9736_s20 + $0x90] sm:$0xff] }
 0x974   :  { %v2164_v53 = vld [vmem:[%s9736_s20 + $0x198] sm:$0xff] }
 0x976   :  { %v1204_v46 = vpop.permute.xlu1 %1203 }
 0x977   :  { %1210 = vst.msk [vmem:[#allocation2] sm:$0xff] %vm1209_vm4, %v1204_v46  ;;  %v2083_v46 = vld [vmem:[%s9658_s3 + $0x110] sm:$0xff] }
 0x979   :  { %v9293_v61 = vpop.eup %9292 }
 0x97a   :  { %v1206_v62 = vpop.permute.xlu1 %1205  ;;  %v1729_v63 = vsel %vm526_vm3, %v9293_v61, 0.0 }
 0x97b   :  { %1211 = vst.msk [vmem:[#allocation2 + $0x8] sm:$0xff] %vm1209_vm4, %v1206_v62  ;;  %1730 = vadd.xlane.f32.xlu0 %v1729_v63  ;;  %v2054_v63 = vld [vmem:[%s9658_s3 + $0x28] sm:$0xff] }
 0x97d   :  { %v9295_v0 = vpop.eup %9294 }
 0x97e   :  { %v1551_v1 = vpop.permute.xlu1 %1550  ;;  %v1732_v2 = vsel %vm526_vm3, %v9295_v0, 0.0 }
 0x97f   :  { %1556 = vst.msk [vmem:[#allocation2 + $0x8] sm:$0xff] %vm1554_vm5, %v1551_v1  ;;  %1733 = vadd.xlane.f32.xlu0 %v1732_v2  ;;  %v2056_v1 = vld [vmem:[%s9658_s3 + $0x38] sm:$0xff] }
 0x995   :  { %1739 = vrot.lane.b32.xlu0 %v9478_v47, %s9364_s18  ;;  %v1904_v47 = vld [vmem:[%s7361_s23] sm:$0xff]  ;;  %s9859_s23 = sld [smem:[%s11020_s0 + %s9365_s19]]  }
 0x996   :  { %v8536_v12 = vpack.c.bf16 %v1905_v11, %v1904_v47 }
 0x999   :  { %1548 = vrot.lane.b32.xlu0 %v1466_v34, %s9365_s19  ;;  %v2050_v34 = vld [vmem:[%s9658_s3 + $0x8] sm:$0xff] }
 0x99a   :  { %v8544_v38 = vpack.c.bf16 %v2066_v35, %v2050_v34  ;;  %v2085_v34 = vld [vmem:[%s9658_s3 + $0x120] sm:$0xff] }
 0x99c   :  { %8545 = vmatprep.subr.bf16.mxu0 %v8544_v38  ;;  %v2101_v38 = vld [vmem:[%s9658_s3 + $0x1a0] sm:$0xff] }
 0xa08   :  { %v1731_v3 = vpop.xlane.xlu0 %1730 }
 0xa09   :  { %9296 = vrcp.f32 %v1731_v3  ;;  %v2072_v3 = vld [vmem:[%s9658_s3 + $0xb8] sm:$0xff] }
 0xa0c   :  { %v1734_v4 = vpop.xlane.xlu0 %1733 }
 0xa0d   :  { %9298 = vrcp.f32 %v1734_v4  ;;  %v8568_v4 = vpack.c.bf16 %v2072_v3, %v2056_v1  ;;  %v2108_v1 = vld [vmem:[%s9658_s3 + $0x1d8] sm:$0xff] }
 0xa10   :  { %v1740_v5 = vpop.permute.xlu0 %1739 }
 0xa11   :  { %8353 = vmatpush3.msra.mxu1 %v1740_v5 }
 0xa12   :  { %8537 = vmatprep.subr.bf16.mxu1 %v8536_v12 }
 0xa13   :  { %v9297_v6 = vpop.eup %9296 }
 0xa14   :  { %v1737_v7 = vmul.f32 %v9297_v6, %v9293_v61  ;;  %v1549_v8 = vpop.permute.xlu0 %1548  ;;  %v2099_v61 = vld [vmem:[%s9658_s3 + $0x190] sm:$0xff] }
 0xa15   :  { %1555 = vst.msk [vmem:[#allocation2] sm:$0xff] %vm1554_vm5, %v1549_v8  ;;  %v8558_v62 = vpack.c.bf16 %v2099_v61, %v2083_v46  ;;  %v2059_v46 = vld [vmem:[%s9658_s3 + $0x50] sm:$0xff] }
 0xa16   :  { %8355 = vmatmul.mubr.msk.f32.vlgmr.msra.gmra.mrb[16].mxu1 %vm526_vm3, %v1737_v7  ;;  %v2075_v61 = vld [vmem:[%s9658_s3 + $0xd0] sm:$0xff] }
 0xa17   :  { %v9299_v9 = vpop.eup %9298  ;;  %8539 = vmatpush3.bf16.msra.mxu1 %v8536_v12  ;;  %v8586_v3 = vpack.c.bf16 %v2075_v61, %v2059_v46  ;;  %v2148_v46 = vld [vmem:[%s9736_s20 + $0x118] sm:$0xff]  ;;  %v2133_v61 = vld [vmem:[%s9736_s20 + $0xa0] sm:$0xff] }
 0xa18   :  { %v1738_v10 = vmul.f32 %v9299_v9, %v9295_v0  ;;  %8541 = vmatprep.subr.bf16.mxu1 %v8540_v15  ;;  %v2070_v0 = vld [vmem:[%s9658_s3 + $0xa8] sm:$0xff] }
 0xa19   :  { %v8560_v2 = vpack.c.bf16 %v2070_v0, %v2054_v63  ;;  %v2106_v63 = vld [vmem:[%s9658_s3 + $0x1c8] sm:$0xff]  ;;  %v2092_v0 = vld [vmem:[%s9658_s3 + $0x158] sm:$0xff] }
 0xa1a   :  { %8360 = vmatmul.mubr.msk.f32.vlgmr.msra.gmra.mrb[20].mxu0 %vm526_vm3, %v1738_v10 }
 0xa1b   :  { %2523 = vmatprep.mubr.f32.mxu0 %v9356_v32  ;;  %8543 = vmatpush3.bf16.msra.mxu1 %v8540_v15 }
 0xa1c   :  { %8553 = vmatprep.subr.bf16.mxu1 %v8552_v45  ;;  %8547 = vmatpush1.bf16.msra.mxu0 %v8546_v48 }
 0xa1d   :  { %8549 = vmatprep.subr.bf16.mxu0 %v8548_v56 }
 0xa20   :  { %8551 = vmatpush1.bf16.msra.mxu0 %v8550_v60  ;;  %v2073_v60 = vld [vmem:[%s9658_s3 + $0xc0] sm:$0xff] }
 0xa21   :  { %8561 = vmatprep.subr.bf16.mxu0 %v8560_v2  ;;  %v8578_v2 = vpack.c.bf16 %v2073_v60, %v2057_v57  ;;  %v2116_v57 = vld [vmem:[%s9736_s20 + $0x18] sm:$0xff]  ;;  %v2147_v60 = vld [vmem:[%s9736_s20 + $0x110] sm:$0xff] }
 0xae9   :  { %v1811_v16 = vpop.f32.mrb[16].mxu1 }
 0xaea   :  { %1893 = vrot.lane.b32.xlu0 %v1811_v16, %s9367_s24  ;;  %v8356_v17 = vpop.f32.mrb[17].mxu1 }
 0xaed   :  { %v1887_v18 = vpop.f32.mrb[20].mxu0 }
 0xaee   :  { %1895 = vrot.lane.b32.xlu1 %v1887_v18, %s9367_s24  ;;  %v8361_v19 = vpop.f32.mrb[21].mxu0 }
 0xb5c   :  { %v1894_v20 = vpop.permute.xlu0 %1893 }
 0xb5d   :  { %1900 = vst.msk [vmem:[#allocation2] sm:$0xff] %vm1899_vm6, %v1894_v20 }
 0xb60   :  { %v1896_v36 = vpop.permute.xlu1 %1895 }
 0xb61   :  { %1901 = vst.msk [vmem:[#allocation2 + $0x8] sm:$0xff] %vm1899_vm6, %v1896_v36 }
 0xb64   :  { %v1902_v40 = vld [vmem:[#allocation2] sm:$0xff] }
 0xb65   :  { %8370 = vmatprep.mubr.msk.f32.mxu1 %vm272_vm1, %v1902_v40  ;;  %v7431_v40 = vld [vmem:[%s7363_s7] ss:$0 sm:$0xff]  ;;  %s7373_s7 = sld [smem:[%s11020_s0 + %s9375_s4]]   ;;  %s9380_s4 = smov 26  }
 0xb68   :  { %v1903_v44 = vld [vmem:[#allocation2 + $0x8] sm:$0xff] }
 0xb69   :  { %8371 = vmatmul.mubr.msk.f32.vlgmr.msra.gmra.mrb[18].mxu1 %vm272_vm1, %v1903_v44  ;;  %v2053_v44 = vld [vmem:[%s9658_s3 + $0x20] sm:$0xff] }
 0xb6a   :  { %2600 = vmatprep.mubr.f32.mxu1 %v9356_v32  ;;  %8555 = vmatpush1.bf16.msra.mxu1 %v8554_v52  ;;  %v8574_v52 = vpack.c.bf16 %v2103_v42, %v2087_v39  ;;  %v2113_v39 = vld [vmem:[%s9736_s20] sm:$0xff]  ;;  %v2114_v42 = vld [vmem:[%s9736_s20 + $0x8] sm:$0xff] }
 0xb6b   :  { %8557 = vmatprep.subr.bf16.mxu1 %v8556_v59  ;;  %v8584_v59 = vpack.c.bf16 %v2076_v49, %v2060_v55  ;;  %v8610_v55 = vpack.c.bf16 %v2114_v42, %v2113_v39  ;;  %v2124_v39 = vld [vmem:[%s9736_s20 + $0x58] sm:$0xff] }
 0xb6e   :  { %8559 = vmatpush1.bf16.msra.mxu1 %v8558_v62  ;;  %v2090_v62 = vld [vmem:[%s9658_s3 + $0x148] sm:$0xff] }
 0xb6f   :  { %8569 = vmatprep.subr.bf16.mxu1 %v8568_v4  ;;  %v2089_v4 = vld [vmem:[%s9658_s3 + $0x140] sm:$0xff] }
 0xc3c   :  { %v8372_v22 = vpop.f32.mrb[18].mxu1 }
 0xc3d   :  { %v1987_v23 = vpop.f32.mrb[19].mxu1  ;;  %v1993_v24 = vadd.f32 %v8372_v22, %v7428_v21  ;;  %v2069_v22 = vld [vmem:[%s9658_s3 + $0xa0] sm:$0xff] }
 0xc3e   :  { %v1988_v25 = vadd.f32 %v7428_v21, %v1987_v23  ;;  %v2055_v23 = vld [vmem:[%s9658_s3 + $0x30] sm:$0xff] }
 0xc3f   :  { %v9643_v27 = vadd.f32 %v1993_v24, %v9424_v30  ;;  %v2071_v24 = vld [vmem:[%s9658_s3 + $0xb0] sm:$0xff] }
 0xc40   :  { %v9640_v26 = vadd.f32 %v1988_v25, %v9422_v29  ;;  %v7432_v25 = vld [vmem:[%s7364_s11] ss:$0 sm:$0xff]  ;;  %s10231_s11 = sld [smem:[%s11020_s0 + %s9376_s8]]   ;;  %s9390_s8 = smov 35  }
 0xc41   :  { %v2001_v33 = vsel %vm272_vm1, %v9643_v27, 0.0  ;;  %v2008_v29 = vmul.f32 %v9643_v27, %v9643_v27  ;;  %s7385_s10 = sld [smem:[%s11020_s0 + %s9390_s8]]  }
 0xc42   :  { %v1998_v28 = vsel %vm272_vm1, %v9640_v26, 0.0  ;;  %v2007_v31 = vmul.f32 %v9640_v26, %v9640_v26 }
 0xc43   :  { %1999 = vadd.xlane.f32.xlu0 %v1998_v28  ;;  %v2012_v30 = vsel %vm272_vm1, %v2008_v29, 0.0  ;;  %v2086_v28 = vld [vmem:[%s9658_s3 + $0x128] sm:$0xff]  ;;  %v2104_v29 = vld [vmem:[%s9658_s3 + $0x1b8] sm:$0xff] }
 0xc44   :  { %v2009_v41 = vsel %vm272_vm1, %v2007_v31, 0.0 }
 0xc45   :  { %2010 = vadd.xlane.f32.xlu1 %v2009_v41  ;;  %v2102_v41 = vld [vmem:[%s9658_s3 + $0x1a8] sm:$0xff] }
 0xc46   :  { %v8564_v45 = vpack.c.bf16 %v2102_v41, %v2086_v28  ;;  %v2095_v28 = vld [vmem:[%s9658_s3 + $0x170] sm:$0xff] }
 0xc47   :  { %2002 = vadd.xlane.f32.xlu0 %v2001_v33  ;;  %v2088_v33 = vld [vmem:[%s9658_s3 + $0x138] sm:$0xff] }
 0xc48   :  { %v8572_v48 = vpack.c.bf16 %v2104_v29, %v2088_v33  ;;  %v2129_v29 = vld [vmem:[%s9736_s20 + $0x80] sm:$0xff] }
 0xc4b   :  { %2013 = vadd.xlane.f32.xlu0 %v2012_v30  ;;  %v8562_v30 = vpack.c.bf16 %v2069_v22, %v2053_v44  ;;  %v2096_v44 = vld [vmem:[%s9658_s3 + $0x178] sm:$0xff] }
 0xcd0   :  { %v2000_v5 = vpop.xlane.xlu0 %1999 }
 0xcd1   :  { %v2005_v6 = vmul.f32 0.03125, %v2000_v5  ;;  %v2105_v5 = vld [vmem:[%s9658_s3 + $0x1c0] sm:$0xff] }
 0xcd2   :  { %v2011_v7 = vpop.xlane.xlu1 %2010 }
 0xcd3   :  { %v2017_v8 = vmul.f32 %v2005_v6, %v2005_v6  ;;  %v2015_v9 = vmul.f32 0.03125, %v2011_v7  ;;  %v2023_v20 = vsub.f32 %v9640_v26, %v2005_v6  ;;  %v8570_v26 = vpack.c.bf16 %v2071_v24, %v2055_v23  ;;  %v2091_v6 = vld [vmem:[%s9658_s3 + $0x150] sm:$0xff]  ;;  %v2093_v24 = vld [vmem:[%s9658_s3 + $0x160] sm:$0xff] }
 0xcd4   :  { %v2003_v10 = vpop.xlane.xlu0 %2002  ;;  %v2107_v7 = vld [vmem:[%s9658_s3 + $0x1d0] sm:$0xff] }
 0xcd5   :  { %v2019_v47 = vsub.f32 %v2015_v9, %v2017_v8  ;;  %v2006_v11 = vmul.f32 0.03125, %v2003_v10  ;;  %v8580_v8 = vpack.c.bf16 %v2106_v63, %v2090_v62  ;;  %v8588_v9 = vpack.c.bf16 %v2108_v1, %v2092_v0  ;;  %v2062_v10 = vld [vmem:[%s9658_s3 + $0x68] sm:$0xff]  ;;  %v2165_v63 = vld [vmem:[%s9736_s20 + $0x1a0] sm:$0xff] }
 0xcd6   :  { %v2134_v62 = vld [vmem:[%s9736_s20 + $0xa8] sm:$0xff] }
 0xcd7   :  { %v2021_v12 = vmax.f32 %v2019_v47, 0.0  ;;  %v2018_v15 = vmul.f32 %v2006_v11, %v2006_v11  ;;  %v2024_v37 = vsub.f32 %v9643_v27, %v2006_v11  ;;  %v8566_v27 = vpack.c.bf16 %v2101_v38, %v2085_v34  ;;  %v2078_v47 = vld [vmem:[%s9658_s3 + $0xe8] sm:$0xff]  ;;  %v2064_v11 = vld [vmem:[%s9658_s3 + $0x78] sm:$0xff] }
 0xcd8   :  { %v2014_v13 = vpop.xlane.xlu0 %2013  ;;  %v2162_v34 = vld [vmem:[%s9736_s20 + $0x188] sm:$0xff] }
 0xcd9   :  { %v2025_v14 = vadd.f32 1e-05, %v2021_v12  ;;  %v2016_v16 = vmul.f32 0.03125, %v2014_v13  ;;  %v2080_v12 = vld [vmem:[%s9658_s3 + $0xf8] sm:$0xff]  ;;  %v8582_v13 = vpack.c.bf16 %v2105_v5, %v2089_v4  ;;  %v2166_v0 = vld [vmem:[%s9736_s20 + $0x1a8] sm:$0xff]  ;;  %v8616_v5 = vpack.c.bf16 %v2134_v62, %v2133_v61  ;;  %v2143_v62 = vld [vmem:[%s9736_s20 + $0xf0] sm:$0xff] }
 0xcda   :  { %v2118_v4 = vld [vmem:[%s9736_s20 + $0x28] sm:$0xff] }
 0xcdb   :  { %9300 = vrsqrt.f32 %v2025_v14  ;;  %v2020_v17 = vsub.f32 %v2016_v16, %v2018_v15  ;;  %v8590_v14 = vpack.c.bf16 %v2107_v7, %v2091_v6  ;;  %v2061_v15 = vld [vmem:[%s9658_s3 + $0x60] sm:$0xff]  ;;  %v8648_v6 = vpack.c.bf16 %v2166_v0, %v2165_v63  ;;  %v2144_v63 = vld [vmem:[%s9736_s20 + $0xf8] sm:$0xff]  ;;  %v2175_v0 = vld [vmem:[%s9736_s20 + $0x1f0] sm:$0xff] }
 0xcdc   :  { %v2077_v16 = vld [vmem:[%s9658_s3 + $0xe0] sm:$0xff] }
 0xcdd   :  { %v2022_v18 = vmax.f32 %v2020_v17, 0.0  ;;  %v2063_v17 = vld [vmem:[%s9658_s3 + $0x70] sm:$0xff]  ;;  %v8594_v22 = vpack.c.bf16 %v2077_v16, %v2061_v15  ;;  %v2149_v7 = vld [vmem:[%s9736_s20 + $0x120] sm:$0xff]  ;;  %v2120_v15 = vld [vmem:[%s9736_s20 + $0x38] sm:$0xff] }
 0xcdf   :  { %v2026_v19 = vadd.f32 1e-05, %v2022_v18  ;;  %v2079_v18 = vld [vmem:[%s9658_s3 + $0xf0] sm:$0xff] }
 0xce0   :  { %v8602_v23 = vpack.c.bf16 %v2079_v18, %v2063_v17  ;;  %v2151_v18 = vld [vmem:[%s9736_s20 + $0x130] sm:$0xff] }
 0xce1   :  { %9302 = vrsqrt.f32 %v2026_v19  ;;  %v8592_v19 = vpack.c.bf16 %v2078_v47, %v2062_v10  ;;  %v2136_v10 = vld [vmem:[%s9736_s20 + $0xb8] sm:$0xff]  ;;  %v2167_v47 = vld [vmem:[%s9736_s20 + $0x1b0] sm:$0xff] }
 0xce5   :  { %v9301_v36 = vpop.eup %9300 }
 0xce6   :  { %v2029_v21 = vmul.f32 %v9301_v36, %v2023_v20  ;;  %v8600_v20 = vpack.c.bf16 %v2080_v12, %v2064_v11  ;;  %v2094_v36 = vld [vmem:[%s9658_s3 + $0x168] sm:$0xff]  ;;  %v2168_v11 = vld [vmem:[%s9736_s20 + $0x1b8] sm:$0xff] }
 0xce7   :  { %v8652_v17 = vpack.c.bf16 %v2168_v11, %v2167_v47  ;;  %v2194_v47 = vld [vmem:[%s9736_s20 + $0x288] sm:$0xff]  ;;  %v2225_v11 = vld [vmem:[%s9736_s20 + $0x380] sm:$0xff] }
 0xce8   :  { %v2038_v31 = vmul.f32 %v7431_v40, %v2029_v21  ;;  %v2112_v21 = vld [vmem:[%s9658_s3 + $0x1f8] sm:$0xff] }
 0xce9   :  { %v8604_v33 = vpack.c.bf16 %v2112_v21, %v2096_v44  ;;  %v2170_v44 = vld [vmem:[%s9736_s20 + $0x1c8] sm:$0xff] }
 0xcea   :  { %v9696_v35 = vadd.f32 %v7432_v25, %v2038_v31  ;;  %v2111_v31 = vld [vmem:[%s9658_s3 + $0x1f0] sm:$0xff] }
 0xceb   :  { %v9303_v43 = vpop.eup %9302  ;;  %v8606_v38 = vpack.c.bf16 %v2111_v31, %v2095_v28  ;;  %v2153_v31 = vld [vmem:[%s9736_s20 + $0x140] sm:$0xff] }
 0xcec   :  { %v2030_v50 = vmul.f32 %v9303_v43, %v2024_v37  ;;  %7433 = vmatmul.mubr.msk.f32.vlgmr.msra.gmra.mrb[22].mxu0 %vm272_vm1, %v9696_v35  ;;  %7435 = vmatmul.mubr.msk.f32.vlgmr.msra.gmra.mrb[20].mxu1 %vm272_vm1, %v9696_v35 }
 0xced   :  { %8563 = vmatpush1.bf16.msra.mxu0 %v8562_v30  ;;  %8571 = vmatpush1.bf16.msra.mxu1 %v8570_v26  ;;  %v2130_v30 = vld [vmem:[%s9736_s20 + $0x88] sm:$0xff]  ;;  %v2161_v26 = vld [vmem:[%s9736_s20 + $0x180] sm:$0xff] }
 0xcee   :  { %v2039_v56 = vmul.f32 %v7431_v40, %v2030_v50  ;;  %2529 = vmatprep.mubr.f32.mxu0 %v9356_v32  ;;  %2606 = vmatprep.mubr.f32.mxu1 %v9356_v32  ;;  %v2110_v40 = vld [vmem:[%s9658_s3 + $0x1e8] sm:$0xff]  ;;  %v8608_v43 = vpack.c.bf16 %v2130_v30, %v2129_v29  ;;  %v2140_v29 = vld [vmem:[%s9736_s20 + $0xd8] sm:$0xff]  ;;  %v2171_v30 = vld [vmem:[%s9736_s20 + $0x1d0] sm:$0xff] }
 0xcef   :  { %8565 = vmatprep.subr.bf16.mxu0 %v8564_v45  ;;  %8573 = vmatprep.subr.bf16.mxu1 %v8572_v48  ;;  %v8596_v41 = vpack.c.bf16 %v2110_v40, %v2094_v36  ;;  %v8640_v45 = vpack.c.bf16 %v2162_v34, %v2161_v26  ;;  %v2145_v48 = vld [vmem:[%s9736_s20 + $0x100] sm:$0xff]  ;;  %v2146_v50 = vld [vmem:[%s9736_s20 + $0x108] sm:$0xff]  ;;  %v2172_v26 = vld [vmem:[%s9736_s20 + $0x1d8] sm:$0xff] }
 0xcf0   :  { %v9713_v58 = vadd.f32 %v7432_v25, %v2039_v56  ;;  %v2109_v25 = vld [vmem:[%s9658_s3 + $0x1e0] sm:$0xff]  ;;  %v8642_v49 = vpack.c.bf16 %v2146_v50, %v2145_v48  ;;  %v2115_v56 = vld [vmem:[%s9736_s20 + $0x10] sm:$0xff]  ;;  %v2138_v36 = vld [vmem:[%s9736_s20 + $0xc8] sm:$0xff]  ;;  %s7371_s3 = sld [smem:[%s11020_s0 + %s9374_s29]]   ;;  %s9379_s29 = smov 22  }
 0xcf1   :  { %8567 = vmatpush1.bf16.msra.mxu0 %v8566_v27  ;;  %8575 = vmatpush1.bf16.msra.mxu1 %v8574_v52  ;;  %v8598_v37 = vpack.c.bf16 %v2109_v25, %v2093_v24  ;;  %v2132_v27 = vld [vmem:[%s9736_s20 + $0x98] sm:$0xff]  ;;  %v2163_v52 = vld [vmem:[%s9736_s20 + $0x190] sm:$0xff]  ;;  %v8614_v1 = vpack.c.bf16 %v2116_v57, %v2115_v56  ;;  %v2169_v40 = vld [vmem:[%s9736_s20 + $0x1c0] sm:$0xff] }
 0xcf2   :  { %7434 = vmatmul.mubr.msk.f32.gmra.mrb[24].mxu0 %vm272_vm1, %v9713_v58  ;;  %7436 = vmatmul.mubr.msk.f32.gmra.mrb[22].mxu1 %vm272_vm1, %v9713_v58  ;;  %v2122_v24 = vld [vmem:[%s9736_s20 + $0x48] sm:$0xff]  ;;  %v8656_v28 = vpack.c.bf16 %v2170_v44, %v2169_v40  ;;  %v2156_v48 = vld [vmem:[%s9736_s20 + $0x158] sm:$0xff]  ;;  %v2141_v50 = vld [vmem:[%s9736_s20 + $0xe0] sm:$0xff] }
 0xcf3   :  { %2677 = vmatprep.mubr.f32.mxu0 %v9356_v32  ;;  %2754 = vmatprep.mubr.f32.mxu1 %v9356_v32 }
 0xcf4   :  { %8577 = vmatprep.subr.bf16.mxu0 %v8576_v54  ;;  %8585 = vmatprep.subr.bf16.mxu1 %v8584_v59  ;;  %v8612_v54 = vpack.c.bf16 %v2132_v27, %v2131_v51  ;;  %v8644_v59 = vpack.c.bf16 %v2164_v53, %v2163_v52  ;;  %v2142_v51 = vld [vmem:[%s9736_s20 + $0xe8] sm:$0xff]  ;;  %v2173_v27 = vld [vmem:[%s9736_s20 + $0x1e0] sm:$0xff] }
 0xcf5   :  { %v2174_v52 = vld [vmem:[%s9736_s20 + $0x1e8] sm:$0xff]  ;;  %v8632_v56 = vpack.c.bf16 %v2142_v51, %v2141_v50  ;;  %v2179_v50 = vld [vmem:[%s9736_s20 + $0x210] sm:$0xff]  ;;  %v2180_v51 = vld [vmem:[%s9736_s20 + $0x218] sm:$0xff] }
 0xcf6   :  { %7437 = vmatmul.mubr.msk.f32.vlgmr.msra.gmra.mrb[26].mxu0 %vm272_vm1, %v9696_v35  ;;  %7439 = vmatmul.mubr.msk.f32.vlgmr.msra.gmra.mrb[24].mxu1 %vm272_vm1, %v9696_v35  ;;  %v8664_v57 = vpack.c.bf16 %v2174_v52, %v2173_v27 }
 0xcf7   :  { %8579 = vmatpush1.bf16.msra.mxu0 %v8578_v2  ;;  %8587 = vmatpush1.bf16.msra.mxu1 %v8586_v3  ;;  %v8646_v2 = vpack.c.bf16 %v2148_v46, %v2147_v60  ;;  %v2117_v3 = vld [vmem:[%s9736_s20 + $0x20] sm:$0xff]  ;;  %v2158_v60 = vld [vmem:[%s9736_s20 + $0x168] sm:$0xff] }
 0xcf8   :  { %2683 = vmatprep.mubr.f32.mxu0 %v9356_v32  ;;  %2760 = vmatprep.mubr.f32.mxu1 %v9356_v32  ;;  %v8618_v12 = vpack.c.bf16 %v2118_v4, %v2117_v3  ;;  %v2127_v3 = vld [vmem:[%s9736_s20 + $0x70] sm:$0xff]  ;;  %v2128_v4 = vld [vmem:[%s9736_s20 + $0x78] sm:$0xff] }
 0xcf9   :  { %8581 = vmatprep.subr.bf16.mxu0 %v8580_v8  ;;  %8589 = vmatprep.subr.bf16.mxu1 %v8588_v9  ;;  %v2150_v8 = vld [vmem:[%s9736_s20 + $0x128] sm:$0xff]  ;;  %v2135_v9 = vld [vmem:[%s9736_s20 + $0xb0] sm:$0xff] }
 0xcfa   :  { %7438 = vmatmul.mubr.msk.f32.gmra.mrb[28].mxu0 %vm272_vm1, %v9713_v58  ;;  %7440 = vmatmul.mubr.msk.f32.gmra.mrb[26].mxu1 %vm272_vm1, %v9713_v58  ;;  %v8620_v16 = vpack.c.bf16 %v2136_v10, %v2135_v9  ;;  %v2193_v10 = vld [vmem:[%s9736_s20 + $0x280] sm:$0xff] }
 0xcfb   :  { %8583 = vmatpush1.bf16.msra.mxu0 %v8582_v13  ;;  %8591 = vmatpush1.bf16.msra.mxu1 %v8590_v14  ;;  %v8650_v13 = vpack.c.bf16 %v2150_v8, %v2149_v7  ;;  %v2119_v14 = vld [vmem:[%s9736_s20 + $0x30] sm:$0xff]  ;;  %v2160_v8 = vld [vmem:[%s9736_s20 + $0x178] sm:$0xff] }
 0xcfc   :  { %2831 = vmatprep.mubr.f32.mxu0 %v9356_v32  ;;  %2908 = vmatprep.mubr.f32.mxu1 %v9356_v32  ;;  %v8622_v21 = vpack.c.bf16 %v2120_v15, %v2119_v14  ;;  %v2159_v7 = vld [vmem:[%s9736_s20 + $0x170] sm:$0xff]  ;;  %v2373_v15 = vlaneseq }
 0xcfd   :  { %8593 = vmatprep.subr.bf16.mxu0 %v8592_v19  ;;  %8601 = vmatprep.subr.bf16.mxu1 %v8600_v20  ;;  %v2152_v19 = vld [vmem:[%s9736_s20 + $0x138] sm:$0xff]  ;;  %v2137_v20 = vld [vmem:[%s9736_s20 + $0xc0] sm:$0xff]  ;;  %v8670_v9 = vpack.c.bf16 %v2160_v8, %v2159_v7  ;;  %v2230_v8 = vld [vmem:[%s9736_s20 + $0x3a8] sm:$0xff] }
 0xcfe   :  { %7441 = vmatmul.mubr.msk.f32.vlgmr.msra.gmra.mrb[30].mxu0 %vm272_vm1, %v9696_v35  ;;  %7443 = vmatmul.mubr.msk.f32.vlgmr.msra.gmra.mrb[28].mxu1 %vm272_vm1, %v9696_v35  ;;  %v8624_v25 = vpack.c.bf16 %v2138_v36, %v2137_v20  ;;  %v2229_v7 = vld [vmem:[%s9736_s20 + $0x3a0] sm:$0xff] }
 0xcff   :  { %8595 = vmatpush1.bf16.msra.mxu0 %v8594_v22  ;;  %8603 = vmatpush1.bf16.msra.mxu1 %v8602_v23  ;;  %v8654_v22 = vpack.c.bf16 %v2152_v19, %v2151_v18  ;;  %v2121_v23 = vld [vmem:[%s9736_s20 + $0x40] sm:$0xff] }
 0xd00   :  { %2837 = vmatprep.mubr.f32.mxu0 %v9356_v32  ;;  %2914 = vmatprep.mubr.f32.mxu1 %v9356_v32  ;;  %v8626_v34 = vpack.c.bf16 %v2122_v24, %v2121_v23  ;;  %v9870_v19 = vld [vmem:[%s9859_s23] sm:$0xff] }
 0xd01   :  { %8597 = vmatprep.subr.bf16.mxu0 %v8596_v41  ;;  %8605 = vmatprep.subr.bf16.mxu1 %v8604_v33  ;;  %v2154_v41 = vld [vmem:[%s9736_s20 + $0x148] sm:$0xff]  ;;  %v2139_v33 = vld [vmem:[%s9736_s20 + $0xd0] sm:$0xff] }
 0xd02   :  { %7442 = vmatmul.mubr.msk.f32.gmra.mrb[32].mxu0 %vm272_vm1, %v9713_v58  ;;  %7444 = vmatmul.mubr.msk.f32.gmra.mrb[30].mxu1 %vm272_vm1, %v9713_v58  ;;  %v8628_v42 = vpack.c.bf16 %v2140_v29, %v2139_v33 }
 0xd03   :  { %8599 = vmatpush1.bf16.msra.mxu0 %v8598_v37  ;;  %8607 = vmatpush1.bf16.msra.mxu1 %v8606_v38  ;;  %v8658_v37 = vpack.c.bf16 %v2154_v41, %v2153_v31  ;;  %v2123_v38 = vld [vmem:[%s9736_s20 + $0x50] sm:$0xff] }
 0xd04   :  { %2985 = vmatprep.mubr.f32.mxu0 %v9356_v32  ;;  %3062 = vmatprep.mubr.f32.mxu1 %v9356_v32  ;;  %v8630_v53 = vpack.c.bf16 %v2124_v39, %v2123_v38  ;;  %v2196_v39 = vld [vmem:[%s9736_s20 + $0x298] sm:$0xff] }
 0xd05   :  { %8609 = vmatprep.subr.bf16.mxu0 %v8608_v43  ;;  %8641 = vmatprep.subr.bf16.mxu1 %v8640_v45  ;;  %v8660_v43 = vpack.c.bf16 %v2172_v26, %v2171_v30  ;;  %v2155_v45 = vld [vmem:[%s9736_s20 + $0x150] sm:$0xff]  ;;  %v2209_v30 = vld [vmem:[%s9736_s20 + $0x300] sm:$0xff]  ;;  %v2210_v26 = vld [vmem:[%s9736_s20 + $0x308] sm:$0xff] }
 0xd06   :  { %7445 = vmatmul.mubr.msk.f32.vlgmr.msra.gmra.mrb[34].mxu0 %vm272_vm1, %v9696_v35  ;;  %7447 = vmatmul.mubr.msk.f32.vlgmr.msra.gmra.mrb[32].mxu1 %vm272_vm1, %v9696_v35 }
 0xd07   :  { %2991 = vmatprep.mubr.f32.mxu0 %v9356_v32  ;;  %3068 = vmatprep.mubr.f32.mxu1 %v9356_v32 }
 0xd08   :  { %8611 = vmatpush3.bf16.msra.mxu0 %v8610_v55  ;;  %8643 = vmatpush3.bf16.msra.mxu1 %v8642_v49  ;;  %v8662_v55 = vpack.c.bf16 %v2156_v48, %v2155_v45  ;;  %v2125_v49 = vld [vmem:[%s9736_s20 + $0x60] sm:$0xff] }
 0xd09   :  { %8613 = vmatprep.subr.bf16.mxu0 %v8612_v54  ;;  %8645 = vmatprep.subr.bf16.mxu1 %v8644_v59  ;;  %v2126_v54 = vld [vmem:[%s9736_s20 + $0x68] sm:$0xff]  ;;  %v2157_v59 = vld [vmem:[%s9736_s20 + $0x160] sm:$0xff] }
 0xd0a   :  { %7446 = vmatmul.mubr.msk.f32.gmra.mrb[36].mxu0 %vm272_vm1, %v9713_v58  ;;  %7448 = vmatmul.mubr.msk.f32.gmra.mrb[34].mxu1 %vm272_vm1, %v9713_v58  ;;  %v8634_v46 = vpack.c.bf16 %v2126_v54, %v2125_v49  ;;  %v8666_v61 = vpack.c.bf16 %v2158_v60, %v2157_v59  ;;  %v2211_v49 = vld [vmem:[%s9736_s20 + $0x310] sm:$0xff] }
 0xd0c   :  { %8615 = vmatpush3.bf16.msra.mxu0 %v8614_v1  ;;  %8647 = vmatpush3.bf16.msra.mxu1 %v8646_v2  ;;  %v8636_v1 = vpack.c.bf16 %v2144_v63, %v2143_v62  ;;  %v2176_v2 = vld [vmem:[%s9736_s20 + $0x1f8] sm:$0xff]  ;;  %v8678_v63 = vpack.c.bf16 %v2180_v51, %v2179_v50  ;;  %v2201_v51 = vld [vmem:[%s9736_s20 + $0x2c0] sm:$0xff] }
 0xd0d   :  { %8617 = vmatprep.subr.bf16.mxu0 %v8616_v5  ;;  %8649 = vmatprep.subr.bf16.mxu1 %v8648_v6  ;;  %v8668_v5 = vpack.c.bf16 %v2176_v2, %v2175_v0  ;;  %v8638_v6 = vpack.c.bf16 %v2128_v4, %v2127_v3  ;;  %v2197_v0 = vld [vmem:[%s9736_s20 + $0x2a0] sm:$0xff]  ;;  %v2216_v50 = vld [vmem:[%s9736_s20 + $0x338] sm:$0xff] }
 0xd10   :  { %8619 = vmatpush3.bf16.msra.mxu0 %v8618_v12  ;;  %8651 = vmatpush3.bf16.msra.mxu1 %v8650_v13  ;;  %v8672_v12 = vpack.c.bf16 %v2194_v47, %v2193_v10  ;;  %v2226_v13 = vld [vmem:[%s9736_s20 + $0x388] sm:$0xff] }
 0xd11   :  { %8621 = vmatprep.subr.bf16.mxu0 %v8620_v16  ;;  %8653 = vmatprep.subr.bf16.mxu1 %v8652_v17  ;;  %v8704_v14 = vpack.c.bf16 %v2226_v13, %v2225_v11  ;;  %v9861_v16 = vshrl.u32 %v2373_v15, 7  ;;  %v2213_v13 = vld [vmem:[%s9736_s20 + $0x320] sm:$0xff] }
 0xd13   :  { %v9864_v17 = vsub.s32 0, %v9861_v16  ;;  %v9867_v18 = vsub.s32 2, %v9861_v16  ;;  %v9873_v20 = vsub.s32 1, %v9861_v16  ;;  %v9876_v36 = vsub.s32 3, %v9861_v16 }
 0xd14   :  { %8623 = vmatpush3.bf16.msra.mxu0 %v8622_v21  ;;  %8655 = vmatpush3.bf16.msra.mxu1 %v8654_v22  ;;  %v9895_v45 = vsub.s32 5, %v9861_v16  ;;  %v9898_v48 = vsub.s32 7, %v9861_v16 }
 0xd15   :  { %8625 = vmatprep.subr.bf16.mxu0 %v8624_v25  ;;  %8657 = vmatprep.subr.bf16.mxu1 %v8656_v28  ;;  %v2376_v40 = vrot.slane %v9870_v19, %v9864_v17  ;;  %v2384_v44 = vrot.slane %v9870_v19, %v9867_v18  ;;  %v2380_v21 = vrot.slane %v9870_v19, %v9873_v20  ;;  %v2177_v25 = vld [vmem:[%s9736_s20 + $0x200] sm:$0xff]  ;;  %v2178_v28 = vld [vmem:[%s9736_s20 + $0x208] sm:$0xff] }
 0xd16   :  { %v2388_v22 = vrot.slane %v9870_v19, %v9876_v36  ;;  %v9906_v62 = vrot.slane %v9870_v19, %v9895_v45 }
 0xd18   :  { %8627 = vmatpush3.bf16.msra.mxu0 %v8626_v34  ;;  %8659 = vmatpush3.bf16.msra.mxu1 %v8658_v37  ;;  %v2195_v34 = vld [vmem:[%s9736_s20 + $0x290] sm:$0xff] }
 0xd19   :  { %8629 = vmatprep.subr.bf16.mxu0 %v8628_v42  ;;  %8661 = vmatprep.subr.bf16.mxu1 %v8660_v43  ;;  %v2227_v42 = vld [vmem:[%s9736_s20 + $0x390] sm:$0xff]  ;;  %v2228_v43 = vld [vmem:[%s9736_s20 + $0x398] sm:$0xff]  ;;  %v8676_v59 = vpack.c.bf16 %v2196_v39, %v2195_v34 }
 0xd1a   :  { %v8708_v60 = vpack.c.bf16 %v2228_v43, %v2227_v42  ;;  %v2183_v39 = vld [vmem:[%s9736_s20 + $0x230] sm:$0xff]  ;;  %v2184_v42 = vld [vmem:[%s9736_s20 + $0x238] sm:$0xff] }
 0xd1b   :  { %v2215_v43 = vld [vmem:[%s9736_s20 + $0x330] sm:$0xff] }
 0xd1c   :  { %8631 = vmatpush3.bf16.msra.mxu0 %v8630_v53  ;;  %8663 = vmatpush3.bf16.msra.mxu1 %v8662_v55  ;;  %v8674_v53 = vpack.c.bf16 %v2178_v28, %v2177_v25  ;;  %v8706_v55 = vpack.c.bf16 %v2210_v26, %v2209_v30  ;;  %v2199_v25 = vld [vmem:[%s9736_s20 + $0x2b0] sm:$0xff]  ;;  %v8712_v28 = vpack.c.bf16 %v2230_v8, %v2229_v7  ;;  %v2232_v30 = vld [vmem:[%s9736_s20 + $0x3b8] sm:$0xff] }
 0xd1d   :  { %8633 = vmatprep.subr.bf16.mxu0 %v8632_v56  ;;  %8665 = vmatprep.subr.bf16.mxu1 %v8664_v57  ;;  %v2212_v56 = vld [vmem:[%s9736_s20 + $0x318] sm:$0xff]  ;;  %v2203_v7 = vld [vmem:[%s9736_s20 + $0x2d0] sm:$0xff] }
 0xd20   :  { %8635 = vmatpush3.bf16.msra.mxu0 %v8634_v46  ;;  %8667 = vmatpush3.bf16.msra.mxu1 %v8666_v61 }
 0xd21   :  { %8637 = vmatprep.subr.bf16.mxu0 %v8636_v1  ;;  %8669 = vmatprep.subr.bf16.mxu1 %v8668_v5  ;;  %v2198_v1 = vld [vmem:[%s9736_s20 + $0x2a8] sm:$0xff]  ;;  %v9912_v5 = vrot.slane %v9870_v19, %v9898_v48 }
 0xd24   :  { %8639 = vmatpush3.bf16.msra.mxu0 %v8638_v6  ;;  %8671 = vmatpush3.bf16.msra.mxu1 %v8670_v9  ;;  %v8710_v6 = vpack.c.bf16 %v2212_v56, %v2211_v49  ;;  %v2181_v9 = vld [vmem:[%s9736_s20 + $0x220] sm:$0xff] }
 0xd25   :  { %8673 = vmatprep.subr.bf16.mxu0 %v8672_v12  ;;  %8705 = vmatprep.subr.bf16.mxu1 %v8704_v14  ;;  %v2182_v12 = vld [vmem:[%s9736_s20 + $0x228] sm:$0xff] }
 0xd26   :  { %v2214_v14 = vld [vmem:[%s9736_s20 + $0x328] sm:$0xff] }
 0xdbf   :  { %v2525_v23 = vpop.f32.mrb[22].mxu0  ;;  %v2602_v24 = vpop.f32.mrb[20].mxu1 }
 0xdc0   :  { %v2526_v31 = vadd.f32 %v2525_v23, %v2376_v40  ;;  %v2603_v41 = vadd.f32 %v2602_v24, %v2384_v44  ;;  %v2527_v33 = vpop.f32.mrb[23].mxu0  ;;  %v2604_v29 = vpop.f32.mrb[21].mxu1 }
 0xdc1   :  { %v2528_v37 = vadd.f32 %v2527_v33, %v2380_v21  ;;  %v2605_v38 = vadd.f32 %v2604_v29, %v2388_v22  ;;  %v2200_v33 = vld [vmem:[%s9736_s20 + $0x2b8] sm:$0xff]  ;;  %v2231_v29 = vld [vmem:[%s9736_s20 + $0x3b0] sm:$0xff] }
 0xdc2   :  { %v3075_v57 = vmax.f32 %v2526_v31, 0.0  ;;  %v3077_v54 = vmax.f32 %v2603_v41, 0.0  ;;  %v8682_v31 = vpack.c.bf16 %v2182_v12, %v2181_v9  ;;  %v8714_v41 = vpack.c.bf16 %v2214_v14, %v2213_v13 }
 0xdc3   :  { %v3076_v27 = vmax.f32 %v2528_v37, 0.0  ;;  %v3078_v52 = vmax.f32 %v2605_v38, 0.0  ;;  %v8684_v56 = vpack.c.bf16 %v2200_v33, %v2199_v25  ;;  %v2188_v25 = vld [vmem:[%s9736_s20 + $0x258] sm:$0xff] }
 0xdc5   :  { %v2531_v46 = vpop.f32.mrb[24].mxu0  ;;  %v2608_v61 = vpop.f32.mrb[22].mxu1  ;;  %3178 = vmatprep.mubr.f32.mxu0 %v3076_v27  ;;  %3253 = vmatprep.mubr.f32.mxu1 %v3078_v52  ;;  %v2202_v27 = vld [vmem:[%s9736_s20 + $0x2c8] sm:$0xff] }
 0xdc6   :  { %v2532_v2 = vadd.f32 %v2531_v46, %v2376_v40  ;;  %v2533_v3 = vpop.f32.mrb[25].mxu0  ;;  %v2610_v4 = vpop.f32.mrb[23].mxu1  ;;  %3179 = vmatmul.mubr.f32.vlgmr.msra.gmra.mrb[38].mxu0 %v3075_v57  ;;  %3254 = vmatmul.mubr.f32.vlgmr.msra.gmra.mrb[36].mxu1 %v3077_v54  ;;  %v2609_v10 = vadd.f32 %v2608_v61, %v2384_v44  ;;  %v8716_v57 = vpack.c.bf16 %v2232_v30, %v2231_v29  ;;  %v2233_v54 = vld [vmem:[%s9736_s20 + $0x3c0] sm:$0xff]  ;;  %v2206_v29 = vld [vmem:[%s9736_s20 + $0x2e8] sm:$0xff] }
 0xdc7   :  { %v2534_v47 = vadd.f32 %v2533_v3, %v2380_v21  ;;  %v2611_v11 = vadd.f32 %v2610_v4, %v2388_v22  ;;  %8675 = vmatpush3.bf16.msra.mxu0 %v8674_v53  ;;  %8707 = vmatpush3.bf16.msra.mxu1 %v8706_v55  ;;  %v8680_v22 = vpack.c.bf16 %v2198_v1, %v2197_v0  ;;  %v2185_v0 = vld [vmem:[%s9736_s20 + $0x240] sm:$0xff]  ;;  %v2186_v1 = vld [vmem:[%s9736_s20 + $0x248] sm:$0xff] }
 0xdc8   :  { %8677 = vmatprep.subr.bf16.mxu0 %v8676_v59  ;;  %8709 = vmatprep.subr.bf16.mxu1 %v8708_v60  ;;  %v3091_v26 = vmax.f32 %v2532_v2, 0.0  ;;  %v3093_v34 = vmax.f32 %v2609_v10, 0.0  ;;  %v2234_v59 = vld [vmem:[%s9736_s20 + $0x3c8] sm:$0xff]  ;;  %v8686_v61 = vpack.c.bf16 %v2184_v42, %v2183_v39  ;;  %v8688_v2 = vpack.c.bf16 %v2202_v27, %v2201_v51  ;;  %v2217_v4 = vld [vmem:[%s9736_s20 + $0x340] sm:$0xff]  ;;  %v2204_v10 = vld [vmem:[%s9736_s20 + $0x2d8] sm:$0xff] }
 0xdc9   :  { %v3092_v15 = vmax.f32 %v2534_v47, 0.0  ;;  %v3094_v40 = vmax.f32 %v2611_v11, 0.0  ;;  %v9920_v23 = vpop.f32.mrb[26].mxu0  ;;  %v9922_v24 = vpop.f32.mrb[24].mxu1  ;;  %v8720_v3 = vpack.c.bf16 %v2234_v59, %v2233_v54  ;;  %v2235_v47 = vld [vmem:[%s9736_s20 + $0x3d0] sm:$0xff]  ;;  %v2236_v11 = vld [vmem:[%s9736_s20 + $0x3d8] sm:$0xff]  ;;  %v8690_v14 = vpack.c.bf16 %v2186_v1, %v2185_v0 }
 0xdca   :  { %v2681_v44 = vpop.f32.mrb[27].mxu0  ;;  %v2758_v21 = vpop.f32.mrb[25].mxu1  ;;  %v2237_v30 = vld [vmem:[%s9736_s20 + $0x3e0] sm:$0xff]  ;;  %v9984_v51 = vsub.s32 6, %v9861_v16  ;;  %v2240_v0 = vld [vmem:[%s9736_s20 + $0x3f8] sm:$0xff] }
 0xdcb   :  { %v2682_v37 = vadd.f32 %v2681_v44, %v9906_v62  ;;  %v2759_v38 = vadd.f32 %v2758_v21, %v9912_v5  ;;  %8679 = vmatpush3.bf16.msra.mxu0 %v8678_v63  ;;  %8711 = vmatpush3.bf16.msra.mxu1 %v8710_v6  ;;  %v8718_v63 = vpack.c.bf16 %v2216_v50, %v2215_v43  ;;  %v2218_v6 = vld [vmem:[%s9736_s20 + $0x348] sm:$0xff]  ;;  %v2189_v43 = vld [vmem:[%s9736_s20 + $0x260] sm:$0xff] }
 0xdcc   :  { %3183 = vmatprep.mubr.f32.mxu0 %v3092_v15  ;;  %3258 = vmatprep.mubr.f32.mxu1 %v3094_v40  ;;  %v8722_v15 = vpack.c.bf16 %v2218_v6, %v2217_v4  ;;  %v2187_v40 = vld [vmem:[%s9736_s20 + $0x250] sm:$0xff]  ;;  %v8692_v44 = vpack.c.bf16 %v2204_v10, %v2203_v7  ;;  %v8724_v21 = vpack.c.bf16 %v2236_v11, %v2235_v47  ;;  %v2190_v50 = vld [vmem:[%s9736_s20 + $0x268] sm:$0xff]  ;;  %v2192_v7 = vld [vmem:[%s9736_s20 + $0x278] sm:$0xff] }
 0xdcd   :  { %v3080_v52 = vmax.f32 %v2682_v37, 0.0  ;;  %v3082_v53 = vmax.f32 %v2759_v38, 0.0  ;;  %3184 = vmatmul.mubr.f32.gmra.mrb[40].mxu0 %v3091_v26  ;;  %3259 = vmatmul.mubr.f32.gmra.mrb[38].mxu1 %v3093_v34  ;;  %v9936_v55 = vpop.f32.mrb[28].mxu0  ;;  %v9938_v49 = vpop.f32.mrb[26].mxu1  ;;  %v2238_v26 = vld [vmem:[%s9736_s20 + $0x3e8] sm:$0xff]  ;;  %v9979_v38 = vsub.s32 4, %v9861_v16  ;;  %v8694_v39 = vpack.c.bf16 %v2188_v25, %v2187_v40 }
 0xdce   :  { %8681 = vmatprep.subr.bf16.mxu0 %v8680_v22  ;;  %8713 = vmatprep.subr.bf16.mxu1 %v8712_v28  ;;  %v9942_v60 = vpop.f32.mrb[29].mxu0  ;;  %v9944_v46 = vpop.f32.mrb[27].mxu1  ;;  %v2219_v22 = vld [vmem:[%s9736_s20 + $0x350] sm:$0xff]  ;;  %v2220_v28 = vld [vmem:[%s9736_s20 + $0x358] sm:$0xff]  ;;  %v2400_v47 = vrot.slane %v9870_v19, %v9984_v51  ;;  %v2257_v40 = vld [vmem:[%s9736_s20 + $0x480] sm:$0xff] }
 0xdcf   :  { %8683 = vmatpush3.bf16.msra.mxu0 %v8682_v31  ;;  %8715 = vmatpush3.bf16.msra.mxu1 %v8714_v41  ;;  %v2205_v31 = vld [vmem:[%s9736_s20 + $0x2e0] sm:$0xff]  ;;  %v8726_v42 = vpack.c.bf16 %v2220_v28, %v2219_v22  ;;  %v2191_v6 = vld [vmem:[%s9736_s20 + $0x270] sm:$0xff]  ;;  %v2258_v25 = vld [vmem:[%s9736_s20 + $0x488] sm:$0xff] }
 0xdd0   :  { %3328 = vmatprep.mubr.f32.mxu0 %v3080_v52  ;;  %3403 = vmatprep.mubr.f32.mxu1 %v3082_v53  ;;  %v8696_v27 = vpack.c.bf16 %v2206_v29, %v2205_v31  ;;  %v8728_v52 = vpack.c.bf16 %v2238_v26, %v2237_v30  ;;  %v2221_v53 = vld [vmem:[%s9736_s20 + $0x360] sm:$0xff]  ;;  %v2223_v10 = vld [vmem:[%s9736_s20 + $0x370] sm:$0xff]  ;;  %v2290_v28 = vld [vmem:[%s9736_s20 + $0x588] sm:$0xff] }
 0xdd1   :  { %v9951_v8 = vpop.f32.mrb[30].mxu0  ;;  %v9953_v9 = vpop.f32.mrb[28].mxu1  ;;  %8685 = vmatprep.subr.bf16.mxu0 %v8684_v56  ;;  %8717 = vmatprep.subr.bf16.mxu1 %v8716_v57  ;;  %v2222_v56 = vld [vmem:[%s9736_s20 + $0x368] sm:$0xff]  ;;  %v2207_v57 = vld [vmem:[%s9736_s20 + $0x2f0] sm:$0xff]  ;;  %v2289_v22 = vld [vmem:[%s9736_s20 + $0x580] sm:$0xff] }
 0xdd2   :  { %v9958_v12 = vpop.f32.mrb[31].mxu0  ;;  %v9960_v13 = vpop.f32.mrb[29].mxu1  ;;  %v8730_v4 = vpack.c.bf16 %v2222_v56, %v2221_v53  ;;  %v10017_v31 = vld [vmem:[%s9859_s23 + $0x8] sm:$0xff]  ;;  %v2241_v30 = vld [vmem:[%s9736_s20 + $0x400] sm:$0xff]  ;;  %v2757_v56 = vadd.f32 %v9922_v24, %v2400_v47 }
 0xdd3   :  { %8687 = vmatpush3.bf16.msra.mxu0 %v8686_v61  ;;  %8719 = vmatpush3.bf16.msra.mxu1 %v8718_v63  ;;  %v2208_v61 = vld [vmem:[%s9736_s20 + $0x2f8] sm:$0xff]  ;;  %v2239_v63 = vld [vmem:[%s9736_s20 + $0x3f0] sm:$0xff]  ;;  %v2242_v26 = vld [vmem:[%s9736_s20 + $0x408] sm:$0xff] }
 0xdd4   :  { %8689 = vmatprep.subr.bf16.mxu0 %v8688_v2  ;;  %8721 = vmatprep.subr.bf16.mxu1 %v8720_v3  ;;  %v2392_v2 = vrot.slane %v9870_v19, %v9979_v38  ;;  %v8698_v3 = vpack.c.bf16 %v2190_v50, %v2189_v43  ;;  %v8700_v11 = vpack.c.bf16 %v2208_v61, %v2207_v57  ;;  %v2273_v50 = vld [vmem:[%s9736_s20 + $0x500] sm:$0xff]  ;;  %v2260_v61 = vld [vmem:[%s9736_s20 + $0x498] sm:$0xff] }
 0xdd5   :  { %v9967_v41 = vpop.f32.mrb[32].mxu0  ;;  %v9969_v33 = vpop.f32.mrb[30].mxu1  ;;  %v8736_v43 = vpack.c.bf16 %v2258_v25, %v2257_v40  ;;  %v8768_v57 = vpack.c.bf16 %v2290_v28, %v2289_v22  ;;  %v8738_v24 = vpack.c.bf16 %v2242_v26, %v2241_v30  ;;  %v2275_v30 = vld [vmem:[%s9736_s20 + $0x510] sm:$0xff]  ;;  %v2276_v26 = vld [vmem:[%s9736_s20 + $0x518] sm:$0xff] }
 0xdd6   :  { %v9974_v34 = vpop.f32.mrb[33].mxu0  ;;  %v9976_v37 = vpop.f32.mrb[31].mxu1  ;;  %v2680_v53 = vadd.f32 %v9920_v23, %v2392_v2  ;;  %v10043_v23 = vrot.slane %v10017_v31, %v9876_v36 }
 0xdd7   :  { %8691 = vmatpush3.bf16.msra.mxu0 %v8690_v14  ;;  %8723 = vmatpush3.bf16.msra.mxu1 %v8722_v15  ;;  %v8732_v14 = vpack.c.bf16 %v2240_v0, %v2239_v63  ;;  %v2224_v15 = vld [vmem:[%s9736_s20 + $0x378] sm:$0xff]  ;;  %v2291_v63 = vld [vmem:[%s9736_s20 + $0x590] sm:$0xff] }
 0xdd8   :  { %8693 = vmatprep.subr.bf16.mxu0 %v8692_v44  ;;  %8725 = vmatprep.subr.bf16.mxu1 %v8724_v21  ;;  %v2292_v0 = vld [vmem:[%s9736_s20 + $0x598] sm:$0xff]  ;;  %v2913_v28 = vadd.f32 %v9960_v13, %v10043_v23 }
 0xdd9   :  { %v9989_v54 = vpop.f32.mrb[34].mxu0  ;;  %v9991_v59 = vpop.f32.mrb[32].mxu1 }
 0xdda   :  { %v9996_v16 = vpop.f32.mrb[35].mxu0  ;;  %v9998_v1 = vpop.f32.mrb[33].mxu1 }
 0xddb   :  { %8695 = vmatpush3.bf16.msra.mxu0 %v8694_v39  ;;  %8727 = vmatpush3.bf16.msra.mxu1 %v8726_v42  ;;  %v8702_v39 = vpack.c.bf16 %v2192_v7, %v2191_v6  ;;  %v8734_v42 = vpack.c.bf16 %v2224_v15, %v2223_v10  ;;  %v10039_v6 = vrot.slane %v10017_v31, %v9873_v20  ;;  %v3079_v10 = vmax.f32 %v2680_v53, 0.0  ;;  %v2244_v15 = vld [vmem:[%s9736_s20 + $0x418] sm:$0xff] }
 0xddc   :  { %8697 = vmatprep.subr.bf16.mxu0 %v8696_v27  ;;  %8729 = vmatprep.subr.bf16.mxu1 %v8728_v52  ;;  %v2274_v27 = vld [vmem:[%s9736_s20 + $0x508] sm:$0xff]  ;;  %v2259_v52 = vld [vmem:[%s9736_s20 + $0x490] sm:$0xff] }
 0xddd   :  { %v10010_v44 = vpop.f32.mrb[36].mxu0  ;;  %v10012_v21 = vpop.f32.mrb[34].mxu1  ;;  %v8770_v7 = vpack.c.bf16 %v2274_v27, %v2273_v50  ;;  %v2836_v22 = vadd.f32 %v9958_v12, %v10039_v6  ;;  %v2246_v50 = vld [vmem:[%s9736_s20 + $0x428] sm:$0xff] }
 0xdde   :  { %v10019_v19 = vpop.f32.mrb[37].mxu0  ;;  %v10021_v29 = vpop.f32.mrb[35].mxu1 }
 0xddf   :  { %8699 = vmatpush3.bf16.msra.mxu0 %v8698_v3  ;;  %8731 = vmatpush3.bf16.msra.mxu1 %v8730_v4  ;;  %v2688_v3 = vadd.f32 %v9942_v60, %v9906_v62  ;;  %v2765_v4 = vadd.f32 %v9944_v46, %v9912_v5  ;;  %v8740_v62 = vpack.c.bf16 %v2260_v61, %v2259_v52  ;;  %v3081_v5 = vmax.f32 %v2757_v56, 0.0  ;;  %v2278_v61 = vld [vmem:[%s9736_s20 + $0x528] sm:$0xff] }
 0xde0   :  { %8701 = vmatprep.subr.bf16.mxu0 %v8700_v11  ;;  %8733 = vmatprep.subr.bf16.mxu1 %v8732_v14  ;;  %v8772_v60 = vpack.c.bf16 %v2292_v0, %v2291_v63  ;;  %v2686_v46 = vadd.f32 %v9936_v55, %v2392_v2  ;;  %v2763_v11 = vadd.f32 %v9938_v49, %v2400_v47  ;;  %v2243_v14 = vld [vmem:[%s9736_s20 + $0x410] sm:$0xff]  ;;  %v2261_v55 = vld [vmem:[%s9736_s20 + $0x4a0] sm:$0xff]  ;;  %v2262_v49 = vld [vmem:[%s9736_s20 + $0x4a8] sm:$0xff]  ;;  %v3084_v27 = vmax.f32 %v2836_v22, 0.0 }
 0xde1   :  { %v3096_v40 = vmax.f32 %v2688_v3, 0.0  ;;  %v3098_v25 = vmax.f32 %v2765_v4, 0.0  ;;  %v2293_v2 = vld [vmem:[%s9736_s20 + $0x5a0] sm:$0xff]  ;;  %v2294_v47 = vld [vmem:[%s9736_s20 + $0x5a8] sm:$0xff]  ;;  %v8742_v13 = vpack.c.bf16 %v2244_v15, %v2243_v14  ;;  %v3086_v52 = vmax.f32 %v2913_v28, 0.0  ;;  %v2263_v63 = vld [vmem:[%s9736_s20 + $0x4b0] sm:$0xff] }
 0xde2   :  { %v3097_v12 = vmax.f32 %v2763_v11, 0.0  ;;  %v8744_v53 = vpack.c.bf16 %v2262_v49, %v2261_v55  ;;  %v8776_v56 = vpack.c.bf16 %v2294_v47, %v2293_v2  ;;  %v2264_v0 = vld [vmem:[%s9736_s20 + $0x4b8] sm:$0xff]  ;;  %v2295_v3 = vld [vmem:[%s9736_s20 + $0x5b0] sm:$0xff]  ;;  %v2265_v14 = vld [vmem:[%s9736_s20 + $0x4c0] sm:$0xff] }
 0xde3   :  { %8703 = vmatpush3.bf16.msra.mxu0 %v8702_v39  ;;  %8735 = vmatpush3.bf16.msra.mxu1 %v8734_v42  ;;  %v3095_v39 = vmax.f32 %v2686_v46, 0.0  ;;  %v8774_v42 = vpack.c.bf16 %v2276_v26, %v2275_v30  ;;  %v2296_v4 = vld [vmem:[%s9736_s20 + $0x5b8] sm:$0xff]  ;;  %v2279_v46 = vld [vmem:[%s9736_s20 + $0x530] sm:$0xff]  ;;  %v2266_v15 = vld [vmem:[%s9736_s20 + $0x4c8] sm:$0xff] }
 0xde4   :  { %8737 = vmatprep.subr.bf16.mxu0 %v8736_v43  ;;  %8769 = vmatprep.subr.bf16.mxu1 %v8768_v57  ;;  %v2245_v43 = vld [vmem:[%s9736_s20 + $0x420] sm:$0xff]  ;;  %v2280_v11 = vld [vmem:[%s9736_s20 + $0x538] sm:$0xff]  ;;  %v2250_v26 = vld [vmem:[%s9736_s20 + $0x448] sm:$0xff]  ;;  %v8752_v55 = vpack.c.bf16 %v2266_v15, %v2265_v14 }
 0xde5   :  { %v2277_v57 = vld [vmem:[%s9736_s20 + $0x520] sm:$0xff]  ;;  %v8782_v28 = vpack.c.bf16 %v2280_v11, %v2279_v46  ;;  %v2282_v47 = vld [vmem:[%s9736_s20 + $0x548] sm:$0xff]  ;;  %v2271_v14 = vld [vmem:[%s9736_s20 + $0x4f0] sm:$0xff] }
 0xde6   :  { %3329 = vmatmul.mubr.f32.vlgmr.msra.gmra.mrb[42].mxu0 %v3079_v10  ;;  %3404 = vmatmul.mubr.f32.vlgmr.msra.gmra.mrb[40].mxu1 %v3081_v5  ;;  %v8748_v10 = vpack.c.bf16 %v2264_v0, %v2263_v63  ;;  %v8780_v5 = vpack.c.bf16 %v2296_v4, %v2295_v3  ;;  %v2249_v30 = vld [vmem:[%s9736_s20 + $0x440] sm:$0xff]  ;;  %v2270_v0 = vld [vmem:[%s9736_s20 + $0x4e8] sm:$0xff]  ;;  %v2272_v15 = vld [vmem:[%s9736_s20 + $0x4f8] sm:$0xff] }
 0xde7   :  { %3333 = vmatprep.mubr.f32.mxu0 %v3096_v40  ;;  %3408 = vmatprep.mubr.f32.mxu1 %v3098_v25  ;;  %v2297_v40 = vld [vmem:[%s9736_s20 + $0x5c0] sm:$0xff]  ;;  %v2298_v25 = vld [vmem:[%s9736_s20 + $0x5c8] sm:$0xff] }
 0xde8   :  { %8739 = vmatpush3.bf16.msra.mxu0 %v8738_v24  ;;  %8771 = vmatpush3.bf16.msra.mxu1 %v8770_v7  ;;  %v8746_v24 = vpack.c.bf16 %v2246_v50, %v2245_v43  ;;  %v8778_v7 = vpack.c.bf16 %v2278_v61, %v2277_v57  ;;  %v8784_v49 = vpack.c.bf16 %v2298_v25, %v2297_v40  ;;  %v2281_v2 = vld [vmem:[%s9736_s20 + $0x540] sm:$0xff]  ;;  %v2283_v57 = vld [vmem:[%s9736_s20 + $0x550] sm:$0xff]  ;;  %v2284_v61 = vld [vmem:[%s9736_s20 + $0x558] sm:$0xff] }
 0xde9   :  { %8741 = vmatprep.subr.bf16.mxu0 %v8740_v62  ;;  %8773 = vmatprep.subr.bf16.mxu1 %v8772_v60  ;;  %v2247_v62 = vld [vmem:[%s9736_s20 + $0x430] sm:$0xff]  ;;  %v2248_v60 = vld [vmem:[%s9736_s20 + $0x438] sm:$0xff]  ;;  %v8754_v43 = vpack.c.bf16 %v2250_v26, %v2249_v30  ;;  %v8786_v50 = vpack.c.bf16 %v2282_v47, %v2281_v2  ;;  %v2269_v63 = vld [vmem:[%s9736_s20 + $0x4e0] sm:$0xff]  ;;  %v2416_v2 = vrot.slane %v10017_v31, %v9867_v18 }
 0xdea   :  { %3334 = vmatmul.mubr.f32.gmra.mrb[44].mxu0 %v3095_v39  ;;  %3409 = vmatmul.mubr.f32.gmra.mrb[42].mxu1 %v3097_v12  ;;  %v8750_v22 = vpack.c.bf16 %v2248_v60, %v2247_v62  ;;  %v2267_v39 = vld [vmem:[%s9736_s20 + $0x4d0] sm:$0xff]  ;;  %v2268_v12 = vld [vmem:[%s9736_s20 + $0x4d8] sm:$0xff]  ;;  %v2301_v3 = vld [vmem:[%s9736_s20 + $0x5e0] sm:$0xff]  ;;  %v8764_v47 = vpack.c.bf16 %v2272_v15, %v2271_v14 }
 0xdeb   :  { %3478 = vmatprep.mubr.f32.mxu0 %v3084_v27  ;;  %3553 = vmatprep.mubr.f32.mxu1 %v3086_v52  ;;  %v2251_v27 = vld [vmem:[%s9736_s20 + $0x450] sm:$0xff]  ;;  %v2252_v52 = vld [vmem:[%s9736_s20 + $0x458] sm:$0xff]  ;;  %v2302_v4 = vld [vmem:[%s9736_s20 + $0x5e8] sm:$0xff]  ;;  %v2917_v15 = vadd.f32 %v9969_v33, %v2416_v2 }
 0xdec   :  { %8743 = vmatpush3.bf16.msra.mxu0 %v8742_v13  ;;  %8775 = vmatpush3.bf16.msra.mxu1 %v8774_v42  ;;  %v2299_v13 = vld [vmem:[%s9736_s20 + $0x5d0] sm:$0xff]  ;;  %v2300_v42 = vld [vmem:[%s9736_s20 + $0x5d8] sm:$0xff]  ;;  %v2253_v62 = vld [vmem:[%s9736_s20 + $0x460] sm:$0xff] }
 0xded   :  { %8745 = vmatprep.subr.bf16.mxu0 %v8744_v53  ;;  %8777 = vmatprep.subr.bf16.mxu1 %v8776_v56  ;;  %v8756_v53 = vpack.c.bf16 %v2268_v12, %v2267_v39  ;;  %v8788_v56 = vpack.c.bf16 %v2300_v42, %v2299_v13  ;;  %v2254_v60 = vld [vmem:[%s9736_s20 + $0x468] sm:$0xff]  ;;  %v2285_v46 = vld [vmem:[%s9736_s20 + $0x560] sm:$0xff]  ;;  %v2303_v40 = vld [vmem:[%s9736_s20 + $0x5f0] sm:$0xff] }
 0xdee   :  { %v2286_v11 = vld [vmem:[%s9736_s20 + $0x568] sm:$0xff]  ;;  %v2304_v25 = vld [vmem:[%s9736_s20 + $0x5f8] sm:$0xff]  ;;  %v2255_v26 = vld [vmem:[%s9736_s20 + $0x470] sm:$0xff] }
 0xdef   :  { %v8794_v30 = vpack.c.bf16 %v2286_v11, %v2285_v46  ;;  %v8796_v39 = vpack.c.bf16 %v2304_v25, %v2303_v40  ;;  %v2288_v12 = vld [vmem:[%s9736_s20 + $0x578] sm:$0xff]  ;;  %v2321_v13 = vld [vmem:[%s9736_s20 + $0x680] sm:$0xff]  ;;  %v2322_v42 = vld [vmem:[%s9736_s20 + $0x688] sm:$0xff]  ;;  %v10127_v46 = vrot.slane %v10017_v31, %v9895_v45 }
 0xdf0   :  { %8747 = vmatpush3.bf16.msra.mxu0 %v8746_v24  ;;  %8779 = vmatpush3.bf16.msra.mxu1 %v8778_v7  ;;  %v8758_v24 = vpack.c.bf16 %v2252_v52, %v2251_v27  ;;  %v8790_v7 = vpack.c.bf16 %v2284_v61, %v2283_v57  ;;  %v2305_v27 = vld [vmem:[%s9736_s20 + $0x600] sm:$0xff]  ;;  %v2306_v52 = vld [vmem:[%s9736_s20 + $0x608] sm:$0xff]  ;;  %v8800_v57 = vpack.c.bf16 %v2322_v42, %v2321_v13  ;;  %v2307_v40 = vld [vmem:[%s9736_s20 + $0x610] sm:$0xff] }
 0xdf1   :  { %8749 = vmatprep.subr.bf16.mxu0 %v8748_v10  ;;  %8781 = vmatprep.subr.bf16.mxu1 %v8780_v5  ;;  %v8760_v10 = vpack.c.bf16 %v2270_v0, %v2269_v63  ;;  %v8792_v5 = vpack.c.bf16 %v2302_v4, %v2301_v3  ;;  %v2337_v61 = vld [vmem:[%s9736_s20 + $0x700] sm:$0xff]  ;;  %v2338_v63 = vld [vmem:[%s9736_s20 + $0x708] sm:$0xff]  ;;  %v2323_v0 = vld [vmem:[%s9736_s20 + $0x690] sm:$0xff]  ;;  %v2911_v4 = vadd.f32 %v9953_v9, %v2416_v2 }
 0xdf2   :  { %v8802_v9 = vpack.c.bf16 %v2306_v52, %v2305_v27  ;;  %v8834_v11 = vpack.c.bf16 %v2338_v63, %v2337_v61  ;;  %v2308_v25 = vld [vmem:[%s9736_s20 + $0x618] sm:$0xff]  ;;  %v2326_v33 = vld [vmem:[%s9736_s20 + $0x6a8] sm:$0xff]  ;;  %v2309_v13 = vld [vmem:[%s9736_s20 + $0x620] sm:$0xff] }
 0xdf3   :  { %v2358_v2 = vld [vmem:[%s9736_s20 + $0x7a8] sm:$0xff]  ;;  %v2328_v61 = vld [vmem:[%s9736_s20 + $0x6b8] sm:$0xff]  ;;  %v2359_v63 = vld [vmem:[%s9736_s20 + $0x7b0] sm:$0xff] }
 0xdf4   :  { %8751 = vmatpush3.bf16.msra.mxu0 %v8750_v22  ;;  %8783 = vmatpush3.bf16.msra.mxu1 %v8782_v28  ;;  %v2408_v22 = vrot.slane %v10017_v31, %v9864_v17  ;;  %v8762_v28 = vpack.c.bf16 %v2254_v60, %v2253_v62  ;;  %v2355_v62 = vld [vmem:[%s9736_s20 + $0x790] sm:$0xff]  ;;  %v2356_v60 = vld [vmem:[%s9736_s20 + $0x798] sm:$0xff]  ;;  %v2310_v42 = vld [vmem:[%s9736_s20 + $0x628] sm:$0xff] }
 0xdf5   :  { %8753 = vmatprep.subr.bf16.mxu0 %v8752_v55  ;;  %8785 = vmatprep.subr.bf16.mxu1 %v8784_v49  ;;  %v2256_v55 = vld [vmem:[%s9736_s20 + $0x478] sm:$0xff]  ;;  %v2287_v49 = vld [vmem:[%s9736_s20 + $0x570] sm:$0xff] }
 0xdf6   :  { %v2834_v3 = vadd.f32 %v9951_v8, %v2408_v22  ;;  %v10131_v8 = vrot.slane %v10017_v31, %v9898_v48 }
 0xdf8   :  { %8755 = vmatpush3.bf16.msra.mxu0 %v8754_v43  ;;  %8787 = vmatpush3.bf16.msra.mxu1 %v8786_v50  ;;  %v2353_v43 = vld [vmem:[%s9736_s20 + $0x780] sm:$0xff]  ;;  %v2354_v50 = vld [vmem:[%s9736_s20 + $0x788] sm:$0xff]  ;;  %v3083_v14 = vmax.f32 %v2834_v3, 0.0  ;;  %v8810_v3 = vpack.c.bf16 %v2310_v42, %v2309_v13 }
 0xdf9   :  { %8757 = vmatprep.subr.bf16.mxu0 %v8756_v53  ;;  %8789 = vmatprep.subr.bf16.mxu1 %v8788_v56  ;;  %v8766_v53 = vpack.c.bf16 %v2256_v55, %v2255_v26  ;;  %v8798_v56 = vpack.c.bf16 %v2288_v12, %v2287_v49  ;;  %v2990_v26 = vadd.f32 %v9996_v16, %v10127_v46  ;;  %v2339_v49 = vld [vmem:[%s9736_s20 + $0x710] sm:$0xff]  ;;  %v3101_v16 = vmax.f32 %v2917_v15, 0.0  ;;  %v2314_v15 = vld [vmem:[%s9736_s20 + $0x648] sm:$0xff]  ;;  %v2333_v13 = vld [vmem:[%s9736_s20 + $0x6e0] sm:$0xff] }
 0xdfa   :  { %v3067_v55 = vadd.f32 %v9998_v1, %v10131_v8  ;;  %v8806_v1 = vpack.c.bf16 %v2308_v25, %v2307_v40  ;;  %v2334_v42 = vld [vmem:[%s9736_s20 + $0x6e8] sm:$0xff] }
 0xdfc   :  { %8759 = vmatpush3.bf16.msra.mxu0 %v8758_v24  ;;  %8791 = vmatpush3.bf16.msra.mxu1 %v8790_v7  ;;  %v8832_v24 = vpack.c.bf16 %v2354_v50, %v2353_v43  ;;  %v2324_v7 = vld [vmem:[%s9736_s20 + $0x698] sm:$0xff]  ;;  %v3088_v43 = vmax.f32 %v2990_v26, 0.0  ;;  %v3090_v50 = vmax.f32 %v3067_v55, 0.0  ;;  %v2331_v26 = vld [vmem:[%s9736_s20 + $0x6d0] sm:$0xff] }
 0xdfd   :  { %8761 = vmatprep.subr.bf16.mxu0 %v8760_v10  ;;  %8793 = vmatprep.subr.bf16.mxu1 %v8792_v5  ;;  %v2842_v10 = vadd.f32 %v9974_v34, %v10039_v6  ;;  %v2919_v5 = vadd.f32 %v9976_v37, %v10043_v23  ;;  %v8804_v34 = vpack.c.bf16 %v2324_v7, %v2323_v0  ;;  %v3085_v37 = vmax.f32 %v2911_v4, 0.0  ;;  %v2360_v0 = vld [vmem:[%s9736_s20 + $0x7b8] sm:$0xff] }
 0xdfe   :  { %v8836_v6 = vpack.c.bf16 %v2356_v60, %v2355_v62  ;;  %v2840_v23 = vadd.f32 %v9967_v41, %v2408_v22  ;;  %v2325_v41 = vld [vmem:[%s9736_s20 + $0x6a0] sm:$0xff]  ;;  %v2312_v7 = vld [vmem:[%s9736_s20 + $0x638] sm:$0xff]  ;;  %v8844_v60 = vpack.c.bf16 %v2360_v0, %v2359_v63  ;;  %v2350_v0 = vld [vmem:[%s9736_s20 + $0x768] sm:$0xff] }
 0xdff   :  { %v2357_v22 = vld [vmem:[%s9736_s20 + $0x7a0] sm:$0xff]  ;;  %v8808_v27 = vpack.c.bf16 %v2326_v33, %v2325_v41  ;;  %v2332_v55 = vld [vmem:[%s9736_s20 + $0x6d8] sm:$0xff] }
 0xe00   :  { %8763 = vmatpush3.bf16.msra.mxu0 %v8762_v28  ;;  %8795 = vmatpush3.bf16.msra.mxu1 %v8794_v30  ;;  %v3100_v28 = vmax.f32 %v2842_v10, 0.0  ;;  %v3102_v30 = vmax.f32 %v2919_v5, 0.0  ;;  %v8840_v52 = vpack.c.bf16 %v2358_v2, %v2357_v22  ;;  %v2343_v10 = vld [vmem:[%s9736_s20 + $0x730] sm:$0xff]  ;;  %v2344_v5 = vld [vmem:[%s9736_s20 + $0x738] sm:$0xff]  ;;  %v2349_v63 = vld [vmem:[%s9736_s20 + $0x760] sm:$0xff] }
 0xe01   :  { %8765 = vmatprep.subr.bf16.mxu0 %v8764_v47  ;;  %8797 = vmatprep.subr.bf16.mxu1 %v8796_v39  ;;  %v2340_v47 = vld [vmem:[%s9736_s20 + $0x718] sm:$0xff]  ;;  %v3099_v39 = vmax.f32 %v2840_v23, 0.0  ;;  %v2313_v23 = vld [vmem:[%s9736_s20 + $0x640] sm:$0xff]  ;;  %v2315_v22 = vld [vmem:[%s9736_s20 + $0x650] sm:$0xff] }
 0xe02   :  { %v8838_v12 = vpack.c.bf16 %v2340_v47, %v2339_v49  ;;  %v2363_v49 = vld [vmem:[%s9736_s20 + $0x7d0] sm:$0xff]  ;;  %v2364_v47 = vld [vmem:[%s9736_s20 + $0x7d8] sm:$0xff]  ;;  %v8818_v41 = vpack.c.bf16 %v2314_v15, %v2313_v23 }
 0xe03   :  { %v2316_v2 = vld [vmem:[%s9736_s20 + $0x658] sm:$0xff] }
 0xe04   :  { %8767 = vmatpush3.bf16.msra.mxu0 %v8766_v53  ;;  %8799 = vmatpush3.bf16.msra.mxu1 %v8798_v56  ;;  %v2341_v53 = vld [vmem:[%s9736_s20 + $0x720] sm:$0xff]  ;;  %v2342_v56 = vld [vmem:[%s9736_s20 + $0x728] sm:$0xff] }
 0xe05   :  { %8801 = vmatprep.subr.bf16.mxu0 %v8800_v57  ;;  %8833 = vmatprep.subr.bf16.mxu1 %v8832_v24  ;;  %v2327_v57 = vld [vmem:[%s9736_s20 + $0x6b0] sm:$0xff]  ;;  %v8842_v4 = vpack.c.bf16 %v2342_v56, %v2341_v53  ;;  %v2317_v53 = vld [vmem:[%s9736_s20 + $0x660] sm:$0xff]  ;;  %v2318_v56 = vld [vmem:[%s9736_s20 + $0x668] sm:$0xff] }
 0xe06   :  { %v2311_v24 = vld [vmem:[%s9736_s20 + $0x630] sm:$0xff]  ;;  %v8812_v62 = vpack.c.bf16 %v2328_v61, %v2327_v57  ;;  %v8824_v57 = vpack.c.bf16 %v2334_v42, %v2333_v13 }
 0xe07   :  { %3479 = vmatmul.mubr.f32.vlgmr.msra.gmra.mrb[46].mxu0 %v3083_v14  ;;  %3554 = vmatmul.mubr.f32.vlgmr.msra.gmra.mrb[44].mxu1 %v3085_v37  ;;  %v8814_v14 = vpack.c.bf16 %v2312_v7, %v2311_v24  ;;  %v8846_v37 = vpack.c.bf16 %v2344_v5, %v2343_v10  ;;  %v2367_v24 = vld [vmem:[%s9736_s20 + $0x7f0] sm:$0xff]  ;;  %v2368_v7 = vld [vmem:[%s9736_s20 + $0x7f8] sm:$0xff]  ;;  %v8858_v10 = vpack.c.bf16 %v2350_v0, %v2349_v63 }
 0xe08   :  { %3483 = vmatprep.mubr.f32.mxu0 %v3100_v28  ;;  %3558 = vmatprep.mubr.f32.mxu1 %v3102_v30  ;;  %v2345_v28 = vld [vmem:[%s9736_s20 + $0x740] sm:$0xff]  ;;  %v2346_v30 = vld [vmem:[%s9736_s20 + $0x748] sm:$0xff]  ;;  %v2319_v5 = vld [vmem:[%s9736_s20 + $0x670] sm:$0xff] }
 0xe09   :  { %8803 = vmatpush3.bf16.msra.mxu0 %v8802_v9  ;;  %8835 = vmatpush3.bf16.msra.mxu1 %v8834_v11  ;;  %v2329_v9 = vld [vmem:[%s9736_s20 + $0x6c0] sm:$0xff]  ;;  %v2330_v11 = vld [vmem:[%s9736_s20 + $0x6c8] sm:$0xff]  ;;  %v8850_v33 = vpack.c.bf16 %v2346_v30, %v2345_v28  ;;  %v3073_v28 = vadd.f32 %v10021_v29, %v10131_v8 }
 0xe0a   :  { %8805 = vmatprep.subr.bf16.mxu0 %v8804_v34  ;;  %8837 = vmatprep.subr.bf16.mxu1 %v8836_v6  ;;  %v2361_v34 = vld [vmem:[%s9736_s20 + $0x7c0] sm:$0xff]  ;;  %v2362_v6 = vld [vmem:[%s9736_s20 + $0x7c8] sm:$0xff]  ;;  %v8816_v40 = vpack.c.bf16 %v2330_v11, %v2329_v9  ;;  %v2432_v9 = vrot.slane %v10017_v31, %v9984_v51 }
 0xe0b   :  { %3484 = vmatmul.mubr.f32.gmra.mrb[48].mxu0 %v3099_v39  ;;  %3559 = vmatmul.mubr.f32.gmra.mrb[46].mxu1 %v3101_v16  ;;  %v8848_v25 = vpack.c.bf16 %v2362_v6, %v2361_v34  ;;  %v8820_v39 = vpack.c.bf16 %v2332_v55, %v2331_v26  ;;  %v8852_v16 = vpack.c.bf16 %v2364_v47, %v2363_v49  ;;  %v2320_v6 = vld [vmem:[%s9736_s20 + $0x678] sm:$0xff] }
 0xe0c   :  { %3628 = vmatprep.mubr.f32.mxu0 %v3088_v43  ;;  %3703 = vmatprep.mubr.f32.mxu1 %v3090_v50  ;;  %v2365_v43 = vld [vmem:[%s9736_s20 + $0x7e0] sm:$0xff]  ;;  %v2366_v50 = vld [vmem:[%s9736_s20 + $0x7e8] sm:$0xff]  ;;  %v8860_v34 = vpack.c.bf16 %v2368_v7, %v2367_v24  ;;  %v8830_v23 = vpack.c.bf16 %v2320_v6, %v2319_v5  ;;  %v3071_v49 = vadd.f32 %v10012_v21, %v2432_v9 }
 0xe0d   :  { %8807 = vmatpush3.bf16.msra.mxu0 %v8806_v1  ;;  %8839 = vmatpush3.bf16.msra.mxu1 %v8838_v12  ;;  %v2347_v1 = vld [vmem:[%s9736_s20 + $0x750] sm:$0xff]  ;;  %v2348_v12 = vld [vmem:[%s9736_s20 + $0x758] sm:$0xff]  ;;  %v8856_v61 = vpack.c.bf16 %v2366_v50, %v2365_v43 }
 0xe0e   :  { %8809 = vmatprep.subr.bf16.mxu0 %v8808_v27  ;;  %8841 = vmatprep.subr.bf16.mxu1 %v8840_v52  ;;  %v8822_v27 = vpack.c.bf16 %v2316_v2, %v2315_v22  ;;  %v8854_v52 = vpack.c.bf16 %v2348_v12, %v2347_v1 }
 0xe11   :  { %8811 = vmatpush3.bf16.msra.mxu0 %v8810_v3  ;;  %8843 = vmatpush3.bf16.msra.mxu1 %v8842_v4  ;;  %v2335_v3 = vld [vmem:[%s9736_s20 + $0x6f0] sm:$0xff]  ;;  %v2336_v4 = vld [vmem:[%s9736_s20 + $0x6f8] sm:$0xff] }
 0xe12   :  { %8813 = vmatprep.subr.bf16.mxu0 %v8812_v62  ;;  %8845 = vmatprep.subr.bf16.mxu1 %v8844_v60  ;;  %v2424_v62 = vrot.slane %v10017_v31, %v9979_v38  ;;  %v8826_v60 = vpack.c.bf16 %v2318_v56, %v2317_v53  ;;  %v8828_v11 = vpack.c.bf16 %v2336_v4, %v2335_v3 }
 0xe13   :  { %v2996_v31 = vadd.f32 %v10019_v19, %v10127_v46 }
 0xe14   :  { %v2994_v55 = vadd.f32 %v10010_v44, %v2424_v62  ;;  %v7449_v44 = vld [vmem:[%s7368_s28] ss:$0 sm:$0xff]  ;;  %s7374_s28 = sld [smem:[%s11020_s0 + %s9367_s24]]  }
 0xe15   :  { %8815 = vmatpush3.bf16.msra.mxu0 %v8814_v14  ;;  %8847 = vmatpush3.bf16.msra.mxu1 %v8846_v37  ;;  %v2351_v14 = vld [vmem:[%s9736_s20 + $0x770] sm:$0xff]  ;;  %v2352_v37 = vld [vmem:[%s9736_s20 + $0x778] sm:$0xff]  ;;  %v3104_v47 = vmax.f32 %v2996_v31, 0.0  ;;  %s7369_s20 = sld [smem:[%s11020_s0 + %s9377_s13]]  }
 0xe16   :  { %8817 = vmatprep.subr.bf16.mxu0 %v8816_v40  ;;  %8849 = vmatprep.subr.bf16.mxu1 %v8848_v25  ;;  %v8862_v15 = vpack.c.bf16 %v2352_v37, %v2351_v14  ;;  %v2988_v40 = vadd.f32 %v9989_v54, %v2424_v62  ;;  %v3065_v25 = vadd.f32 %v9991_v59, %v2432_v9  ;;  %v3106_v54 = vmax.f32 %v3073_v28, 0.0  ;;  %s10476_s13 = sld [smem:[%s11020_s0 + %s9383_s9]]  }
 0xe17   :  { %v3103_v59 = vmax.f32 %v2994_v55, 0.0 }
 0xe18   :  { %v3087_v30 = vmax.f32 %v2988_v40, 0.0  ;;  %v3089_v26 = vmax.f32 %v3065_v25, 0.0 }
 0xe19   :  { %8819 = vmatpush3.bf16.msra.mxu0 %v8818_v41  ;;  %8851 = vmatpush3.bf16.msra.mxu1 %v8850_v33  ;;  %v3105_v41 = vmax.f32 %v3071_v49, 0.0 }
 0xe1a   :  { %8821 = vmatprep.subr.bf16.mxu0 %v8820_v39  ;;  %8853 = vmatprep.subr.bf16.mxu1 %v8852_v16 }
 0xe1d   :  { %8823 = vmatpush3.bf16.msra.mxu0 %v8822_v27  ;;  %8855 = vmatpush3.bf16.msra.mxu1 %v8854_v52 }
 0xe1e   :  { %8825 = vmatprep.subr.bf16.mxu0 %v8824_v57  ;;  %8857 = vmatprep.subr.bf16.mxu1 %v8856_v61 }
 0xe21   :  { %8827 = vmatpush3.bf16.msra.mxu0 %v8826_v60  ;;  %8859 = vmatpush3.bf16.msra.mxu1 %v8858_v10 }
 0xe22   :  { %8829 = vmatprep.subr.bf16.mxu0 %v8828_v11  ;;  %8861 = vmatprep.subr.bf16.mxu1 %v8860_v34 }
 0xe25   :  { %8831 = vmatpush3.bf16.msra.mxu0 %v8830_v23  ;;  %8863 = vmatpush3.bf16.msra.mxu1 %v8862_v15 }
 0xe28   :  { %3629 = vmatmul.mubr.f32.vlgmr.msra.gmra.mrb[50].mxu0 %v3087_v30  ;;  %3704 = vmatmul.mubr.f32.vlgmr.msra.gmra.mrb[48].mxu1 %v3089_v26 }
 0xe29   :  { %3633 = vmatprep.mubr.f32.mxu0 %v3104_v47  ;;  %3708 = vmatprep.mubr.f32.mxu1 %v3106_v54 }
 0xe2c   :  { %3634 = vmatmul.mubr.f32.gmra.mrb[52].mxu0 %v3103_v59  ;;  %3709 = vmatmul.mubr.f32.gmra.mrb[50].mxu1 %v3105_v41 }
 0xe99   :  { %v7604_v19 = vpop.f32.mrb[38].mxu0  ;;  %v7642_v29 = vpop.f32.mrb[36].mxu1 }
 0xe9a   :  { %v7605_v46 = vpop.f32.mrb[39].mxu0  ;;  %v7643_v21 = vpop.f32.mrb[37].mxu1 }
 0xe9b   :  { %v7606_v8 = vadd.f32 %v7605_v46, %v7604_v19  ;;  %v7644_v33 = vadd.f32 %v7643_v21, %v7642_v29 }
 0xe9d   :  { %v3181_v22 = vadd.f32 %v7606_v8, %v7449_v44 }
 0xe9f   :  { %v3256_v2 = vadd.f32 %v7644_v33, %v3181_v22 }
 0xea0   :  { %v7607_v39 = vpop.f32.mrb[40].mxu0  ;;  %v7645_v16 = vpop.f32.mrb[38].mxu1 }
 0xea1   :  { %v7608_v1 = vpop.f32.mrb[41].mxu0  ;;  %v7646_v12 = vpop.f32.mrb[39].mxu1 }
 0xea2   :  { %v7609_v13 = vadd.f32 %v7608_v1, %v7607_v39  ;;  %v7647_v42 = vadd.f32 %v7646_v12, %v7645_v16 }
 0xea4   :  { %v3186_v43 = vadd.f32 %v7609_v13, %v7449_v44 }
 0xea6   :  { %v3261_v50 = vadd.f32 %v7647_v42, %v3186_v43 }
 0xeb9   :  { %v7680_v27 = vpop.f32.mrb[42].mxu0  ;;  %v7718_v52 = vpop.f32.mrb[40].mxu1 }
 0xeba   :  { %v7681_v53 = vpop.f32.mrb[43].mxu0  ;;  %v7719_v56 = vpop.f32.mrb[41].mxu1 }
 0xebb   :  { %v7682_v57 = vadd.f32 %v7681_v53, %v7680_v27  ;;  %v7720_v61 = vadd.f32 %v7719_v56, %v7718_v52  ;;  %v3767_v53 = vld [vmem:[%s7371_s3 + $0x8] sm:$0xff]  ;;  %v3768_v56 = vld [vmem:[%s7371_s3 + $0x10] sm:$0xff] }
 0xebd   :  { %v3331_v63 = vadd.f32 %v7682_v57, %v3256_v2  ;;  %v7683_v0 = vpop.f32.mrb[44].mxu0  ;;  %v7721_v3 = vpop.f32.mrb[42].mxu1 }
 0xebe   :  { %v7684_v4 = vpop.f32.mrb[45].mxu0  ;;  %v7722_v24 = vpop.f32.mrb[43].mxu1 }
 0xebf   :  { %v3406_v7 = vadd.f32 %v7720_v61, %v3331_v63  ;;  %v7685_v62 = vadd.f32 %v7684_v4, %v7683_v0  ;;  %v7723_v60 = vadd.f32 %v7722_v24, %v7721_v3  ;;  %v3858_v61 = vld [vmem:[%s7373_s7] sm:$0xff]  ;;  %v3859_v63 = vld [vmem:[%s7373_s7 + $0x8] sm:$0xff]  ;;  %v3769_v0 = vld [vmem:[%s7371_s3 + $0x18] sm:$0xff] }
 0xec0   :  { %v8872_v3 = vpack.c.bf16 %v3859_v63, %v3858_v61  ;;  %v8868_v4 = vpack.c.bf16 %v3769_v0, %v3768_v56  ;;  %v3860_v24 = vld [vmem:[%s7373_s7 + $0x10] sm:$0xff] }
 0xec1   :  { %v3336_v10 = vadd.f32 %v7685_v62, %v3261_v50 }
 0xec2   :  { %8873 = vmatprep.subr.bf16.mxu1 %v8872_v3 }
 0xec3   :  { %v3411_v5 = vadd.f32 %v7723_v60, %v3336_v10  ;;  %8875 = vmatpush3.bf16.msra.mxu1 %v8872_v3  ;;  %v3944_v60 = vld [vmem:[%s10231_s11] sm:$0xff]  ;;  %v3945_v10 = vld [vmem:[%s10231_s11 + $0x8] sm:$0xff] }
 0xeda   :  { %v7756_v9 = vpop.f32.mrb[46].mxu0  ;;  %v7794_v11 = vpop.f32.mrb[44].mxu1 }
 0xedb   :  { %v7757_v34 = vpop.f32.mrb[47].mxu0  ;;  %v7795_v6 = vpop.f32.mrb[45].mxu1 }
 0xedc   :  { %v7758_v14 = vadd.f32 %v7757_v34, %v7756_v9  ;;  %v7796_v37 = vadd.f32 %v7795_v6, %v7794_v11 }
 0xede   :  { %v3481_v23 = vadd.f32 %v7758_v14, %v3406_v7  ;;  %v7759_v15 = vpop.f32.mrb[48].mxu0  ;;  %v7797_v40 = vpop.f32.mrb[46].mxu1  ;;  %v3861_v7 = vld [vmem:[%s7373_s7 + $0x18] sm:$0xff]  ;;  %s7376_s7 = sld [smem:[%s11020_s0 + %s9380_s4]]  }
 0xedf   :  { %v7760_v25 = vpop.f32.mrb[49].mxu0  ;;  %v7798_v31 = vpop.f32.mrb[47].mxu1  ;;  %v8876_v62 = vpack.c.bf16 %v3861_v7, %v3860_v24 }
 0xee0   :  { %v3556_v28 = vadd.f32 %v7796_v37, %v3481_v23  ;;  %v7761_v30 = vadd.f32 %v7760_v25, %v7759_v15  ;;  %v7799_v26 = vadd.f32 %v7798_v31, %v7797_v40 }
 0xee1   :  { %8877 = vmatprep.subr.bf16.mxu1 %v8876_v62 }
 0xee2   :  { %v3486_v55 = vadd.f32 %v7761_v30, %v3411_v5  ;;  %8879 = vmatpush3.bf16.msra.mxu1 %v8876_v62  ;;  %v8880_v5 = vpack.c.bf16 %v3945_v10, %v3944_v60  ;;  %v10308_v60 = vld [vmem:[%s9491_s16 + $0x1] ss:$0 sm:$0xff] }
 0xee3   :  { %8406 = vmatprep.subr.mxu1 %v9356_v32 }
 0xee4   :  { %v3561_v49 = vadd.f32 %v7799_v26, %v3486_v55 }
 0xefb   :  { %v7832_v47 = vpop.f32.mrb[50].mxu0  ;;  %v7870_v54 = vpop.f32.mrb[48].mxu1 }
 0xefc   :  { %v7833_v59 = vpop.f32.mrb[51].mxu0  ;;  %v7871_v41 = vpop.f32.mrb[49].mxu1 }
 0xefd   :  { %v7834_v19 = vadd.f32 %v7833_v59, %v7832_v47  ;;  %v7872_v29 = vadd.f32 %v7871_v41, %v7870_v54  ;;  %v7450_v59 = vld [vmem:[%s7369_s20] ss:$0 sm:$0xff]  ;;  %s9392_s20 = smov 38  }
 0xefe   :  { %s7388_s23 = sld [smem:[%s11020_s0 + %s9392_s20]]  }
 0xeff   :  { %v3631_v44 = vadd.f32 %v7834_v19, %v3556_v28  ;;  %v7835_v46 = vpop.f32.mrb[52].mxu0  ;;  %v7873_v21 = vpop.f32.mrb[50].mxu1  ;;  %v7451_v19 = vld [vmem:[%s7370_s25] ss:$0 sm:$0xff]  ;;  %s9393_s25 = smov 39  }
 0xf00   :  { %v7836_v8 = vpop.f32.mrb[53].mxu0  ;;  %v7874_v33 = vpop.f32.mrb[51].mxu1 }
 0xf01   :  { %v3706_v22 = vadd.f32 %v7872_v29, %v3631_v44  ;;  %v7837_v2 = vadd.f32 %v7836_v8, %v7835_v46  ;;  %v7875_v39 = vadd.f32 %v7874_v33, %v7873_v21  ;;  %v3946_v33 = vld [vmem:[%s10231_s11 + $0x10] sm:$0xff] }
 0xf03   :  { %v10207_v16 = vadd.f32 %v3706_v22, %v9696_v35  ;;  %v3636_v1 = vadd.f32 %v7837_v2, %v3561_v49  ;;  %v3947_v22 = vld [vmem:[%s10231_s11 + $0x18] sm:$0xff]  ;;  %s9391_s11 = smov 36  }
 0xf04   :  { %s7386_s15 = sld [smem:[%s11020_s0 + %s9391_s11]]  }
 0xf05   :  { %v3711_v12 = vadd.f32 %v7875_v39, %v3636_v1  ;;  %v3716_v13 = vsel %vm272_vm1, %v10207_v16, 0.0  ;;  %v3724_v42 = vmul.f32 %v10207_v16, %v10207_v16  ;;  %v7455_v1 = vld [vmem:[%s7374_s28] ss:$0 sm:$0xff]  ;;  %s7389_s28 = sld [smem:[%s11020_s0 + %s9393_s25]]  }
 0xf06   :  { %3717 = vadd.xlane.f32.xlu0 %v3716_v13 }
 0xf07   :  { %v10214_v43 = vadd.f32 %v3711_v12, %v9713_v58  ;;  %v3726_v27 = vsel %vm272_vm1, %v3724_v42, 0.0  ;;  %v3766_v58 = vld [vmem:[%s7371_s3] sm:$0xff]  ;;  %s7372_s3 = sld [smem:[%s11020_s0 + %s9379_s29]]  }
 0xf08   :  { %v8864_v57 = vpack.c.bf16 %v3767_v53, %v3766_v58  ;;  %v7458_v53 = vld [vmem:[%s7376_s7] ss:$0 sm:$0xff] }
 0xf09   :  { %v3719_v50 = vsel %vm272_vm1, %v10214_v43, 0.0  ;;  %v3725_v35 = vmul.f32 %v10214_v43, %v10214_v43 }
 0xf0a   :  { %3720 = vadd.xlane.f32.xlu1 %v3719_v50  ;;  %3727 = vadd.xlane.f32.xlu0 %v3726_v27 }
 0xf0b   :  { %v3729_v52 = vsel %vm272_vm1, %v3725_v35, 0.0  ;;  %8865 = vmatprep.subr.bf16.mxu0 %v8864_v57 }
 0xf0c   :  { %8867 = vmatpush3.bf16.msra.mxu0 %v8864_v57 }
 0xf0d   :  { %8869 = vmatprep.subr.bf16.mxu0 %v8868_v4  ;;  %v7452_v42 = vld [vmem:[%s7372_s3] ss:$0 sm:$0xff] }
 0xf0e   :  { %3730 = vadd.xlane.f32.xlu1 %v3729_v52 }
 0xf10   :  { %8871 = vmatpush3.bf16.msra.mxu0 %v8868_v4 }
 0xf11   :  { %8881 = vmatprep.subr.bf16.mxu0 %v8880_v5 }
 0xf93   :  { %v3718_v9 = vpop.xlane.xlu0 %3717 }
 0xf94   :  { %v3722_v11 = vmul.f32 0.03125, %v3718_v9 }
 0xf96   :  { %v3734_v14 = vmul.f32 %v3722_v11, %v3722_v11  ;;  %v3740_v47 = vsub.f32 %v10207_v16, %v3722_v11  ;;  %v8884_v16 = vpack.c.bf16 %v3947_v22, %v3946_v33 }
 0xf97   :  { %v3721_v34 = vpop.xlane.xlu1 %3720  ;;  %v3728_v6 = vpop.xlane.xlu0 %3727 }
 0xf98   :  { %v3723_v37 = vmul.f32 0.03125, %v3721_v34  ;;  %v3732_v23 = vmul.f32 0.03125, %v3728_v6 }
 0xf9a   :  { %v3736_v15 = vsub.f32 %v3732_v23, %v3734_v14  ;;  %v3735_v25 = vmul.f32 %v3723_v37, %v3723_v37  ;;  %v3741_v29 = vsub.f32 %v10214_v43, %v3723_v37 }
 0xf9b   :  { %v3731_v40 = vpop.xlane.xlu1 %3730 }
 0xf9c   :  { %v3738_v31 = vmax.f32 %v3736_v15, 0.0  ;;  %v3733_v28 = vmul.f32 0.03125, %v3731_v40 }
 0xf9e   :  { %v3742_v30 = vadd.f32 1e-05, %v3738_v31  ;;  %v3737_v26 = vsub.f32 %v3733_v28, %v3735_v25 }
 0xfa0   :  { %9304 = vrsqrt.f32 %v3742_v30  ;;  %v3739_v55 = vmax.f32 %v3737_v26, 0.0 }
 0xfa2   :  { %v3743_v49 = vadd.f32 1e-05, %v3739_v55 }
 0xfa4   :  { %9306 = vrsqrt.f32 %v3743_v49 }
 0xfaa   :  { %v9305_v54 = vpop.eup %9304 }
 0xfab   :  { %v3746_v41 = vmul.f32 %v9305_v54, %v3740_v47 }
 0xfad   :  { %v3755_v44 = vmul.f32 %v7450_v59, %v3746_v41 }
 0xfae   :  { %v9307_v46 = vpop.eup %9306 }
 0xfaf   :  { %v3747_v21 = vmul.f32 %v9307_v46, %v3741_v29  ;;  %v10244_v8 = vadd.f32 %v7451_v19, %v3755_v44 }
 0xfb1   :  { %v3756_v2 = vmul.f32 %v7450_v59, %v3747_v21  ;;  %8381 = vmatprep.mubr.msk.f32.mxu0 %vm272_vm1, %v10244_v8  ;;  %8392 = vmatprep.mubr.msk.f32.mxu1 %vm272_vm1, %v10244_v8 }
 0xfb3   :  { %v10252_v39 = vadd.f32 %v7451_v19, %v3756_v2 }
 0xfb5   :  { %8382 = vmatmul.mubr.msk.f32.vlgmr.msra.gmra.mrb[54].mxu0 %vm272_vm1, %v10252_v39  ;;  %8393 = vmatmul.mubr.msk.f32.vlgmr.msra.gmra.mrb[52].mxu1 %vm272_vm1, %v10252_v39 }
 0xfb6   :  { %8883 = vmatpush3.bf16.msra.mxu0 %v8880_v5  ;;  %8403 = vmatprep.mubr.msk.f32.mxu0 %vm272_vm1, %v10244_v8  ;;  %v10312_v5 = vld [vmem:[%s9491_s16] ss:$0 sm:$0xff]  ;;  %s9389_s16 = smov 37  }
 0xfb7   :  { %8885 = vmatprep.subr.bf16.mxu0 %v8884_v16  ;;  %8408 = vmatprep.mubr.msk.f32.mxu1 %vm9357_vm2, %v9356_v32 }
 0xfba   :  { %8887 = vmatpush3.bf16.msra.mxu0 %v8884_v16 }
 0xfbb   :  { %8411 = vmatprep.subr.mxu0 %v9356_v32 }
 0xfbd   :  { %8404 = vmatmul.mubr.msk.f32.vlgmr.msra.gmra.mrb[56].mxu0 %vm272_vm1, %v10252_v39 }
 0xfbe   :  { %8413 = vmatprep.mubr.msk.f32.mxu0 %vm9357_vm2, %v9356_v32 }
0x1088   :  { %v8383_v12 = vpop.f32.mrb[54].mxu0  ;;  %v8394_v13 = vpop.f32.mrb[52].mxu1 }
0x1089   :  { %v10277_v43 = vadd.f32 %v8394_v13, %v7455_v1  ;;  %v3849_v50 = vpop.f32.mrb[55].mxu0  ;;  %v3935_v27 = vpop.f32.mrb[53].mxu1  ;;  %v10283_v52 = vadd.f32 %v8383_v12, %v7452_v42 }
0x108a   :  { %v10279_v35 = vadd.f32 %v7455_v1, %v3935_v27  ;;  %v10288_v58 = vadd.f32 %v7452_v42, %v3849_v50 }
0x108b   :  { %8412 = vmatpush3.xpose.msk.msra.mxu0 %vm526_vm3, %v10277_v43 }
0x108c   :  { %8407 = vmatpush3.xpose.msk.msra.mxu1 %vm526_vm3, %v10279_v35  ;;  %8421 = vmatprep.subr.mxu0 %v9356_v32 }
0x108d   :  { %8416 = vmatprep.subr.mxu1 %v9356_v32 }
0x108e   :  { %8414 = vmatmul.mubr.msk.f32.vlgmr.msra.gmra.mrb[58].mxu0 %vm526_vm3, %v10283_v52 }
0x108f   :  { %8409 = vmatmul.mubr.msk.f32.vlgmr.msra.gmra.mrb[54].mxu1 %vm526_vm3, %v10288_v58  ;;  %8423 = vmatprep.mubr.msk.f32.mxu0 %vm9357_vm2, %v9356_v32 }
0x1090   :  { %v8405_v56 = vpop.f32.mrb[56].mxu0  ;;  %8418 = vmatprep.mubr.msk.f32.mxu1 %vm9357_vm2, %v9356_v32 }
0x1091   :  { %v10299_v57 = vadd.f32 %v8405_v56, %v7458_v53  ;;  %v4021_v61 = vpop.f32.mrb[57].mxu0 }
0x1092   :  { %v10301_v63 = vadd.f32 %v7458_v53, %v4021_v61 }
0x1093   :  { %8422 = vmatpush3.msra.mxu0 %v10299_v57 }
0x1094   :  { %8417 = vmatpush3.msra.mxu1 %v10301_v63  ;;  %8431 = vmatprep.subr.mxu0 %v9356_v32 }
0x1095   :  { %8426 = vmatprep.subr.mxu1 %v9356_v32 }
0x1161   :  { %v4178_v0 = vpop.f32.mrb[58].mxu0 }
0x1162   :  { %v4183_v3 = vmul.f32 0.35355338, %v4178_v0  ;;  %v4102_v4 = vpop.f32.mrb[54].mxu1  ;;  %v8415_v24 = vpop.f32.mrb[59].mxu0 }
0x1163   :  { %v4182_v7 = vmul.f32 0.35355338, %v4102_v4  ;;  %v8410_v62 = vpop.f32.mrb[55].mxu1 }
0x1164   :  { %v4185_v10 = vadd.f32 %v10308_v60, %v4183_v3 }
0x1165   :  { %v4184_v9 = vadd.f32 %v10312_v5, %v4182_v7 }
0x1166   :  { %v4189_v11 = vsel %vm526_vm3, %v4185_v10, -inf }
0x1167   :  { %4190 = vmax.xlane.f32.xlu1 %v4189_v11  ;;  %v4186_v34 = vsel %vm526_vm3, %v4184_v9, -inf }
0x1168   :  { %4187 = vmax.xlane.f32.xlu0 %v4186_v34 }
0x11f4   :  { %v4191_v6 = vpop.xlane.xlu1 %4190 }
0x11f5   :  { %v4193_v14 = vsub.f32 %v4185_v10, %v4191_v6  ;;  %v4188_v37 = vpop.xlane.xlu0 %4187 }
0x11f6   :  { %v4192_v23 = vsub.f32 %v4184_v9, %v4188_v37 }
0x11f7   :  { %v4196_v15 = vmul.f32 1.442695, %v4193_v14 }
0x11f8   :  { %v4194_v40 = vmul.f32 1.442695, %v4192_v23 }
0x11f9   :  { %9308 = vpow2.f32 %v4196_v15 }
0x11fa   :  { %9310 = vpow2.f32 %v4194_v40 }
0x1203   :  { %v9309_v25 = vpop.eup %9308 }
0x1204   :  { %v9311_v31 = vpop.eup %9310  ;;  %v4201_v28 = vsel %vm526_vm3, %v9309_v25, 0.0 }
0x1205   :  { %4202 = vadd.xlane.f32.xlu1 %v4201_v28  ;;  %v4198_v30 = vsel %vm526_vm3, %v9311_v31, 0.0 }
0x1206   :  { %4199 = vadd.xlane.f32.xlu0 %v4198_v30 }
0x1216   :  { %4436 = vrot.lane.b32.xlu1 %v10277_v43, %s9361_s12 }
0x121a   :  { %4356 = vrot.lane.b32.xlu1 %v10288_v58, %s9361_s12 }
0x121c   :  { %4358 = vrot.lane.b32.xlu0 %v10279_v35, %s9361_s12 }
0x121e   :  { %4434 = vrot.lane.b32.xlu1 %v10283_v52, %s9361_s12 }
0x1292   :  { %v4203_v26 = vpop.xlane.xlu1 %4202 }
0x1293   :  { %9312 = vrcp.f32 %v4203_v26  ;;  %v4200_v55 = vpop.xlane.xlu0 %4199 }
0x1294   :  { %9314 = vrcp.f32 %v4200_v55 }
0x1296   :  { %v4437_v49 = vpop.permute.xlu1 %4436 }
0x1297   :  { %v4359_v29 = vpop.permute.xlu0 %4358 }
0x129a   :  { %v4357_v54 = vpop.permute.xlu1 %4356 }
0x129d   :  { %v9313_v47 = vpop.eup %9312 }
0x129e   :  { %v9315_v59 = vpop.eup %9314  ;;  %v4207_v41 = vmul.f32 %v9313_v47, %v9309_v25  ;;  %v4435_v44 = vpop.permute.xlu1 %4434 }
0x129f   :  { %v4206_v19 = vmul.f32 %v9315_v59, %v9311_v31 }
0x12a0   :  { %8424 = vmatmul.mubr.msk.f32.vlgmr.msra.gmra.mrb[60].mxu0 %vm526_vm3, %v4207_v41 }
0x12a1   :  { %8432 = vmatpush3.xpose.msk.msra.mxu0 %vm526_vm3, %v4437_v49  ;;  %8419 = vmatmul.mubr.msk.f32.vlgmr.msra.gmra.mrb[56].mxu1 %vm526_vm3, %v4206_v19 }
0x12a2   :  { %8427 = vmatpush3.xpose.msk.msra.mxu1 %vm526_vm3, %v4359_v29  ;;  %8433 = vmatprep.mubr.msk.f32.mxu0 %vm9357_vm2, %v9356_v32 }
0x12a3   :  { %8428 = vmatprep.mubr.msk.f32.mxu1 %vm9357_vm2, %v9356_v32  ;;  %8441 = vmatprep.subr.mxu0 %v9356_v32 }
0x12a4   :  { %8434 = vmatmul.mubr.msk.f32.vlgmr.msra.gmra.mrb[62].mxu0 %vm526_vm3, %v4435_v44  ;;  %8436 = vmatprep.subr.mxu1 %v9356_v32 }
0x12a5   :  { %8429 = vmatmul.mubr.msk.f32.vlgmr.msra.gmra.mrb[58].mxu1 %vm526_vm3, %v4357_v54  ;;  %8443 = vmatprep.mubr.msk.f32.mxu0 %vm9357_vm2, %v9356_v32 }
0x12a6   :  { %8438 = vmatprep.mubr.msk.f32.mxu1 %vm9357_vm2, %v9356_v32 }
0x1373   :  { %v4350_v46 = vpop.f32.mrb[60].mxu0 }
0x1374   :  { %4355 = vst.msk [vmem:[#allocation2 + $0x8] sm:$0xff] %vm526_vm3, %v4350_v46  ;;  %v4277_v21 = vpop.f32.mrb[56].mxu1  ;;  %v8425_v33 = vpop.f32.mrb[61].mxu0 }
0x1375   :  { %4354 = vst.msk [vmem:[#allocation2] sm:$0xff] %vm526_vm3, %v4277_v21  ;;  %v8420_v22 = vpop.f32.mrb[57].mxu1 }
0x1377   :  { %v4508_v2 = vpop.f32.mrb[62].mxu0 }
0x1378   :  { %v4513_v16 = vmul.f32 0.35355338, %v4508_v2  ;;  %v4430_v1 = vpop.f32.mrb[58].mxu1  ;;  %v8435_v12 = vpop.f32.mrb[63].mxu0 }
0x1379   :  { %v4512_v13 = vmul.f32 0.35355338, %v4430_v1  ;;  %v8430_v42 = vpop.f32.mrb[59].mxu1 }
0x137a   :  { %v4515_v50 = vadd.f32 %v10308_v60, %v4513_v16 }
0x137b   :  { %v4514_v27 = vadd.f32 %v10312_v5, %v4512_v13 }
0x137c   :  { %v4519_v53 = vsel %vm526_vm3, %v4515_v50, -inf }
0x137d   :  { %4520 = vmax.xlane.f32.xlu1 %v4519_v53  ;;  %v4516_v56 = vsel %vm526_vm3, %v4514_v27, -inf }
0x137e   :  { %4517 = vmax.xlane.f32.xlu0 %v4516_v56 }
0x138e   :  { %4616 = vrot.lane.b32.xlu1 %v10299_v57, %s9361_s12 }
0x1392   :  { %4704 = vrot.lane.b32.xlu1 %v10279_v35, %s9363_s17 }
0x1394   :  { %4539 = vrot.lane.b32.xlu0 %v10301_v63, %s9361_s12  ;;  %s7384_s12 = sld [smem:[%s11020_s0 + %s9388_s6]]  }
0x1396   :  { %4782 = vrot.lane.b32.xlu1 %v10277_v43, %s9363_s17 }
0x139a   :  { %4780 = vrot.lane.b32.xlu1 %v10283_v52, %s9363_s17 }
0x140a   :  { %v4521_v61 = vpop.xlane.xlu1 %4520 }
0x140b   :  { %v4523_v0 = vsub.f32 %v4515_v50, %v4521_v61  ;;  %v4518_v3 = vpop.xlane.xlu0 %4517 }
0x140c   :  { %v4522_v4 = vsub.f32 %v4514_v27, %v4518_v3 }
0x140d   :  { %v4526_v24 = vmul.f32 1.442695, %v4523_v0 }
0x140e   :  { %v4524_v7 = vmul.f32 1.442695, %v4522_v4  ;;  %v4617_v62 = vpop.permute.xlu1 %4616 }
0x140f   :  { %9316 = vpow2.f32 %v4526_v24  ;;  %8442 = vmatpush3.msra.mxu0 %v4617_v62  ;;  %v4540_v10 = vpop.permute.xlu0 %4539 }
0x1410   :  { %8437 = vmatpush3.msra.mxu1 %v4540_v10  ;;  %8451 = vmatprep.subr.mxu0 %v9356_v32  ;;  %9318 = vpow2.f32 %v4524_v7 }
0x1411   :  { %8446 = vmatprep.subr.mxu1 %v9356_v32 }
0x1412   :  { %v4705_v23 = vpop.permute.xlu1 %4704 }
0x1416   :  { %v4783_v40 = vpop.permute.xlu1 %4782 }
0x1419   :  { %v9317_v9 = vpop.eup %9316 }
0x141a   :  { %v4531_v11 = vsel %vm526_vm3, %v9317_v9, 0.0  ;;  %v9319_v34 = vpop.eup %9318  ;;  %v4781_v30 = vpop.permute.xlu1 %4780 }
0x141b   :  { %4532 = vadd.xlane.f32.xlu0 %v4531_v11  ;;  %v4528_v6 = vsel %vm526_vm3, %v9319_v34, 0.0 }
0x141f   :  { %4529 = vadd.xlane.f32.xlu0 %v4528_v6 }
0x1435   :  { %4702 = vrot.lane.b32.xlu0 %v10288_v58, %s9363_s17 }
0x14a8   :  { %v4533_v14 = vpop.xlane.xlu0 %4532 }
0x14a9   :  { %9320 = vrcp.f32 %v4533_v14 }
0x14ac   :  { %v4530_v37 = vpop.xlane.xlu0 %4529 }
0x14ad   :  { %9322 = vrcp.f32 %v4530_v37 }
0x14b0   :  { %v4703_v26 = vpop.permute.xlu0 %4702 }
0x14b3   :  { %v9321_v15 = vpop.eup %9320 }
0x14b4   :  { %v4537_v25 = vmul.f32 %v9321_v15, %v9317_v9 }
0x14b6   :  { %8444 = vmatmul.mubr.msk.f32.vlgmr.msra.gmra.mrb[64].mxu0 %vm526_vm3, %v4537_v25 }
0x14b7   :  { %v9323_v31 = vpop.eup %9322  ;;  %8452 = vmatpush3.xpose.msk.msra.mxu0 %vm526_vm3, %v4783_v40  ;;  %8453 = vmatprep.mubr.msk.f32.mxu0 %vm9357_vm2, %v9356_v32 }
0x14b8   :  { %v4536_v28 = vmul.f32 %v9323_v31, %v9319_v34  ;;  %8461 = vmatprep.subr.mxu0 %v9356_v32 }
0x14ba   :  { %8439 = vmatmul.mubr.msk.f32.vlgmr.msra.gmra.mrb[60].mxu1 %vm526_vm3, %v4536_v28  ;;  %8454 = vmatmul.mubr.msk.f32.vlgmr.msra.gmra.mrb[66].mxu0 %vm526_vm3, %v4781_v30 }
0x14bb   :  { %8447 = vmatpush3.xpose.msk.msra.mxu1 %vm526_vm3, %v4705_v23  ;;  %8448 = vmatprep.mubr.msk.f32.mxu1 %vm9357_vm2, %v9356_v32 }
0x14bc   :  { %8456 = vmatprep.subr.mxu1 %v9356_v32  ;;  %8463 = vmatprep.mubr.msk.f32.mxu0 %vm9357_vm2, %v9356_v32 }
0x14be   :  { %8449 = vmatmul.mubr.msk.f32.vlgmr.msra.gmra.mrb[62].mxu1 %vm526_vm3, %v4703_v26 }
0x14bf   :  { %8458 = vmatprep.mubr.msk.f32.mxu1 %vm9357_vm2, %v9356_v32 }
0x1589   :  { %v10381_v55 = vpop.f32.mrb[64].mxu0 }
0x158a   :  { %v8445_v49 = vpop.f32.mrb[65].mxu0 }
0x158d   :  { %v10383_v47 = vpop.f32.mrb[60].mxu1  ;;  %v4854_v54 = vpop.f32.mrb[66].mxu0 }
0x158e   :  { %v4859_v59 = vmul.f32 0.35355338, %v4854_v54  ;;  %v8440_v41 = vpop.f32.mrb[61].mxu1  ;;  %v8455_v19 = vpop.f32.mrb[67].mxu0 }
0x1590   :  { %v4861_v29 = vadd.f32 %v10308_v60, %v4859_v59 }
0x1591   :  { %v4776_v44 = vpop.f32.mrb[62].mxu1 }
0x1592   :  { %v4858_v46 = vmul.f32 0.35355338, %v4776_v44  ;;  %v8450_v21 = vpop.f32.mrb[63].mxu1  ;;  %v4865_v33 = vsel %vm526_vm3, %v4861_v29, -inf }
0x1593   :  { %4866 = vmax.xlane.f32.xlu1 %v4865_v33 }
0x1594   :  { %v4860_v22 = vadd.f32 %v10312_v5, %v4858_v46 }
0x1596   :  { %v4862_v2 = vsel %vm526_vm3, %v4860_v22, -inf }
0x1597   :  { %4863 = vmax.xlane.f32.xlu0 %v4862_v2 }
0x15a4   :  { %4960 = vrot.lane.b32.xlu1 %v10299_v57, %s9363_s17 }
0x15a8   :  { %5048 = vrot.lane.b32.xlu1 %v10279_v35, %s9364_s18 }
0x15ac   :  { %5126 = vrot.lane.b32.xlu1 %v10277_v43, %s9364_s18 }
0x15ad   :  { %4884 = vrot.lane.b32.xlu0 %v10301_v63, %s9363_s17 }
0x15b0   :  { %5124 = vrot.lane.b32.xlu1 %v10283_v52, %s9364_s18 }
0x1620   :  { %v4867_v16 = vpop.xlane.xlu1 %4866 }
0x1621   :  { %v4869_v1 = vsub.f32 %v4861_v29, %v4867_v16 }
0x1623   :  { %v4872_v12 = vmul.f32 1.442695, %v4869_v1 }
0x1624   :  { %v4961_v13 = vpop.permute.xlu1 %4960  ;;  %v4864_v42 = vpop.xlane.xlu0 %4863 }
0x1625   :  { %9324 = vpow2.f32 %v4872_v12  ;;  %v4868_v50 = vsub.f32 %v4860_v22, %v4864_v42  ;;  %8462 = vmatpush3.msra.mxu0 %v4961_v13 }
0x1626   :  { %8471 = vmatprep.subr.mxu0 %v9356_v32 }
0x1627   :  { %v4870_v35 = vmul.f32 1.442695, %v4868_v50 }
0x1628   :  { %v4885_v27 = vpop.permute.xlu0 %4884  ;;  %v5049_v3 = vpop.permute.xlu1 %5048 }
0x1629   :  { %9326 = vpow2.f32 %v4870_v35  ;;  %8457 = vmatpush3.msra.mxu1 %v4885_v27 }
0x162a   :  { %8466 = vmatprep.subr.mxu1 %v9356_v32 }
0x162c   :  { %v5127_v24 = vpop.permute.xlu1 %5126 }
0x162f   :  { %v9325_v43 = vpop.eup %9324 }
0x1630   :  { %v4877_v53 = vsel %vm526_vm3, %v9325_v43, 0.0 }
0x1631   :  { %4878 = vadd.xlane.f32.xlu0 %v4877_v53 }
0x1633   :  { %v9327_v52 = vpop.eup %9326 }
0x1634   :  { %v4874_v56 = vsel %vm526_vm3, %v9327_v52, 0.0 }
0x1635   :  { %4875 = vadd.xlane.f32.xlu0 %v4874_v56 }
0x164b   :  { %5046 = vrot.lane.b32.xlu0 %v10288_v58, %s9364_s18  ;;  %v5125_v58 = vpop.permute.xlu1 %5124 }
0x16be   :  { %v4879_v61 = vpop.xlane.xlu0 %4878 }
0x16bf   :  { %9328 = vrcp.f32 %v4879_v61 }
0x16c2   :  { %v4876_v0 = vpop.xlane.xlu0 %4875 }
0x16c3   :  { %9330 = vrcp.f32 %v4876_v0 }
0x16c6   :  { %v5047_v9 = vpop.permute.xlu0 %5046 }
0x16c9   :  { %v9329_v4 = vpop.eup %9328 }
0x16ca   :  { %v4883_v7 = vmul.f32 %v9329_v4, %v9325_v43 }
0x16cc   :  { %8464 = vmatmul.mubr.msk.f32.vlgmr.msra.gmra.mrb[68].mxu0 %vm526_vm3, %v4883_v7 }
0x16cd   :  { %v9331_v62 = vpop.eup %9330  ;;  %8472 = vmatpush3.xpose.msk.msra.mxu0 %vm526_vm3, %v5127_v24  ;;  %8473 = vmatprep.mubr.msk.f32.mxu0 %vm9357_vm2, %v9356_v32 }
0x16ce   :  { %v4882_v10 = vmul.f32 %v9331_v62, %v9327_v52  ;;  %8481 = vmatprep.subr.mxu0 %v9356_v32 }
0x16d0   :  { %8459 = vmatmul.mubr.msk.f32.vlgmr.msra.gmra.mrb[64].mxu1 %vm526_vm3, %v4882_v10  ;;  %8474 = vmatmul.mubr.msk.f32.vlgmr.msra.gmra.mrb[70].mxu0 %vm526_vm3, %v5125_v58 }
0x16d1   :  { %8467 = vmatpush3.xpose.msk.msra.mxu1 %vm526_vm3, %v5049_v3  ;;  %8468 = vmatprep.mubr.msk.f32.mxu1 %vm9357_vm2, %v9356_v32 }
0x16d2   :  { %8476 = vmatprep.subr.mxu1 %v9356_v32  ;;  %8483 = vmatprep.mubr.msk.f32.mxu0 %vm9357_vm2, %v9356_v32 }
0x16d4   :  { %8469 = vmatmul.mubr.msk.f32.vlgmr.msra.gmra.mrb[66].mxu1 %vm526_vm3, %v5047_v9 }
0x16d5   :  { %8478 = vmatprep.mubr.msk.f32.mxu1 %vm9357_vm2, %v9356_v32 }
0x179f   :  { %v5032_v11 = vpop.f32.mrb[68].mxu0 }
0x17a0   :  { %v8465_v34 = vpop.f32.mrb[69].mxu0 }
0x17a3   :  { %v4956_v6 = vpop.f32.mrb[64].mxu1  ;;  %v5198_v14 = vpop.f32.mrb[70].mxu0 }
0x17a4   :  { %v5203_v37 = vmul.f32 0.35355338, %v5198_v14  ;;  %v8460_v23 = vpop.f32.mrb[65].mxu1  ;;  %v8475_v15 = vpop.f32.mrb[71].mxu0 }
0x17a6   :  { %v5205_v40 = vadd.f32 %v10308_v60, %v5203_v37 }
0x17a7   :  { %v5120_v25 = vpop.f32.mrb[66].mxu1 }
0x17a8   :  { %v5202_v31 = vmul.f32 0.35355338, %v5120_v25  ;;  %v8470_v28 = vpop.f32.mrb[67].mxu1  ;;  %v5209_v30 = vsel %vm526_vm3, %v5205_v40, -inf  ;;  %v5537_v25 = vld [vmem:[%s10476_s13 + $0x8] sm:$0xff] }
0x17a9   :  { %5210 = vmax.xlane.f32.xlu1 %v5209_v30  ;;  %v5539_v28 = vld [vmem:[%s10476_s13 + $0x18] sm:$0xff] }
0x17aa   :  { %v5204_v26 = vadd.f32 %v10312_v5, %v5202_v31  ;;  %v5553_v31 = vld [vmem:[%s10476_s13 + $0x88] sm:$0xff] }
0x17ab   :  { %v8896_v30 = vpack.c.bf16 %v5553_v31, %v5537_v25  ;;  %v5558_v25 = vld [vmem:[%s10476_s13 + $0xb0] sm:$0xff]  ;;  %v7489_v31 = vld [vmem:[%s7380_s26] ss:$0 sm:$0xff] }
0x17ac   :  { %v5206_v49 = vsel %vm526_vm3, %v5204_v26, -inf }
0x17ad   :  { %5207 = vmax.xlane.f32.xlu0 %v5206_v49  ;;  %v5536_v49 = vld [vmem:[%s10476_s13] sm:$0xff] }
0x17ba   :  { %5304 = vrot.lane.b32.xlu1 %v10299_v57, %s9364_s18 }
0x17be   :  { %4694 = vrot.lane.b32.xlu1 %v10383_v47, %s9358_s30 }
0x17c2   :  { %4696 = vrot.lane.b32.xlu1 %v10381_v55, %s9358_s30  ;;  %s9381_s30 = smov 27  }
0x17c3   :  { %s7377_s17 = sld [smem:[%s11020_s0 + %s9381_s30]]  }
0x17c6   :  { %5040 = vrot.lane.b32.xlu1 %v5032_v11, %s9365_s19 }
0x17c9   :  { %v5393_v35 = vld [vmem:[%s7377_s17 + $0x8] sm:$0xff]  ;;  %v5394_v43 = vld [vmem:[%s7377_s17 + $0x10] sm:$0xff]  ;;  %v5395_v53 = vld [vmem:[%s7377_s17 + $0x18] sm:$0xff] }
0x17ca   :  { %v8892_v52 = vpack.c.bf16 %v5395_v53, %v5394_v43 }
0x1836   :  { %v5211_v60 = vpop.xlane.xlu1 %5210 }
0x1837   :  { %v5213_v54 = vsub.f32 %v5205_v40, %v5211_v60  ;;  %v5552_v60 = vld [vmem:[%s10476_s13 + $0x80] sm:$0xff] }
0x1839   :  { %v5216_v59 = vmul.f32 1.442695, %v5213_v54 }
0x183a   :  { %v5305_v41 = vpop.permute.xlu1 %5304  ;;  %v5208_v19 = vpop.xlane.xlu0 %5207 }
0x183b   :  { %9332 = vpow2.f32 %v5216_v59  ;;  %v5212_v5 = vsub.f32 %v5204_v26, %v5208_v19  ;;  %8482 = vmatpush3.msra.mxu0 %v5305_v41  ;;  %v5555_v26 = vld [vmem:[%s10476_s13 + $0x98] sm:$0xff]  ;;  %v8898_v59 = vpack.c.bf16 %v5552_v60, %v5536_v49  ;;  %v5538_v41 = vld [vmem:[%s10476_s13 + $0x10] sm:$0xff] }
0x183c   :  { %v8904_v54 = vpack.c.bf16 %v5555_v26, %v5539_v28  ;;  %v5554_v19 = vld [vmem:[%s10476_s13 + $0x90] sm:$0xff]  ;;  %8897 = vmatprep.subr.bf16.mxu0 %v8896_v30  ;;  %v5573_v28 = vld [vmem:[%s10476_s13 + $0x128] sm:$0xff]  ;;  %v5575_v49 = vld [vmem:[%s10476_s13 + $0x138] sm:$0xff] }
0x183d   :  { %v5214_v29 = vmul.f32 1.442695, %v5212_v5  ;;  %v8906_v5 = vpack.c.bf16 %v5554_v19, %v5538_v41  ;;  %v5589_v26 = vld [vmem:[%s10476_s13 + $0x1a8] sm:$0xff]  ;;  %v5591_v60 = vld [vmem:[%s10476_s13 + $0x1b8] sm:$0xff] }
0x183e   :  { %v4695_v44 = vpop.permute.xlu1 %4694 }
0x183f   :  { %9334 = vpow2.f32 %v5214_v29  ;;  %4700 = vst.msk [vmem:[#allocation2] sm:$0xff] %vm1209_vm4, %v4695_v44  ;;  %v5569_v29 = vld [vmem:[%s10476_s13 + $0x108] sm:$0xff] }
0x1840   :  { %v5585_v44 = vld [vmem:[%s10476_s13 + $0x188] sm:$0xff] }
0x1842   :  { %v4697_v57 = vpop.permute.xlu1 %4696 }
0x1843   :  { %4701 = vst.msk [vmem:[#allocation2 + $0x8] sm:$0xff] %vm1209_vm4, %v4697_v57  ;;  %v5571_v57 = vld [vmem:[%s10476_s13 + $0x118] sm:$0xff] }
0x1845   :  { %v9333_v47 = vpop.eup %9332 }
0x1846   :  { %v5041_v55 = vpop.permute.xlu1 %5040  ;;  %v5221_v46 = vsel %vm526_vm3, %v9333_v47, 0.0 }
0x1847   :  { %5045 = vst.msk [vmem:[#allocation2 + $0x8] sm:$0xff] %vm1554_vm5, %v5041_v55  ;;  %5222 = vadd.xlane.f32.xlu0 %v5221_v46  ;;  %v5587_v55 = vld [vmem:[%s10476_s13 + $0x198] sm:$0xff]  ;;  %v5568_v46 = vld [vmem:[%s10476_s13 + $0x100] sm:$0xff] }
0x1849   :  { %v9335_v21 = vpop.eup %9334 }
0x184a   :  { %v5218_v33 = vsel %vm526_vm3, %v9335_v21, 0.0 }
0x184b   :  { %5219 = vadd.xlane.f32.xlu0 %v5218_v33  ;;  %v8908_v33 = vpack.c.bf16 %v5587_v55, %v5571_v57  ;;  %v8924_v55 = vpack.c.bf16 %v5591_v60, %v5575_v49  ;;  %v5599_v49 = vld [vmem:[%s10476_s13 + $0x1f8] sm:$0xff] }
0x1861   :  { %5228 = vrot.lane.b32.xlu0 %v10301_v63, %s9364_s18  ;;  %v5392_v63 = vld [vmem:[%s7377_s17] sm:$0xff]  ;;  %s9382_s18 = smov 28  }
0x1862   :  { %v8888_v27 = vpack.c.bf16 %v5393_v35, %v5392_v63  ;;  %v5559_v63 = vld [vmem:[%s10476_s13 + $0xb8] sm:$0xff] }
0x1865   :  { %5038 = vrot.lane.b32.xlu0 %v4956_v6, %s9365_s19  ;;  %s7387_s19 = sld [smem:[%s11020_s0 + %s9389_s16]]  }
0x18d4   :  { %v5223_v22 = vpop.xlane.xlu0 %5222 }
0x18d5   :  { %9336 = vrcp.f32 %v5223_v22 }
0x18d8   :  { %v5220_v2 = vpop.xlane.xlu0 %5219 }
0x18d9   :  { %9338 = vrcp.f32 %v5220_v2  ;;  %v5570_v2 = vld [vmem:[%s10476_s13 + $0x110] sm:$0xff] }
0x18dc   :  { %v5229_v16 = vpop.permute.xlu0 %5228 }
0x18dd   :  { %8477 = vmatpush3.msra.mxu1 %v5229_v16  ;;  %v5586_v16 = vld [vmem:[%s10476_s13 + $0x190] sm:$0xff] }
0x18de   :  { %8889 = vmatprep.subr.bf16.mxu1 %v8888_v27 }
0x18df   :  { %v9337_v1 = vpop.eup %9336 }
0x18e0   :  { %v5227_v12 = vmul.f32 %v9337_v1, %v9333_v47  ;;  %v5039_v13 = vpop.permute.xlu0 %5038  ;;  %v8900_v47 = vpack.c.bf16 %v5585_v44, %v5569_v29  ;;  %v8910_v1 = vpack.c.bf16 %v5586_v16, %v5570_v2  ;;  %v5574_v29 = vld [vmem:[%s10476_s13 + $0x130] sm:$0xff]  ;;  %v5547_v2 = vld [vmem:[%s10476_s13 + $0x58] sm:$0xff] }
0x18e1   :  { %5044 = vst.msk [vmem:[#allocation2] sm:$0xff] %vm1554_vm5, %v5039_v13  ;;  %v5557_v13 = vld [vmem:[%s10476_s13 + $0xa8] sm:$0xff]  ;;  %v5590_v44 = vld [vmem:[%s10476_s13 + $0x1b0] sm:$0xff]  ;;  %v5563_v16 = vld [vmem:[%s10476_s13 + $0xd8] sm:$0xff] }
0x18e2   :  { %8484 = vmatmul.mubr.msk.f32.vlgmr.msra.gmra.mrb[72].mxu0 %vm526_vm3, %v5227_v12  ;;  %v5541_v12 = vld [vmem:[%s10476_s13 + $0x28] sm:$0xff] }
0x18e3   :  { %v9339_v42 = vpop.eup %9338  ;;  %6010 = vmatprep.mubr.f32.mxu0 %v9356_v32  ;;  %8899 = vmatpush1.bf16.msra.mxu0 %v8898_v59  ;;  %v5572_v59 = vld [vmem:[%s10476_s13 + $0x120] sm:$0xff] }
0x18e4   :  { %v5226_v50 = vmul.f32 %v9339_v42, %v9335_v21  ;;  %v5584_v21 = vld [vmem:[%s10476_s13 + $0x180] sm:$0xff]  ;;  %8901 = vmatprep.subr.bf16.mxu0 %v8900_v47  ;;  %v5543_v42 = vld [vmem:[%s10476_s13 + $0x38] sm:$0xff]  ;;  %v8916_v47 = vpack.c.bf16 %v5589_v26, %v5573_v28  ;;  %v5581_v28 = vld [vmem:[%s10476_s13 + $0x168] sm:$0xff] }
0x18e5   :  { %v8902_v22 = vpack.c.bf16 %v5584_v21, %v5568_v46  ;;  %v8920_v35 = vpack.c.bf16 %v5559_v63, %v5543_v42  ;;  %v5545_v21 = vld [vmem:[%s10476_s13 + $0x48] sm:$0xff]  ;;  %v5560_v63 = vld [vmem:[%s10476_s13 + $0xc0] sm:$0xff]  ;;  %v5583_v26 = vld [vmem:[%s10476_s13 + $0x178] sm:$0xff] }
0x18e6   :  { %8479 = vmatmul.mubr.msk.f32.vlgmr.msra.gmra.mrb[68].mxu1 %vm526_vm3, %v5226_v50  ;;  %v8912_v50 = vpack.c.bf16 %v5557_v13, %v5541_v12  ;;  %v5544_v12 = vld [vmem:[%s10476_s13 + $0x40] sm:$0xff] }
0x18e7   :  { %8891 = vmatpush3.bf16.msra.mxu1 %v8888_v27  ;;  %8903 = vmatpush1.bf16.msra.mxu0 %v8902_v22  ;;  %v5561_v22 = vld [vmem:[%s10476_s13 + $0xc8] sm:$0xff] }
0x18e8   :  { %8893 = vmatprep.subr.bf16.mxu1 %v8892_v52  ;;  %8913 = vmatprep.subr.bf16.mxu0 %v8912_v50  ;;  %v8928_v42 = vpack.c.bf16 %v5561_v22, %v5545_v21  ;;  %v8936_v50 = vpack.c.bf16 %v5563_v16, %v5547_v2  ;;  %v5601_v22 = vld [vmem:[%s10554_s1 + $0x8] sm:$0xff] }
0x18eb   :  { %8895 = vmatpush3.bf16.msra.mxu1 %v8892_v52 }
0x18ec   :  { %8905 = vmatprep.subr.bf16.mxu1 %v8904_v54 }
0x19b5   :  { %v5376_v56 = vpop.f32.mrb[72].mxu0 }
0x19b6   :  { %5384 = vrot.lane.b32.xlu1 %v5376_v56, %s9367_s24  ;;  %v8485_v61 = vpop.f32.mrb[73].mxu0 }
0x19b9   :  { %v5300_v0 = vpop.f32.mrb[68].mxu1 }
0x19ba   :  { %5382 = vrot.lane.b32.xlu0 %v5300_v0, %s9367_s24  ;;  %v8480_v3 = vpop.f32.mrb[69].mxu1  ;;  %s7378_s24 = sld [smem:[%s11020_s0 + %s9382_s18]]  }
0x19c0   :  { %v7485_v10 = vld [vmem:[%s7378_s24] ss:$0 sm:$0xff] }
0x1a28   :  { %v5385_v4 = vpop.permute.xlu1 %5384 }
0x1a29   :  { %5389 = vst.msk [vmem:[#allocation2 + $0x8] sm:$0xff] %vm1899_vm6, %v5385_v4 }
0x1a2c   :  { %v5383_v24 = vpop.permute.xlu0 %5382 }
0x1a2d   :  { %5388 = vst.msk [vmem:[#allocation2] sm:$0xff] %vm1899_vm6, %v5383_v24 }
0x1a30   :  { %v5391_v62 = vld [vmem:[#allocation2 + $0x8] sm:$0xff] }
0x1a34   :  { %v5390_v7 = vld [vmem:[#allocation2] sm:$0xff] }
0x1a35   :  { %8494 = vmatprep.mubr.msk.f32.mxu1 %vm272_vm1, %v5390_v7 }
0x1a36   :  { %8495 = vmatmul.mubr.msk.f32.vlgmr.msra.gmra.mrb[70].mxu1 %vm272_vm1, %v5391_v62 }
0x1a37   :  { %6087 = vmatprep.mubr.f32.mxu1 %v9356_v32  ;;  %8907 = vmatpush1.bf16.msra.mxu1 %v8906_v5  ;;  %v5588_v5 = vld [vmem:[%s10476_s13 + $0x1a0] sm:$0xff] }
0x1a38   :  { %8909 = vmatprep.subr.bf16.mxu1 %v8908_v33  ;;  %v8926_v33 = vpack.c.bf16 %v5590_v44, %v5574_v29  ;;  %v8956_v44 = vpack.c.bf16 %v5599_v49, %v5583_v26 }
0x1a3b   :  { %8911 = vmatpush1.bf16.msra.mxu1 %v8910_v1 }
0x1a3c   :  { %8921 = vmatprep.subr.bf16.mxu1 %v8920_v35  ;;  %v5546_v35 = vld [vmem:[%s10476_s13 + $0x50] sm:$0xff] }
0x1b09   :  { %v8496_v58 = vpop.f32.mrb[70].mxu1 }
0x1b0a   :  { %v5475_v9 = vpop.f32.mrb[71].mxu1  ;;  %v5481_v11 = vadd.f32 %v8496_v58, %v7485_v10 }
0x1b0b   :  { %v5476_v34 = vadd.f32 %v7485_v10, %v5475_v9 }
0x1b0c   :  { %v10461_v14 = vadd.f32 %v5481_v11, %v10252_v39 }
0x1b0d   :  { %v10458_v6 = vadd.f32 %v5476_v34, %v10244_v8 }
0x1b0e   :  { %v5489_v40 = vsel %vm272_vm1, %v10461_v14, 0.0  ;;  %v5495_v8 = vmul.f32 %v10461_v14, %v10461_v14 }
0x1b0f   :  { %v5486_v37 = vsel %vm272_vm1, %v10458_v6, 0.0  ;;  %v5494_v23 = vmul.f32 %v10458_v6, %v10458_v6 }
0x1b10   :  { %5487 = vadd.xlane.f32.xlu0 %v5486_v37  ;;  %v5499_v39 = vsel %vm272_vm1, %v5495_v8, 0.0  ;;  %v5556_v8 = vld [vmem:[%s10476_s13 + $0xa0] sm:$0xff] }
0x1b11   :  { %v5496_v15 = vsel %vm272_vm1, %v5494_v23, 0.0  ;;  %v7488_v23 = vld [vmem:[%s7379_s21] ss:$0 sm:$0xff] }
0x1b12   :  { %5497 = vadd.xlane.f32.xlu1 %v5496_v15  ;;  %v5540_v15 = vld [vmem:[%s10476_s13 + $0x20] sm:$0xff] }
0x1b13   :  { %v8914_v54 = vpack.c.bf16 %v5556_v8, %v5540_v15  ;;  %v5548_v15 = vld [vmem:[%s10476_s13 + $0x60] sm:$0xff]  ;;  %v5550_v8 = vld [vmem:[%s10476_s13 + $0x70] sm:$0xff] }
0x1b14   :  { %5490 = vadd.xlane.f32.xlu0 %v5489_v40 }
0x1b18   :  { %5500 = vadd.xlane.f32.xlu0 %v5499_v39  ;;  %v5542_v39 = vld [vmem:[%s10476_s13 + $0x30] sm:$0xff] }
0x1b9d   :  { %v5488_v27 = vpop.xlane.xlu0 %5487 }
0x1b9e   :  { %v5492_v43 = vmul.f32 0.03125, %v5488_v27  ;;  %v5562_v27 = vld [vmem:[%s10476_s13 + $0xd0] sm:$0xff] }
0x1b9f   :  { %v5498_v53 = vpop.xlane.xlu1 %5497 }
0x1ba0   :  { %v5504_v52 = vmul.f32 %v5492_v43, %v5492_v43  ;;  %v5502_v56 = vmul.f32 0.03125, %v5498_v53  ;;  %v5510_v34 = vsub.f32 %v10458_v6, %v5492_v43  ;;  %v8922_v6 = vpack.c.bf16 %v5558_v25, %v5542_v39  ;;  %v5577_v43 = vld [vmem:[%s10476_s13 + $0x148] sm:$0xff]  ;;  %v5566_v39 = vld [vmem:[%s10476_s13 + $0xf0] sm:$0xff] }
0x1ba1   :  { %v5491_v61 = vpop.xlane.xlu0 %5490  ;;  %v5593_v53 = vld [vmem:[%s10476_s13 + $0x1c8] sm:$0xff] }
0x1ba2   :  { %v5506_v0 = vsub.f32 %v5502_v56, %v5504_v52  ;;  %v5493_v3 = vmul.f32 0.03125, %v5491_v61  ;;  %v5579_v52 = vld [vmem:[%s10476_s13 + $0x158] sm:$0xff]  ;;  %v8930_v61 = vpack.c.bf16 %v5560_v63, %v5544_v12  ;;  %v5633_v12 = vld [vmem:[%s10554_s1 + $0x108] sm:$0xff]  ;;  %v5650_v63 = vld [vmem:[%s10554_s1 + $0x190] sm:$0xff] }
0x1ba3   :  { %v5595_v56 = vld [vmem:[%s10476_s13 + $0x1d8] sm:$0xff] }
0x1ba4   :  { %v5508_v4 = vmax.f32 %v5506_v0, 0.0  ;;  %v5505_v62 = vmul.f32 %v5493_v3, %v5493_v3  ;;  %v5511_v19 = vsub.f32 %v10461_v14, %v5493_v3  ;;  %v8918_v14 = vpack.c.bf16 %v5588_v5, %v5572_v59  ;;  %v5576_v3 = vld [vmem:[%s10476_s13 + $0x140] sm:$0xff]  ;;  %v5598_v5 = vld [vmem:[%s10476_s13 + $0x1f0] sm:$0xff] }
0x1ba5   :  { %v5501_v24 = vpop.xlane.xlu0 %5500  ;;  %v8938_v0 = vpack.c.bf16 %v5562_v27, %v5546_v35  ;;  %v5596_v59 = vld [vmem:[%s10476_s13 + $0x1e0] sm:$0xff]  ;;  %v5651_v35 = vld [vmem:[%s10554_s1 + $0x198] sm:$0xff] }
0x1ba6   :  { %v5512_v7 = vadd.f32 1e-05, %v5508_v4  ;;  %v5503_v10 = vmul.f32 0.03125, %v5501_v24  ;;  %v5592_v4 = vld [vmem:[%s10476_s13 + $0x1c0] sm:$0xff]  ;;  %v5578_v24 = vld [vmem:[%s10476_s13 + $0x150] sm:$0xff] }
0x1ba8   :  { %9340 = vrsqrt.f32 %v5512_v7  ;;  %v5507_v58 = vsub.f32 %v5503_v10, %v5505_v62  ;;  %v5594_v7 = vld [vmem:[%s10476_s13 + $0x1d0] sm:$0xff]  ;;  %v8932_v62 = vpack.c.bf16 %v5593_v53, %v5577_v43  ;;  %v8940_v10 = vpack.c.bf16 %v5595_v56, %v5579_v52  ;;  %v5603_v52 = vld [vmem:[%s10554_s1 + $0x18] sm:$0xff] }
0x1ba9   :  { %v5602_v53 = vld [vmem:[%s10554_s1 + $0x10] sm:$0xff] }
0x1baa   :  { %v5509_v9 = vmax.f32 %v5507_v58, 0.0  ;;  %v5549_v58 = vld [vmem:[%s10476_s13 + $0x68] sm:$0xff] }
0x1bac   :  { %v5513_v11 = vadd.f32 1e-05, %v5509_v9  ;;  %v5565_v9 = vld [vmem:[%s10476_s13 + $0xe8] sm:$0xff] }
0x1bad   :  { %v8944_v25 = vpack.c.bf16 %v5565_v9, %v5549_v58  ;;  %v5604_v9 = vld [vmem:[%s10554_s1 + $0x20] sm:$0xff] }
0x1bae   :  { %9342 = vrsqrt.f32 %v5513_v11  ;;  %v5551_v11 = vld [vmem:[%s10476_s13 + $0x78] sm:$0xff] }
0x1bb2   :  { %v9341_v37 = vpop.eup %9340 }
0x1bb3   :  { %v5516_v40 = vmul.f32 %v9341_v37, %v5510_v34  ;;  %v5567_v34 = vld [vmem:[%s10476_s13 + $0xf8] sm:$0xff]  ;;  %v8934_v37 = vpack.c.bf16 %v5592_v4, %v5576_v3  ;;  %v5620_v4 = vld [vmem:[%s10554_s1 + $0xa0] sm:$0xff] }
0x1bb4   :  { %v5635_v3 = vld [vmem:[%s10554_s1 + $0x118] sm:$0xff] }
0x1bb5   :  { %v5525_v30 = vmul.f32 %v7488_v23, %v5516_v40  ;;  %v5564_v40 = vld [vmem:[%s10476_s13 + $0xe0] sm:$0xff] }
0x1bb6   :  { %v8946_v60 = vpack.c.bf16 %v5564_v40, %v5548_v15  ;;  %v5637_v15 = vld [vmem:[%s10554_s1 + $0x128] sm:$0xff]  ;;  %v5622_v40 = vld [vmem:[%s10554_s1 + $0xb0] sm:$0xff] }
0x1bb7   :  { %v10514_v41 = vadd.f32 %v7489_v31, %v5525_v30  ;;  %v5597_v30 = vld [vmem:[%s10476_s13 + $0x1e8] sm:$0xff] }
0x1bb8   :  { %v9343_v57 = vpop.eup %9342  ;;  %v8948_v29 = vpack.c.bf16 %v5597_v30, %v5581_v28  ;;  %v5606_v28 = vld [vmem:[%s10554_s1 + $0x30] sm:$0xff]  ;;  %v5607_v30 = vld [vmem:[%s10554_s1 + $0x38] sm:$0xff] }
0x1bb9   :  { %v5517_v46 = vmul.f32 %v9343_v57, %v5511_v19  ;;  %7490 = vmatmul.mubr.msk.f32.vlgmr.msra.gmra.mrb[74].mxu0 %vm272_vm1, %v10514_v41  ;;  %7492 = vmatmul.mubr.msk.f32.vlgmr.msra.gmra.mrb[72].mxu1 %vm272_vm1, %v10514_v41  ;;  %v5582_v19 = vld [vmem:[%s10476_s13 + $0x170] sm:$0xff]  ;;  %v5616_v57 = vld [vmem:[%s10554_s1 + $0x80] sm:$0xff] }
0x1bba   :  { %8915 = vmatpush1.bf16.msra.mxu0 %v8914_v54  ;;  %8923 = vmatpush1.bf16.msra.mxu1 %v8922_v6  ;;  %v8954_v54 = vpack.c.bf16 %v5566_v39, %v5550_v8  ;;  %v5580_v6 = vld [vmem:[%s10476_s13 + $0x160] sm:$0xff]  ;;  %v5654_v8 = vld [vmem:[%s10554_s1 + $0x1b0] sm:$0xff]  ;;  %v5655_v39 = vld [vmem:[%s10554_s1 + $0x1b8] sm:$0xff] }
0x1bbb   :  { %v5526_v1 = vmul.f32 %v7488_v23, %v5517_v46  ;;  %6016 = vmatprep.mubr.f32.mxu0 %v9356_v32  ;;  %6093 = vmatprep.mubr.f32.mxu1 %v9356_v32  ;;  %v8942_v23 = vpack.c.bf16 %v5594_v7, %v5578_v24  ;;  %v5649_v46 = vld [vmem:[%s10554_s1 + $0x188] sm:$0xff]  ;;  %v8950_v21 = vpack.c.bf16 %v5596_v59, %v5580_v6  ;;  %v5652_v7 = vld [vmem:[%s10554_s1 + $0x1a0] sm:$0xff] }
0x1bbc   :  { %8917 = vmatprep.subr.bf16.mxu0 %v8916_v47  ;;  %8925 = vmatprep.subr.bf16.mxu1 %v8924_v55  ;;  %v5617_v47 = vld [vmem:[%s10554_s1 + $0x88] sm:$0xff]  ;;  %v5648_v55 = vld [vmem:[%s10554_s1 + $0x180] sm:$0xff]  ;;  %v9004_v49 = vpack.c.bf16 %v5655_v39, %v5654_v8  ;;  %v5615_v8 = vld [vmem:[%s10554_s1 + $0x78] sm:$0xff] }
0x1bbd   :  { %v10531_v13 = vadd.f32 %v7489_v31, %v5526_v1  ;;  %v8952_v31 = vpack.c.bf16 %v5567_v34, %v5551_v11  ;;  %v8960_v2 = vpack.c.bf16 %v5617_v47, %v5616_v57  ;;  %v8992_v16 = vpack.c.bf16 %v5649_v46, %v5648_v55  ;;  %v5632_v1 = vld [vmem:[%s10554_s1 + $0x100] sm:$0xff]  ;;  %v5621_v24 = vld [vmem:[%s10554_s1 + $0xa8] sm:$0xff] }
0x1bbe   :  { %8919 = vmatpush1.bf16.msra.mxu0 %v8918_v14  ;;  %8927 = vmatpush1.bf16.msra.mxu1 %v8926_v33  ;;  %v8958_v14 = vpack.c.bf16 %v5598_v5, %v5582_v19  ;;  %v5600_v33 = vld [vmem:[%s10554_s1] sm:$0xff]  ;;  %v8994_v43 = vpack.c.bf16 %v5633_v12, %v5632_v1  ;;  %v5605_v11 = vld [vmem:[%s10554_s1 + $0x28] sm:$0xff]  ;;  %v8968_v34 = vpack.c.bf16 %v5621_v24, %v5620_v4 }
0x1bbf   :  { %7491 = vmatmul.mubr.msk.f32.gmra.mrb[76].mxu0 %vm272_vm1, %v10531_v13  ;;  %7493 = vmatmul.mubr.msk.f32.gmra.mrb[74].mxu1 %vm272_vm1, %v10531_v13  ;;  %v8962_v27 = vpack.c.bf16 %v5601_v22, %v5600_v33  ;;  %v5624_v6 = vld [vmem:[%s10554_s1 + $0xc0] sm:$0xff]  ;;  %v5625_v59 = vld [vmem:[%s10554_s1 + $0xc8] sm:$0xff]  ;;  %v5626_v33 = vld [vmem:[%s10554_s1 + $0xd0] sm:$0xff] }
0x1bc0   :  { %6164 = vmatprep.mubr.f32.mxu0 %v9356_v32  ;;  %6241 = vmatprep.mubr.f32.mxu1 %v9356_v32  ;;  %v5656_v19 = vld [vmem:[%s10554_s1 + $0x1c0] sm:$0xff]  ;;  %v5657_v5 = vld [vmem:[%s10554_s1 + $0x1c8] sm:$0xff]  ;;  %v8976_v55 = vpack.c.bf16 %v5625_v59, %v5624_v6  ;;  %v5627_v22 = vld [vmem:[%s10554_s1 + $0xd8] sm:$0xff] }
0x1bc1   :  { %8929 = vmatprep.subr.bf16.mxu0 %v8928_v42  ;;  %8937 = vmatprep.subr.bf16.mxu1 %v8936_v50  ;;  %v5618_v42 = vld [vmem:[%s10554_s1 + $0x90] sm:$0xff]  ;;  %v5619_v50 = vld [vmem:[%s10554_s1 + $0x98] sm:$0xff]  ;;  %v5608_v57 = vld [vmem:[%s10554_s1 + $0x40] sm:$0xff]  ;;  %v9008_v46 = vpack.c.bf16 %v5657_v5, %v5656_v19 }
0x1bc2   :  { %v8964_v56 = vpack.c.bf16 %v5619_v50, %v5618_v42  ;;  %v5609_v47 = vld [vmem:[%s10554_s1 + $0x48] sm:$0xff]  ;;  %v5610_v42 = vld [vmem:[%s10554_s1 + $0x50] sm:$0xff]  ;;  %v5611_v50 = vld [vmem:[%s10554_s1 + $0x58] sm:$0xff] }
0x1bc3   :  { %7494 = vmatmul.mubr.msk.f32.vlgmr.msra.gmra.mrb[78].mxu0 %vm272_vm1, %v10514_v41  ;;  %7496 = vmatmul.mubr.msk.f32.vlgmr.msra.gmra.mrb[76].mxu1 %vm272_vm1, %v10514_v41  ;;  %v8978_v1 = vpack.c.bf16 %v5609_v47, %v5608_v57  ;;  %v5612_v4 = vld [vmem:[%s10554_s1 + $0x60] sm:$0xff]  ;;  %v5713_v6 = vld [vmem:[%s10554_s1 + $0x388] sm:$0xff] }
0x1bc4   :  { %8931 = vmatpush1.bf16.msra.mxu0 %v8930_v61  ;;  %8939 = vmatpush1.bf16.msra.mxu1 %v8938_v0  ;;  %v8996_v61 = vpack.c.bf16 %v5651_v35, %v5650_v63  ;;  %v5634_v0 = vld [vmem:[%s10554_s1 + $0x110] sm:$0xff]  ;;  %v8980_v63 = vpack.c.bf16 %v5627_v22, %v5626_v33  ;;  %v10679_v19 = vld [vmem:[%s10676_s5] sm:$0xff] }
0x1bc5   :  { %6170 = vmatprep.mubr.f32.mxu0 %v9356_v32  ;;  %6247 = vmatprep.mubr.f32.mxu1 %v9356_v32  ;;  %v8998_v58 = vpack.c.bf16 %v5635_v3, %v5634_v0  ;;  %v8982_v0 = vpack.c.bf16 %v5611_v50, %v5610_v42  ;;  %v5863_v5 = vrot.slane %v10679_v19, %v9864_v17 }
0x1bc6   :  { %8933 = vmatprep.subr.bf16.mxu0 %v8932_v62  ;;  %8941 = vmatprep.subr.bf16.mxu1 %v8940_v10  ;;  %v5653_v62 = vld [vmem:[%s10554_s1 + $0x1a8] sm:$0xff]  ;;  %v8966_v10 = vpack.c.bf16 %v5603_v52, %v5602_v53  ;;  %v5628_v53 = vld [vmem:[%s10554_s1 + $0xe0] sm:$0xff]  ;;  %v5875_v57 = vrot.slane %v10679_v19, %v9876_v36 }
0x1bc7   :  { %7495 = vmatmul.mubr.msk.f32.gmra.mrb[80].mxu0 %vm272_vm1, %v10531_v13  ;;  %7497 = vmatmul.mubr.msk.f32.gmra.mrb[78].mxu1 %vm272_vm1, %v10531_v13  ;;  %v5629_v52 = vld [vmem:[%s10554_s1 + $0xe8] sm:$0xff] }
0x1bc8   :  { %8935 = vmatpush1.bf16.msra.mxu0 %v8934_v37  ;;  %8943 = vmatpush1.bf16.msra.mxu1 %v8942_v23  ;;  %v9000_v37 = vpack.c.bf16 %v5653_v62, %v5652_v7  ;;  %v5636_v23 = vld [vmem:[%s10554_s1 + $0x120] sm:$0xff]  ;;  %v8984_v24 = vpack.c.bf16 %v5629_v52, %v5628_v53  ;;  %v5613_v62 = vld [vmem:[%s10554_s1 + $0x68] sm:$0xff]  ;;  %v5667_v53 = vld [vmem:[%s10554_s1 + $0x218] sm:$0xff] }
0x1bc9   :  { %6318 = vmatprep.mubr.f32.mxu0 %v9356_v32  ;;  %6395 = vmatprep.mubr.f32.mxu1 %v9356_v32 }
0x1bca   :  { %8945 = vmatprep.subr.bf16.mxu0 %v8944_v25  ;;  %8953 = vmatprep.subr.bf16.mxu1 %v8952_v31  ;;  %v8970_v25 = vpack.c.bf16 %v5605_v11, %v5604_v9  ;;  %v9002_v31 = vpack.c.bf16 %v5637_v15, %v5636_v23  ;;  %v8986_v9 = vpack.c.bf16 %v5613_v62, %v5612_v4  ;;  %v5662_v23 = vld [vmem:[%s10554_s1 + $0x1f0] sm:$0xff]  ;;  %v5699_v4 = vld [vmem:[%s10554_s1 + $0x318] sm:$0xff] }
0x1bcb   :  { %7498 = vmatmul.mubr.msk.f32.vlgmr.msra.gmra.mrb[82].mxu0 %vm272_vm1, %v10514_v41  ;;  %7500 = vmatmul.mubr.msk.f32.vlgmr.msra.gmra.mrb[80].mxu1 %vm272_vm1, %v10514_v41 }
0x1bcc   :  { %8947 = vmatpush1.bf16.msra.mxu0 %v8946_v60  ;;  %8955 = vmatpush1.bf16.msra.mxu1 %v8954_v54  ;;  %v5638_v60 = vld [vmem:[%s10554_s1 + $0x130] sm:$0xff]  ;;  %v5639_v54 = vld [vmem:[%s10554_s1 + $0x138] sm:$0xff] }
0x1bcd   :  { %6324 = vmatprep.mubr.f32.mxu0 %v9356_v32  ;;  %6401 = vmatprep.mubr.f32.mxu1 %v9356_v32 }
0x1bce   :  { %8949 = vmatprep.subr.bf16.mxu0 %v8948_v29  ;;  %8957 = vmatprep.subr.bf16.mxu1 %v8956_v44  ;;  %v8974_v29 = vpack.c.bf16 %v5607_v30, %v5606_v28  ;;  %v9006_v44 = vpack.c.bf16 %v5639_v54, %v5638_v60  ;;  %v5647_v28 = vld [vmem:[%s10554_s1 + $0x178] sm:$0xff]  ;;  %v5712_v60 = vld [vmem:[%s10554_s1 + $0x380] sm:$0xff] }
0x1bcf   :  { %7499 = vmatmul.mubr.msk.f32.gmra.mrb[84].mxu0 %vm272_vm1, %v10531_v13  ;;  %7501 = vmatmul.mubr.msk.f32.gmra.mrb[82].mxu1 %vm272_vm1, %v10531_v13  ;;  %v9056_v59 = vpack.c.bf16 %v5713_v6, %v5712_v60  ;;  %v5669_v60 = vld [vmem:[%s10554_s1 + $0x228] sm:$0xff] }
0x1bd0   :  { %8951 = vmatpush1.bf16.msra.mxu0 %v8950_v21  ;;  %8959 = vmatpush1.bf16.msra.mxu1 %v8958_v14  ;;  %v5640_v21 = vld [vmem:[%s10554_s1 + $0x140] sm:$0xff]  ;;  %v5641_v14 = vld [vmem:[%s10554_s1 + $0x148] sm:$0xff] }
0x1bd1   :  { %6472 = vmatprep.mubr.f32.mxu0 %v9356_v32  ;;  %6549 = vmatprep.mubr.f32.mxu1 %v9356_v32  ;;  %v9010_v12 = vpack.c.bf16 %v5641_v14, %v5640_v21  ;;  %v5665_v21 = vld [vmem:[%s10554_s1 + $0x208] sm:$0xff] }
0x1bd2   :  { %8961 = vmatprep.subr.bf16.mxu0 %v8960_v2  ;;  %8993 = vmatprep.subr.bf16.mxu1 %v8992_v16  ;;  %v5658_v2 = vld [vmem:[%s10554_s1 + $0x1d0] sm:$0xff]  ;;  %v5659_v16 = vld [vmem:[%s10554_s1 + $0x1d8] sm:$0xff]  ;;  %v5701_v6 = vld [vmem:[%s10554_s1 + $0x328] sm:$0xff] }
0x1bd3   :  { %7502 = vmatmul.mubr.msk.f32.vlgmr.msra.gmra.mrb[86].mxu0 %vm272_vm1, %v10514_v41  ;;  %7504 = vmatmul.mubr.msk.f32.vlgmr.msra.gmra.mrb[84].mxu1 %vm272_vm1, %v10514_v41  ;;  %v9012_v35 = vpack.c.bf16 %v5659_v16, %v5658_v2  ;;  %v5696_v16 = vld [vmem:[%s10554_s1 + $0x300] sm:$0xff] }
0x1bd4   :  { %6478 = vmatprep.mubr.f32.mxu0 %v9356_v32  ;;  %6555 = vmatprep.mubr.f32.mxu1 %v9356_v32  ;;  %v5623_v32 = vld [vmem:[%s10554_s1 + $0xb8] sm:$0xff] }
0x1bd5   :  { %8963 = vmatpush3.bf16.msra.mxu0 %v8962_v27  ;;  %8995 = vmatpush3.bf16.msra.mxu1 %v8994_v43  ;;  %v8972_v26 = vpack.c.bf16 %v5623_v32, %v5622_v40  ;;  %v5642_v27 = vld [vmem:[%s10554_s1 + $0x150] sm:$0xff]  ;;  %v5643_v43 = vld [vmem:[%s10554_s1 + $0x158] sm:$0xff] }
0x1bd6   :  { %8965 = vmatprep.subr.bf16.mxu0 %v8964_v56  ;;  %8997 = vmatprep.subr.bf16.mxu1 %v8996_v61  ;;  %v5660_v56 = vld [vmem:[%s10554_s1 + $0x1e0] sm:$0xff]  ;;  %v5661_v61 = vld [vmem:[%s10554_s1 + $0x1e8] sm:$0xff]  ;;  %v9014_v3 = vpack.c.bf16 %v5643_v43, %v5642_v27  ;;  %v5663_v40 = vld [vmem:[%s10554_s1 + $0x1f8] sm:$0xff] }
0x1bd7   :  { %7503 = vmatmul.mubr.msk.f32.gmra.mrb[88].mxu0 %vm272_vm1, %v10531_v13  ;;  %7505 = vmatmul.mubr.msk.f32.gmra.mrb[86].mxu1 %vm272_vm1, %v10531_v13  ;;  %v9016_v7 = vpack.c.bf16 %v5661_v61, %v5660_v56  ;;  %v5614_v32 = vld [vmem:[%s10554_s1 + $0x70] sm:$0xff]  ;;  %v9020_v39 = vpack.c.bf16 %v5663_v40, %v5662_v23  ;;  %v5715_v27 = vld [vmem:[%s10554_s1 + $0x398] sm:$0xff]  ;;  %v5685_v23 = vld [vmem:[%s10554_s1 + $0x2a8] sm:$0xff] }
0x1bd8   :  { %v5666_v43 = vld [vmem:[%s10554_s1 + $0x210] sm:$0xff] }
0x1bd9   :  { %8967 = vmatpush3.bf16.msra.mxu0 %v8966_v10  ;;  %8999 = vmatpush3.bf16.msra.mxu1 %v8998_v58  ;;  %v5644_v10 = vld [vmem:[%s10554_s1 + $0x160] sm:$0xff]  ;;  %v5645_v58 = vld [vmem:[%s10554_s1 + $0x168] sm:$0xff] }
0x1bda   :  { %8969 = vmatprep.subr.bf16.mxu0 %v8968_v34  ;;  %9001 = vmatprep.subr.bf16.mxu1 %v9000_v37  ;;  %v9018_v11 = vpack.c.bf16 %v5645_v58, %v5644_v10  ;;  %v5630_v34 = vld [vmem:[%s10554_s1 + $0xf0] sm:$0xff]  ;;  %v5631_v37 = vld [vmem:[%s10554_s1 + $0xf8] sm:$0xff] }
0x1bdb   :  { %v8988_v15 = vpack.c.bf16 %v5631_v37, %v5630_v34  ;;  %v9030_v34 = vpack.c.bf16 %v5667_v53, %v5666_v43  ;;  %v5684_v37 = vld [vmem:[%s10554_s1 + $0x2a0] sm:$0xff]  ;;  %v5703_v43 = vld [vmem:[%s10554_s1 + $0x338] sm:$0xff] }
0x1bdc   :  { %v5688_v53 = vld [vmem:[%s10554_s1 + $0x2c0] sm:$0xff] }
0x1bdd   :  { %8971 = vmatpush3.bf16.msra.mxu0 %v8970_v25  ;;  %9003 = vmatpush3.bf16.msra.mxu1 %v9002_v31  ;;  %v8990_v25 = vpack.c.bf16 %v5615_v8, %v5614_v32  ;;  %v5646_v31 = vld [vmem:[%s10554_s1 + $0x170] sm:$0xff]  ;;  %v10709_v8 = vrot.slane %v10679_v19, %v9898_v48 }
0x1bde   :  { %8973 = vmatprep.subr.bf16.mxu0 %v8972_v26  ;;  %9005 = vmatprep.subr.bf16.mxu1 %v9004_v49  ;;  %v9022_v30 = vpack.c.bf16 %v5647_v28, %v5646_v31  ;;  %v5680_v26 = vld [vmem:[%s10554_s1 + $0x280] sm:$0xff]  ;;  %v5681_v49 = vld [vmem:[%s10554_s1 + $0x288] sm:$0xff] }
0x1bdf   :  { %v9024_v54 = vpack.c.bf16 %v5681_v49, %v5680_v26  ;;  %v5717_v31 = vld [vmem:[%s10554_s1 + $0x3a8] sm:$0xff]  ;;  %v5668_v28 = vld [vmem:[%s10554_s1 + $0x220] sm:$0xff] }
0x1be1   :  { %8975 = vmatpush3.bf16.msra.mxu0 %v8974_v29  ;;  %9007 = vmatpush3.bf16.msra.mxu1 %v9006_v44  ;;  %v5871_v29 = vrot.slane %v10679_v19, %v9867_v18  ;;  %v5867_v44 = vrot.slane %v10679_v19, %v9873_v20 }
0x1be2   :  { %8977 = vmatprep.subr.bf16.mxu0 %v8976_v55  ;;  %9009 = vmatprep.subr.bf16.mxu1 %v9008_v46  ;;  %v5664_v46 = vld [vmem:[%s10554_s1 + $0x200] sm:$0xff] }
0x1be3   :  { %v9026_v61 = vpack.c.bf16 %v5665_v21, %v5664_v46  ;;  %v5686_v46 = vld [vmem:[%s10554_s1 + $0x2b0] sm:$0xff] }
0x1be5   :  { %8979 = vmatpush3.bf16.msra.mxu0 %v8978_v1  ;;  %9011 = vmatpush3.bf16.msra.mxu1 %v9010_v12  ;;  %v5697_v1 = vld [vmem:[%s10554_s1 + $0x308] sm:$0xff]  ;;  %v5682_v12 = vld [vmem:[%s10554_s1 + $0x290] sm:$0xff] }
0x1be6   :  { %8981 = vmatprep.subr.bf16.mxu0 %v8980_v63  ;;  %9013 = vmatprep.subr.bf16.mxu1 %v9012_v35  ;;  %v5683_v63 = vld [vmem:[%s10554_s1 + $0x298] sm:$0xff]  ;;  %v5714_v35 = vld [vmem:[%s10554_s1 + $0x390] sm:$0xff] }
0x1be7   :  { %v9028_v62 = vpack.c.bf16 %v5683_v63, %v5682_v12  ;;  %v9060_v10 = vpack.c.bf16 %v5715_v27, %v5714_v35  ;;  %v5670_v63 = vld [vmem:[%s10554_s1 + $0x230] sm:$0xff]  ;;  %v5671_v35 = vld [vmem:[%s10554_s1 + $0x238] sm:$0xff] }
0x1be8   :  { %v5702_v27 = vld [vmem:[%s10554_s1 + $0x330] sm:$0xff] }
0x1be9   :  { %8983 = vmatpush3.bf16.msra.mxu0 %v8982_v0  ;;  %9015 = vmatpush3.bf16.msra.mxu1 %v9014_v3  ;;  %v9058_v0 = vpack.c.bf16 %v5697_v1, %v5696_v16  ;;  %v5698_v3 = vld [vmem:[%s10554_s1 + $0x310] sm:$0xff]  ;;  %v5719_v16 = vld [vmem:[%s10554_s1 + $0x3b8] sm:$0xff] }
0x1bea   :  { %8985 = vmatprep.subr.bf16.mxu0 %v8984_v24  ;;  %9017 = vmatprep.subr.bf16.mxu1 %v9016_v7 }
0x1bed   :  { %8987 = vmatpush3.bf16.msra.mxu0 %v8986_v9  ;;  %9019 = vmatpush3.bf16.msra.mxu1 %v9018_v11  ;;  %v10703_v11 = vrot.slane %v10679_v19, %v9895_v45 }
0x1bee   :  { %8989 = vmatprep.subr.bf16.mxu0 %v8988_v15  ;;  %9021 = vmatprep.subr.bf16.mxu1 %v9020_v39  ;;  %v9062_v39 = vpack.c.bf16 %v5699_v4, %v5698_v3 }
0x1bf1   :  { %8991 = vmatpush3.bf16.msra.mxu0 %v8990_v25  ;;  %9023 = vmatpush3.bf16.msra.mxu1 %v9022_v30  ;;  %v5716_v25 = vld [vmem:[%s10554_s1 + $0x3a0] sm:$0xff] }
0x1bf2   :  { %9025 = vmatprep.subr.bf16.mxu0 %v9024_v54  ;;  %9057 = vmatprep.subr.bf16.mxu1 %v9056_v59  ;;  %v5700_v54 = vld [vmem:[%s10554_s1 + $0x320] sm:$0xff]  ;;  %v9064_v21 = vpack.c.bf16 %v5717_v31, %v5716_v25  ;;  %v5690_v25 = vld [vmem:[%s10554_s1 + $0x2d0] sm:$0xff] }
0x1c8c   :  { %v6012_v47 = vpop.f32.mrb[74].mxu0  ;;  %v6089_v55 = vpop.f32.mrb[72].mxu1 }
0x1c8d   :  { %v6013_v14 = vadd.f32 %v6012_v47, %v5863_v5  ;;  %v6090_v33 = vadd.f32 %v6089_v55, %v5871_v29  ;;  %v6014_v22 = vpop.f32.mrb[75].mxu0  ;;  %v6091_v2 = vpop.f32.mrb[73].mxu1 }
0x1c8e   :  { %v6015_v42 = vadd.f32 %v6014_v22, %v5867_v44  ;;  %v6092_v50 = vadd.f32 %v6091_v2, %v5875_v57  ;;  %v5687_v22 = vld [vmem:[%s10554_s1 + $0x2b8] sm:$0xff]  ;;  %v5718_v2 = vld [vmem:[%s10554_s1 + $0x3b0] sm:$0xff] }
0x1c8f   :  { %v6562_v24 = vmax.f32 %v6013_v14, 0.0  ;;  %v6564_v7 = vmax.f32 %v6090_v33, 0.0  ;;  %v9034_v14 = vpack.c.bf16 %v5669_v60, %v5668_v28  ;;  %v9066_v33 = vpack.c.bf16 %v5701_v6, %v5700_v54 }
0x1c90   :  { %v6563_v52 = vmax.f32 %v6015_v42, 0.0  ;;  %v6565_v56 = vmax.f32 %v6092_v50, 0.0  ;;  %v9036_v4 = vpack.c.bf16 %v5687_v22, %v5686_v46  ;;  %v5675_v46 = vld [vmem:[%s10554_s1 + $0x258] sm:$0xff] }
0x1c92   :  { %v6018_v58 = vpop.f32.mrb[76].mxu0  ;;  %v6095_v9 = vpop.f32.mrb[74].mxu1  ;;  %6665 = vmatprep.mubr.f32.mxu0 %v6563_v52  ;;  %6740 = vmatprep.mubr.f32.mxu1 %v6565_v56  ;;  %v5689_v52 = vld [vmem:[%s10554_s1 + $0x2c8] sm:$0xff] }
0x1c93   :  { %v6019_v15 = vadd.f32 %v6018_v58, %v5863_v5  ;;  %v6020_v40 = vpop.f32.mrb[77].mxu0  ;;  %v6097_v32 = vpop.f32.mrb[75].mxu1  ;;  %6666 = vmatmul.mubr.f32.vlgmr.msra.gmra.mrb[90].mxu0 %v6562_v24  ;;  %6741 = vmatmul.mubr.f32.vlgmr.msra.gmra.mrb[88].mxu1 %v6564_v7  ;;  %v6096_v30 = vadd.f32 %v6095_v9, %v5871_v29  ;;  %v9068_v24 = vpack.c.bf16 %v5719_v16, %v5718_v2  ;;  %v5720_v7 = vld [vmem:[%s10554_s1 + $0x3c0] sm:$0xff]  ;;  %v5693_v2 = vld [vmem:[%s10554_s1 + $0x2e8] sm:$0xff] }
0x1c94   :  { %v6021_v26 = vadd.f32 %v6020_v40, %v5867_v44  ;;  %v6098_v49 = vadd.f32 %v6097_v32, %v5875_v57  ;;  %9027 = vmatpush3.bf16.msra.mxu0 %v9026_v61  ;;  %9059 = vmatpush3.bf16.msra.mxu1 %v9058_v0  ;;  %v9032_v57 = vpack.c.bf16 %v5685_v23, %v5684_v37  ;;  %v5672_v37 = vld [vmem:[%s10554_s1 + $0x240] sm:$0xff]  ;;  %v5673_v23 = vld [vmem:[%s10554_s1 + $0x248] sm:$0xff] }
0x1c95   :  { %9029 = vmatprep.subr.bf16.mxu0 %v9028_v62  ;;  %9061 = vmatprep.subr.bf16.mxu1 %v9060_v10  ;;  %v6578_v1 = vmax.f32 %v6019_v15, 0.0  ;;  %v6580_v12 = vmax.f32 %v6096_v30, 0.0  ;;  %v5721_v62 = vld [vmem:[%s10554_s1 + $0x3c8] sm:$0xff]  ;;  %v9038_v9 = vpack.c.bf16 %v5671_v35, %v5670_v63  ;;  %v9040_v15 = vpack.c.bf16 %v5689_v52, %v5688_v53  ;;  %v5704_v32 = vld [vmem:[%s10554_s1 + $0x340] sm:$0xff]  ;;  %v5691_v30 = vld [vmem:[%s10554_s1 + $0x2d8] sm:$0xff] }
0x1c96   :  { %v6579_v59 = vmax.f32 %v6021_v26, 0.0  ;;  %v6581_v5 = vmax.f32 %v6098_v49, 0.0  ;;  %v10717_v47 = vpop.f32.mrb[78].mxu0  ;;  %v10719_v55 = vpop.f32.mrb[76].mxu1  ;;  %v9072_v40 = vpack.c.bf16 %v5721_v62, %v5720_v7  ;;  %v5722_v26 = vld [vmem:[%s10554_s1 + $0x3d0] sm:$0xff]  ;;  %v5723_v49 = vld [vmem:[%s10554_s1 + $0x3d8] sm:$0xff]  ;;  %v9042_v6 = vpack.c.bf16 %v5673_v23, %v5672_v37 }
0x1c97   :  { %v6168_v29 = vpop.f32.mrb[79].mxu0  ;;  %v6245_v44 = vpop.f32.mrb[77].mxu1  ;;  %v5724_v16 = vld [vmem:[%s10554_s1 + $0x3e0] sm:$0xff]  ;;  %v5695_v7 = vld [vmem:[%s10554_s1 + $0x2f8] sm:$0xff]  ;;  %v5726_v62 = vld [vmem:[%s10554_s1 + $0x3f0] sm:$0xff]  ;;  %v5879_v23 = vrot.slane %v10679_v19, %v9979_v38 }
0x1c98   :  { %v6169_v42 = vadd.f32 %v6168_v29, %v10703_v11  ;;  %v6246_v50 = vadd.f32 %v6245_v44, %v10709_v8  ;;  %9031 = vmatpush3.bf16.msra.mxu0 %v9030_v34  ;;  %9063 = vmatpush3.bf16.msra.mxu1 %v9062_v39  ;;  %v9070_v34 = vpack.c.bf16 %v5703_v43, %v5702_v27  ;;  %v5705_v39 = vld [vmem:[%s10554_s1 + $0x348] sm:$0xff]  ;;  %v5676_v35 = vld [vmem:[%s10554_s1 + $0x260] sm:$0xff] }
0x1c99   :  { %6670 = vmatprep.mubr.f32.mxu0 %v6579_v59  ;;  %6745 = vmatprep.mubr.f32.mxu1 %v6581_v5  ;;  %v9074_v59 = vpack.c.bf16 %v5705_v39, %v5704_v32  ;;  %v5674_v5 = vld [vmem:[%s10554_s1 + $0x250] sm:$0xff]  ;;  %v9044_v29 = vpack.c.bf16 %v5691_v30, %v5690_v25  ;;  %v9076_v44 = vpack.c.bf16 %v5723_v49, %v5722_v26  ;;  %v5677_v27 = vld [vmem:[%s10554_s1 + $0x268] sm:$0xff]  ;;  %v5708_v52 = vld [vmem:[%s10554_s1 + $0x360] sm:$0xff] }
0x1c9a   :  { %v6567_v56 = vmax.f32 %v6169_v42, 0.0  ;;  %v6569_v61 = vmax.f32 %v6246_v50, 0.0  ;;  %6671 = vmatmul.mubr.f32.gmra.mrb[92].mxu0 %v6578_v1  ;;  %6746 = vmatmul.mubr.f32.gmra.mrb[90].mxu1 %v6580_v12  ;;  %v10733_v0 = vpop.f32.mrb[80].mxu0  ;;  %v10735_v3 = vpop.f32.mrb[78].mxu1  ;;  %v5725_v1 = vld [vmem:[%s10554_s1 + $0x3e8] sm:$0xff]  ;;  %v9046_v50 = vpack.c.bf16 %v5675_v46, %v5674_v5  ;;  %v5678_v32 = vld [vmem:[%s10554_s1 + $0x270] sm:$0xff]  ;;  %v5887_v30 = vrot.slane %v10679_v19, %v9984_v51 }
0x1c9b   :  { %9033 = vmatprep.subr.bf16.mxu0 %v9032_v57  ;;  %9065 = vmatprep.subr.bf16.mxu1 %v9064_v21  ;;  %v10739_v10 = vpop.f32.mrb[81].mxu0  ;;  %v10741_v58 = vpop.f32.mrb[79].mxu1  ;;  %v5706_v57 = vld [vmem:[%s10554_s1 + $0x350] sm:$0xff]  ;;  %v5707_v21 = vld [vmem:[%s10554_s1 + $0x358] sm:$0xff]  ;;  %v9080_v53 = vpack.c.bf16 %v5725_v1, %v5724_v16  ;;  %v5745_v5 = vld [vmem:[%s10554_s1 + $0x488] sm:$0xff] }
0x1c9c   :  { %9035 = vmatpush3.bf16.msra.mxu0 %v9034_v14  ;;  %9067 = vmatpush3.bf16.msra.mxu1 %v9066_v33  ;;  %v5692_v14 = vld [vmem:[%s10554_s1 + $0x2e0] sm:$0xff]  ;;  %v9078_v63 = vpack.c.bf16 %v5707_v21, %v5706_v57  ;;  %v5679_v39 = vld [vmem:[%s10554_s1 + $0x278] sm:$0xff]  ;;  %v5710_v25 = vld [vmem:[%s10554_s1 + $0x370] sm:$0xff] }
0x1c9d   :  { %6815 = vmatprep.mubr.f32.mxu0 %v6567_v56  ;;  %6890 = vmatprep.mubr.f32.mxu1 %v6569_v61  ;;  %v9048_v43 = vpack.c.bf16 %v5693_v2, %v5692_v14  ;;  %v5709_v56 = vld [vmem:[%s10554_s1 + $0x368] sm:$0xff]  ;;  %v5694_v61 = vld [vmem:[%s10554_s1 + $0x2f0] sm:$0xff]  ;;  %v5728_v2 = vld [vmem:[%s10554_s1 + $0x400] sm:$0xff]  ;;  %v9054_v1 = vpack.c.bf16 %v5679_v39, %v5678_v32 }
0x1c9e   :  { %v10748_v31 = vpop.f32.mrb[82].mxu0  ;;  %v10750_v28 = vpop.f32.mrb[80].mxu1  ;;  %9037 = vmatprep.subr.bf16.mxu0 %v9036_v4  ;;  %9069 = vmatprep.subr.bf16.mxu1 %v9068_v24  ;;  %v9052_v26 = vpack.c.bf16 %v5695_v7, %v5694_v61  ;;  %v5777_v57 = vld [vmem:[%s10554_s1 + $0x588] sm:$0xff]  ;;  %v5747_v61 = vld [vmem:[%s10554_s1 + $0x498] sm:$0xff]  ;;  %v5778_v7 = vld [vmem:[%s10554_s1 + $0x590] sm:$0xff] }
0x1c9f   :  { %v10755_v60 = vpop.f32.mrb[83].mxu0  ;;  %v10757_v54 = vpop.f32.mrb[81].mxu1  ;;  %v10808_v21 = vld [vmem:[%s10676_s5 + $0x8] sm:$0xff] }
0x1ca0   :  { %9039 = vmatpush3.bf16.msra.mxu0 %v9038_v9  ;;  %9071 = vmatpush3.bf16.msra.mxu1 %v9070_v34  ;;  %v5727_v9 = vld [vmem:[%s10554_s1 + $0x3f8] sm:$0xff]  ;;  %v5729_v16 = vld [vmem:[%s10554_s1 + $0x408] sm:$0xff] }
0x1ca1   :  { %9041 = vmatprep.subr.bf16.mxu0 %v9040_v15  ;;  %9073 = vmatprep.subr.bf16.mxu1 %v9072_v40  ;;  %v9050_v15 = vpack.c.bf16 %v5677_v27, %v5676_v35  ;;  %v9082_v40 = vpack.c.bf16 %v5709_v56, %v5708_v52  ;;  %v9084_v49 = vpack.c.bf16 %v5727_v9, %v5726_v62  ;;  %v5760_v35 = vld [vmem:[%s10554_s1 + $0x500] sm:$0xff]  ;;  %v5761_v27 = vld [vmem:[%s10554_s1 + $0x508] sm:$0xff]  ;;  %v5779_v62 = vld [vmem:[%s10554_s1 + $0x598] sm:$0xff] }
0x1ca2   :  { %v10764_v33 = vpop.f32.mrb[84].mxu0  ;;  %v10766_v22 = vpop.f32.mrb[82].mxu1  ;;  %v6244_v52 = vadd.f32 %v10719_v55, %v5887_v30  ;;  %v6175_v9 = vadd.f32 %v10739_v10, %v10703_v11  ;;  %v9090_v55 = vpack.c.bf16 %v5729_v16, %v5728_v2  ;;  %v9122_v32 = vpack.c.bf16 %v5761_v27, %v5760_v35  ;;  %v5732_v16 = vld [vmem:[%s10554_s1 + $0x420] sm:$0xff] }
0x1ca3   :  { %v10771_v12 = vpop.f32.mrb[85].mxu0  ;;  %v10773_v42 = vpop.f32.mrb[83].mxu1  ;;  %v9124_v10 = vpack.c.bf16 %v5779_v62, %v5778_v7  ;;  %v5783_v7 = vld [vmem:[%s10554_s1 + $0x5b8] sm:$0xff] }
0x1ca4   :  { %9043 = vmatpush3.bf16.msra.mxu0 %v9042_v6  ;;  %9075 = vmatpush3.bf16.msra.mxu1 %v9074_v59  ;;  %v5711_v6 = vld [vmem:[%s10554_s1 + $0x378] sm:$0xff]  ;;  %v5744_v59 = vld [vmem:[%s10554_s1 + $0x480] sm:$0xff] }
0x1ca5   :  { %9045 = vmatprep.subr.bf16.mxu0 %v9044_v29  ;;  %9077 = vmatprep.subr.bf16.mxu1 %v9076_v44  ;;  %v5776_v44 = vld [vmem:[%s10554_s1 + $0x580] sm:$0xff] }
0x1ca6   :  { %v10780_v4 = vpop.f32.mrb[86].mxu0  ;;  %v10782_v24 = vpop.f32.mrb[84].mxu1  ;;  %v9120_v56 = vpack.c.bf16 %v5777_v57, %v5776_v44  ;;  %v5763_v44 = vld [vmem:[%s10554_s1 + $0x518] sm:$0xff] }
0x1ca7   :  { %v10787_v34 = vpop.f32.mrb[87].mxu0  ;;  %v10789_v37 = vpop.f32.mrb[85].mxu1 }
0x1ca8   :  { %9047 = vmatpush3.bf16.msra.mxu0 %v9046_v50  ;;  %9079 = vmatpush3.bf16.msra.mxu1 %v9078_v63  ;;  %v9086_v50 = vpack.c.bf16 %v5711_v6, %v5710_v25  ;;  %v9088_v63 = vpack.c.bf16 %v5745_v5, %v5744_v59  ;;  %v5731_v25 = vld [vmem:[%s10554_s1 + $0x418] sm:$0xff]  ;;  %v5762_v5 = vld [vmem:[%s10554_s1 + $0x510] sm:$0xff] }
0x1ca9   :  { %9049 = vmatprep.subr.bf16.mxu0 %v9048_v43  ;;  %9081 = vmatprep.subr.bf16.mxu1 %v9080_v53  ;;  %v5746_v43 = vld [vmem:[%s10554_s1 + $0x490] sm:$0xff]  ;;  %v6167_v53 = vadd.f32 %v10717_v47, %v5879_v23  ;;  %v10834_v47 = vrot.slane %v10808_v21, %v9876_v36  ;;  %v9126_v2 = vpack.c.bf16 %v5763_v44, %v5762_v5  ;;  %v5768_v44 = vld [vmem:[%s10554_s1 + $0x540] sm:$0xff] }
0x1caa   :  { %v10801_v46 = vpop.f32.mrb[88].mxu0  ;;  %v10803_v29 = vpop.f32.mrb[86].mxu1  ;;  %v9092_v11 = vpack.c.bf16 %v5747_v61, %v5746_v43  ;;  %v5730_v36 = vld [vmem:[%s10554_s1 + $0x410] sm:$0xff]  ;;  %v5764_v43 = vld [vmem:[%s10554_s1 + $0x520] sm:$0xff] }
0x1cab   :  { %v10810_v19 = vpop.f32.mrb[89].mxu0  ;;  %v10812_v14 = vpop.f32.mrb[87].mxu1  ;;  %v6566_v39 = vmax.f32 %v6167_v53, 0.0  ;;  %v6400_v59 = vadd.f32 %v10757_v54, %v10834_v47  ;;  %v9094_v54 = vpack.c.bf16 %v5731_v25, %v5730_v36  ;;  %v5765_v53 = vld [vmem:[%s10554_s1 + $0x528] sm:$0xff]  ;;  %v5782_v61 = vld [vmem:[%s10554_s1 + $0x5b0] sm:$0xff] }
0x1cac   :  { %9051 = vmatpush3.bf16.msra.mxu0 %v9050_v15  ;;  %9083 = vmatpush3.bf16.msra.mxu1 %v9082_v40  ;;  %v6252_v15 = vadd.f32 %v10741_v58, %v10709_v8  ;;  %v10830_v40 = vrot.slane %v10808_v21, %v9873_v20  ;;  %v6568_v8 = vmax.f32 %v6244_v52, 0.0  ;;  %v6173_v58 = vadd.f32 %v10733_v0, %v5879_v23  ;;  %v5748_v0 = vld [vmem:[%s10554_s1 + $0x4a0] sm:$0xff]  ;;  %v5750_v52 = vld [vmem:[%s10554_s1 + $0x4b0] sm:$0xff]  ;;  %v5785_v36 = vld [vmem:[%s10554_s1 + $0x5c8] sm:$0xff] }
0x1cad   :  { %9053 = vmatprep.subr.bf16.mxu0 %v9052_v26  ;;  %9085 = vmatprep.subr.bf16.mxu1 %v9084_v49  ;;  %v6250_v20 = vadd.f32 %v10735_v3, %v5887_v30  ;;  %v6583_v26 = vmax.f32 %v6175_v9, 0.0  ;;  %v5749_v3 = vld [vmem:[%s10554_s1 + $0x4a8] sm:$0xff]  ;;  %v5780_v23 = vld [vmem:[%s10554_s1 + $0x5a0] sm:$0xff]  ;;  %v9130_v9 = vpack.c.bf16 %v5765_v53, %v5764_v43 }
0x1cae   :  { %v6585_v49 = vmax.f32 %v6252_v15, 0.0  ;;  %v6323_v6 = vadd.f32 %v10755_v60, %v10830_v40  ;;  %v5781_v30 = vld [vmem:[%s10554_s1 + $0x5a8] sm:$0xff]  ;;  %v6582_v57 = vmax.f32 %v6173_v58, 0.0  ;;  %v9096_v35 = vpack.c.bf16 %v5749_v3, %v5748_v0  ;;  %v5734_v15 = vld [vmem:[%s10554_s1 + $0x430] sm:$0xff]  ;;  %v5788_v53 = vld [vmem:[%s10554_s1 + $0x5e0] sm:$0xff] }
0x1caf   :  { %v6584_v60 = vmax.f32 %v6250_v20, 0.0  ;;  %v9128_v27 = vpack.c.bf16 %v5781_v30, %v5780_v23  ;;  %v5753_v58 = vld [vmem:[%s10554_s1 + $0x4c8] sm:$0xff]  ;;  %v5784_v20 = vld [vmem:[%s10554_s1 + $0x5c0] sm:$0xff]  ;;  %v5754_v3 = vld [vmem:[%s10554_s1 + $0x4d0] sm:$0xff] }
0x1cb0   :  { %9055 = vmatpush3.bf16.msra.mxu0 %v9054_v1  ;;  %9087 = vmatpush3.bf16.msra.mxu1 %v9086_v50  ;;  %v5733_v1 = vld [vmem:[%s10554_s1 + $0x428] sm:$0xff]  ;;  %v6571_v50 = vmax.f32 %v6323_v6, 0.0  ;;  %v9136_v5 = vpack.c.bf16 %v5785_v36, %v5784_v20  ;;  %v5755_v23 = vld [vmem:[%s10554_s1 + $0x4d8] sm:$0xff]  ;;  %v5786_v30 = vld [vmem:[%s10554_s1 + $0x5d0] sm:$0xff] }
0x1cb1   :  { %9089 = vmatprep.subr.bf16.mxu0 %v9088_v63  ;;  %9121 = vmatprep.subr.bf16.mxu1 %v9120_v56  ;;  %v6573_v63 = vmax.f32 %v6400_v59, 0.0  ;;  %v5751_v56 = vld [vmem:[%s10554_s1 + $0x4b8] sm:$0xff]  ;;  %v9098_v62 = vpack.c.bf16 %v5733_v1, %v5732_v16  ;;  %v5737_v6 = vld [vmem:[%s10554_s1 + $0x448] sm:$0xff]  ;;  %v9108_v1 = vpack.c.bf16 %v5755_v23, %v5754_v3  ;;  %v5840_v3 = vld [vmem:[%s10554_s1 + $0x780] sm:$0xff] }
0x1cb2   :  { %v5769_v0 = vld [vmem:[%s10554_s1 + $0x548] sm:$0xff]  ;;  %v5739_v16 = vld [vmem:[%s10554_s1 + $0x458] sm:$0xff] }
0x1cb3   :  { %6816 = vmatmul.mubr.f32.vlgmr.msra.gmra.mrb[94].mxu0 %v6566_v39  ;;  %6891 = vmatmul.mubr.f32.vlgmr.msra.gmra.mrb[92].mxu1 %v6568_v8  ;;  %v5767_v39 = vld [vmem:[%s10554_s1 + $0x538] sm:$0xff]  ;;  %v5752_v8 = vld [vmem:[%s10554_s1 + $0x4c0] sm:$0xff]  ;;  %v5757_v43 = vld [vmem:[%s10554_s1 + $0x4e8] sm:$0xff] }
0x1cb4   :  { %6820 = vmatprep.mubr.f32.mxu0 %v6583_v26  ;;  %6895 = vmatprep.mubr.f32.mxu1 %v6585_v49  ;;  %v5736_v49 = vld [vmem:[%s10554_s1 + $0x440] sm:$0xff]  ;;  %v9104_v59 = vpack.c.bf16 %v5753_v58, %v5752_v8  ;;  %v5791_v8 = vld [vmem:[%s10554_s1 + $0x5f8] sm:$0xff]  ;;  %v5895_v58 = vrot.slane %v10808_v21, %v9864_v17  ;;  %v5841_v23 = vld [vmem:[%s10554_s1 + $0x788] sm:$0xff] }
0x1cb5   :  { %9091 = vmatpush3.bf16.msra.mxu0 %v9090_v55  ;;  %9123 = vmatpush3.bf16.msra.mxu1 %v9122_v32  ;;  %v5735_v55 = vld [vmem:[%s10554_s1 + $0x438] sm:$0xff]  ;;  %v9100_v32 = vpack.c.bf16 %v5751_v56, %v5750_v52  ;;  %v5789_v52 = vld [vmem:[%s10554_s1 + $0x5e8] sm:$0xff] }
0x1cb6   :  { %9093 = vmatprep.subr.bf16.mxu0 %v9092_v11  ;;  %9125 = vmatprep.subr.bf16.mxu1 %v9124_v10  ;;  %v9132_v11 = vpack.c.bf16 %v5783_v7, %v5782_v61  ;;  %v5766_v10 = vld [vmem:[%s10554_s1 + $0x530] sm:$0xff]  ;;  %v9102_v25 = vpack.c.bf16 %v5735_v55, %v5734_v15  ;;  %v5740_v7 = vld [vmem:[%s10554_s1 + $0x460] sm:$0xff]  ;;  %v9144_v15 = vpack.c.bf16 %v5789_v52, %v5788_v53  ;;  %v5843_v53 = vld [vmem:[%s10554_s1 + $0x798] sm:$0xff] }
0x1cb7   :  { %6821 = vmatmul.mubr.f32.gmra.mrb[96].mxu0 %v6582_v57  ;;  %6896 = vmatmul.mubr.f32.gmra.mrb[94].mxu1 %v6584_v60  ;;  %v9134_v26 = vpack.c.bf16 %v5767_v39, %v5766_v10  ;;  %v5787_v57 = vld [vmem:[%s10554_s1 + $0x5d8] sm:$0xff]  ;;  %v9106_v60 = vpack.c.bf16 %v5737_v6, %v5736_v49  ;;  %v5772_v55 = vld [vmem:[%s10554_s1 + $0x560] sm:$0xff]  ;;  %v5790_v39 = vld [vmem:[%s10554_s1 + $0x5f0] sm:$0xff]  ;;  %v5903_v6 = vrot.slane %v10808_v21, %v9867_v18 }
0x1cb8   :  { %6965 = vmatprep.mubr.f32.mxu0 %v6571_v50  ;;  %7040 = vmatprep.mubr.f32.mxu1 %v6573_v63  ;;  %v9140_v50 = vpack.c.bf16 %v5787_v57, %v5786_v30  ;;  %v5770_v63 = vld [vmem:[%s10554_s1 + $0x550] sm:$0xff]  ;;  %v5759_v10 = vld [vmem:[%s10554_s1 + $0x4f8] sm:$0xff]  ;;  %v9148_v17 = vpack.c.bf16 %v5791_v8, %v5790_v39  ;;  %v5792_v30 = vld [vmem:[%s10554_s1 + $0x600] sm:$0xff]  ;;  %v6329_v52 = vadd.f32 %v10771_v12, %v10830_v40 }
0x1cb9   :  { %9095 = vmatpush3.bf16.msra.mxu0 %v9094_v54  ;;  %9127 = vmatpush3.bf16.msra.mxu1 %v9126_v2  ;;  %v9138_v54 = vpack.c.bf16 %v5769_v0, %v5768_v44  ;;  %v5738_v2 = vld [vmem:[%s10554_s1 + $0x450] sm:$0xff]  ;;  %v5808_v44 = vld [vmem:[%s10554_s1 + $0x680] sm:$0xff]  ;;  %v5809_v0 = vld [vmem:[%s10554_s1 + $0x688] sm:$0xff] }
0x1cba   :  { %9097 = vmatprep.subr.bf16.mxu0 %v9096_v35  ;;  %9129 = vmatprep.subr.bf16.mxu1 %v9128_v27  ;;  %v5771_v35 = vld [vmem:[%s10554_s1 + $0x558] sm:$0xff]  ;;  %v5756_v27 = vld [vmem:[%s10554_s1 + $0x4e0] sm:$0xff]  ;;  %v9110_v56 = vpack.c.bf16 %v5739_v16, %v5738_v2  ;;  %v5774_v49 = vld [vmem:[%s10554_s1 + $0x570] sm:$0xff] }
0x1cbb   :  { %v9142_v61 = vpack.c.bf16 %v5771_v35, %v5770_v63  ;;  %v5793_v57 = vld [vmem:[%s10554_s1 + $0x608] sm:$0xff]  ;;  %v5824_v2 = vld [vmem:[%s10554_s1 + $0x700] sm:$0xff]  ;;  %v6398_v63 = vadd.f32 %v10750_v28, %v5903_v6  ;;  %v9184_v35 = vpack.c.bf16 %v5841_v23, %v5840_v3  ;;  %v5827_v39 = vld [vmem:[%s10554_s1 + $0x718] sm:$0xff] }
0x1cbc   :  { %v5825_v16 = vld [vmem:[%s10554_s1 + $0x708] sm:$0xff]  ;;  %v9154_v28 = vpack.c.bf16 %v5793_v57, %v5792_v30  ;;  %v5844_v8 = vld [vmem:[%s10554_s1 + $0x7a0] sm:$0xff]  ;;  %v5815_v3 = vld [vmem:[%s10554_s1 + $0x6b8] sm:$0xff] }
0x1cbd   :  { %9099 = vmatpush3.bf16.msra.mxu0 %v9098_v62  ;;  %9131 = vmatpush3.bf16.msra.mxu1 %v9130_v9  ;;  %v5741_v62 = vld [vmem:[%s10554_s1 + $0x468] sm:$0xff]  ;;  %v9112_v9 = vpack.c.bf16 %v5757_v43, %v5756_v27  ;;  %v5811_v27 = vld [vmem:[%s10554_s1 + $0x698] sm:$0xff]  ;;  %v5842_v43 = vld [vmem:[%s10554_s1 + $0x790] sm:$0xff] }
0x1cbe   :  { %9101 = vmatprep.subr.bf16.mxu0 %v9100_v32  ;;  %9133 = vmatprep.subr.bf16.mxu1 %v9132_v11  ;;  %v5773_v32 = vld [vmem:[%s10554_s1 + $0x568] sm:$0xff]  ;;  %v5758_v11 = vld [vmem:[%s10554_s1 + $0x4f0] sm:$0xff]  ;;  %v9114_v20 = vpack.c.bf16 %v5741_v62, %v5740_v7  ;;  %v9186_v7 = vpack.c.bf16 %v5825_v16, %v5824_v2  ;;  %v9188_v40 = vpack.c.bf16 %v5843_v53, %v5842_v43  ;;  %v5847_v30 = vld [vmem:[%s10554_s1 + $0x7b8] sm:$0xff] }
0x1cbf   :  { %v9146_v36 = vpack.c.bf16 %v5773_v32, %v5772_v55  ;;  %v5846_v23 = vld [vmem:[%s10554_s1 + $0x7b0] sm:$0xff]  ;;  %v5849_v43 = vld [vmem:[%s10554_s1 + $0x7c8] sm:$0xff] }
0x1cc0   :  { %v9196_v16 = vpack.c.bf16 %v5847_v30, %v5846_v23 }
0x1cc1   :  { %9103 = vmatpush3.bf16.msra.mxu0 %v9102_v25  ;;  %9135 = vmatpush3.bf16.msra.mxu1 %v9134_v26  ;;  %v5742_v25 = vld [vmem:[%s10554_s1 + $0x470] sm:$0xff]  ;;  %v5743_v26 = vld [vmem:[%s10554_s1 + $0x478] sm:$0xff] }
0x1cc2   :  { %9105 = vmatprep.subr.bf16.mxu0 %v9104_v59  ;;  %9137 = vmatprep.subr.bf16.mxu1 %v9136_v5  ;;  %v9116_v59 = vpack.c.bf16 %v5759_v10, %v5758_v11  ;;  %v5775_v5 = vld [vmem:[%s10554_s1 + $0x578] sm:$0xff]  ;;  %v9118_v18 = vpack.c.bf16 %v5743_v26, %v5742_v25  ;;  %v5826_v10 = vld [vmem:[%s10554_s1 + $0x710] sm:$0xff]  ;;  %v5796_v25 = vld [vmem:[%s10554_s1 + $0x620] sm:$0xff] }
0x1cc3   :  { %v5797_v26 = vld [vmem:[%s10554_s1 + $0x628] sm:$0xff] }
0x1cc4   :  { %v9162_v57 = vpack.c.bf16 %v5797_v26, %v5796_v25  ;;  %v5805_v25 = vld [vmem:[%s10554_s1 + $0x668] sm:$0xff] }
0x1cc5   :  { %9107 = vmatpush3.bf16.msra.mxu0 %v9106_v60  ;;  %9139 = vmatpush3.bf16.msra.mxu1 %v9138_v54  ;;  %v9150_v60 = vpack.c.bf16 %v5775_v5, %v5774_v49  ;;  %v9152_v54 = vpack.c.bf16 %v5809_v0, %v5808_v44  ;;  %v5828_v5 = vld [vmem:[%s10554_s1 + $0x720] sm:$0xff]  ;;  %v5829_v44 = vld [vmem:[%s10554_s1 + $0x728] sm:$0xff]  ;;  %v5814_v0 = vld [vmem:[%s10554_s1 + $0x6b0] sm:$0xff] }
0x1cc6   :  { %9109 = vmatprep.subr.bf16.mxu0 %v9108_v1  ;;  %9141 = vmatprep.subr.bf16.mxu1 %v9140_v50  ;;  %v5810_v1 = vld [vmem:[%s10554_s1 + $0x690] sm:$0xff]  ;;  %v6321_v50 = vadd.f32 %v10748_v31, %v5895_v58  ;;  %v10922_v31 = vrot.slane %v10808_v21, %v9898_v48  ;;  %v9164_v2 = vpack.c.bf16 %v5815_v3, %v5814_v0  ;;  %v5855_v0 = vld [vmem:[%s10554_s1 + $0x7f8] sm:$0xff] }
0x1cc7   :  { %v9156_v12 = vpack.c.bf16 %v5811_v27, %v5810_v1  ;;  %v5794_v48 = vld [vmem:[%s10554_s1 + $0x610] sm:$0xff]  ;;  %v5848_v27 = vld [vmem:[%s10554_s1 + $0x7c0] sm:$0xff]  ;;  %v5911_v3 = vrot.slane %v10808_v21, %v9979_v38 }
0x1cc8   :  { %v6570_v62 = vmax.f32 %v6321_v50, 0.0  ;;  %v6554_v11 = vadd.f32 %v10789_v37, %v10922_v31  ;;  %v5830_v1 = vld [vmem:[%s10554_s1 + $0x730] sm:$0xff]  ;;  %v5831_v50 = vld [vmem:[%s10554_s1 + $0x738] sm:$0xff] }
0x1cc9   :  { %9111 = vmatpush3.bf16.msra.mxu0 %v9110_v56  ;;  %9143 = vmatpush3.bf16.msra.mxu1 %v9142_v61  ;;  %v6406_v56 = vadd.f32 %v10773_v42, %v10834_v47  ;;  %v10918_v61 = vrot.slane %v10808_v21, %v9895_v45  ;;  %v6572_v42 = vmax.f32 %v6398_v63, 0.0  ;;  %v6327_v47 = vadd.f32 %v10764_v33, %v5895_v58  ;;  %v5812_v33 = vld [vmem:[%s10554_s1 + $0x6a0] sm:$0xff]  ;;  %v5845_v58 = vld [vmem:[%s10554_s1 + $0x7a8] sm:$0xff] }
0x1cca   :  { %9113 = vmatprep.subr.bf16.mxu0 %v9112_v9  ;;  %9145 = vmatprep.subr.bf16.mxu1 %v9144_v15  ;;  %v6404_v45 = vadd.f32 %v10766_v22, %v5903_v6  ;;  %v5795_v9 = vld [vmem:[%s10554_s1 + $0x618] sm:$0xff]  ;;  %v6587_v15 = vmax.f32 %v6329_v52, 0.0  ;;  %v5813_v22 = vld [vmem:[%s10554_s1 + $0x6a8] sm:$0xff]  ;;  %v6577_v6 = vmax.f32 %v6554_v11, 0.0  ;;  %v5816_v63 = vld [vmem:[%s10554_s1 + $0x6c0] sm:$0xff]  ;;  %v9198_v52 = vpack.c.bf16 %v5831_v50, %v5830_v1 }
0x1ccb   :  { %v6589_v55 = vmax.f32 %v6406_v56, 0.0  ;;  %v6477_v32 = vadd.f32 %v10787_v34, %v10918_v61  ;;  %v9158_v37 = vpack.c.bf16 %v5795_v9, %v5794_v48  ;;  %v5800_v56 = vld [vmem:[%s10554_s1 + $0x640] sm:$0xff]  ;;  %v5851_v48 = vld [vmem:[%s10554_s1 + $0x7d8] sm:$0xff]  ;;  %v6475_v38 = vadd.f32 %v10780_v4, %v5911_v3 }
0x1ccc   :  { %v6588_v34 = vmax.f32 %v6404_v45, 0.0  ;;  %v5850_v45 = vld [vmem:[%s10554_s1 + $0x7d0] sm:$0xff]  ;;  %v5839_v1 = vld [vmem:[%s10554_s1 + $0x778] sm:$0xff] }
0x1ccd   :  { %9115 = vmatpush3.bf16.msra.mxu0 %v9114_v20  ;;  %9147 = vmatpush3.bf16.msra.mxu1 %v9146_v36  ;;  %v6586_v20 = vmax.f32 %v6327_v47, 0.0  ;;  %v9190_v36 = vpack.c.bf16 %v5827_v39, %v5826_v10  ;;  %v6575_v49 = vmax.f32 %v6477_v32, 0.0  ;;  %v5819_v47 = vld [vmem:[%s10554_s1 + $0x6d8] sm:$0xff]  ;;  %v9204_v10 = vpack.c.bf16 %v5851_v48, %v5850_v45  ;;  %v5834_v39 = vld [vmem:[%s10554_s1 + $0x750] sm:$0xff] }
0x1cce   :  { %9117 = vmatprep.subr.bf16.mxu0 %v9116_v59  ;;  %9149 = vmatprep.subr.bf16.mxu1 %v9148_v17  ;;  %v9160_v59 = vpack.c.bf16 %v5813_v22, %v5812_v33  ;;  %v9192_v17 = vpack.c.bf16 %v5845_v58, %v5844_v8  ;;  %v5803_v32 = vld [vmem:[%s10554_s1 + $0x658] sm:$0xff]  ;;  %v5820_v22 = vld [vmem:[%s10554_s1 + $0x6e0] sm:$0xff]  ;;  %v5821_v8 = vld [vmem:[%s10554_s1 + $0x6e8] sm:$0xff] }
0x1ccf   :  { %v5835_v33 = vld [vmem:[%s10554_s1 + $0x758] sm:$0xff]  ;;  %v5852_v58 = vld [vmem:[%s10554_s1 + $0x7e0] sm:$0xff]  ;;  %v9176_v26 = vpack.c.bf16 %v5821_v8, %v5820_v22 }
0x1cd1   :  { %9119 = vmatpush3.bf16.msra.mxu0 %v9118_v18  ;;  %9151 = vmatpush3.bf16.msra.mxu1 %v9150_v60  ;;  %v9194_v18 = vpack.c.bf16 %v5829_v44, %v5828_v5  ;;  %v5798_v60 = vld [vmem:[%s10554_s1 + $0x630] sm:$0xff]  ;;  %v5823_v5 = vld [vmem:[%s10554_s1 + $0x6f8] sm:$0xff] }
0x1cd2   :  { %9153 = vmatprep.subr.bf16.mxu0 %v9152_v54  ;;  %9185 = vmatprep.subr.bf16.mxu1 %v9184_v35  ;;  %v5799_v54 = vld [vmem:[%s10554_s1 + $0x638] sm:$0xff]  ;;  %v5817_v35 = vld [vmem:[%s10554_s1 + $0x6c8] sm:$0xff]  ;;  %v5854_v44 = vld [vmem:[%s10554_s1 + $0x7f0] sm:$0xff] }
0x1cd3   :  { %v9166_v53 = vpack.c.bf16 %v5799_v54, %v5798_v60  ;;  %v9212_v54 = vpack.c.bf16 %v5855_v0, %v5854_v44 }
0x1cd4   :  { %6966 = vmatmul.mubr.f32.vlgmr.msra.gmra.mrb[98].mxu0 %v6570_v62  ;;  %7041 = vmatmul.mubr.f32.vlgmr.msra.gmra.mrb[96].mxu1 %v6572_v42  ;;  %v5833_v62 = vld [vmem:[%s10554_s1 + $0x748] sm:$0xff]  ;;  %v5818_v42 = vld [vmem:[%s10554_s1 + $0x6d0] sm:$0xff] }
0x1cd5   :  { %6970 = vmatprep.mubr.f32.mxu0 %v6587_v15  ;;  %7045 = vmatprep.mubr.f32.mxu1 %v6589_v55  ;;  %v5802_v55 = vld [vmem:[%s10554_s1 + $0x650] sm:$0xff]  ;;  %v9172_v11 = vpack.c.bf16 %v5819_v47, %v5818_v42 }
0x1cd6   :  { %9155 = vmatpush3.bf16.msra.mxu0 %v9154_v28  ;;  %9187 = vmatpush3.bf16.msra.mxu1 %v9186_v7  ;;  %v5801_v28 = vld [vmem:[%s10554_s1 + $0x648] sm:$0xff]  ;;  %v9168_v7 = vpack.c.bf16 %v5817_v35, %v5816_v63 }
0x1cd7   :  { %9157 = vmatprep.subr.bf16.mxu0 %v9156_v12  ;;  %9189 = vmatprep.subr.bf16.mxu1 %v9188_v40  ;;  %v9200_v12 = vpack.c.bf16 %v5849_v43, %v5848_v27  ;;  %v5832_v40 = vld [vmem:[%s10554_s1 + $0x740] sm:$0xff]  ;;  %v9170_v9 = vpack.c.bf16 %v5801_v28, %v5800_v56  ;;  %v6574_v27 = vmax.f32 %v6475_v38, 0.0 }
0x1cd8   :  { %6971 = vmatmul.mubr.f32.gmra.mrb[100].mxu0 %v6586_v20  ;;  %7046 = vmatmul.mubr.f32.gmra.mrb[98].mxu1 %v6588_v34  ;;  %v9202_v15 = vpack.c.bf16 %v5833_v62, %v5832_v40  ;;  %v5853_v20 = vld [vmem:[%s10554_s1 + $0x7e8] sm:$0xff]  ;;  %v9174_v34 = vpack.c.bf16 %v5803_v32, %v5802_v55 }
0x1cd9   :  { %7115 = vmatprep.mubr.f32.mxu0 %v6575_v49  ;;  %7190 = vmatprep.mubr.f32.mxu1 %v6577_v6  ;;  %v9208_v49 = vpack.c.bf16 %v5853_v20, %v5852_v58  ;;  %v5836_v6 = vld [vmem:[%s10554_s1 + $0x760] sm:$0xff] }
0x1cda   :  { %9159 = vmatpush3.bf16.msra.mxu0 %v9158_v37  ;;  %9191 = vmatpush3.bf16.msra.mxu1 %v9190_v36  ;;  %v9206_v37 = vpack.c.bf16 %v5835_v33, %v5834_v39  ;;  %v5804_v36 = vld [vmem:[%s10554_s1 + $0x660] sm:$0xff] }
0x1cdb   :  { %9161 = vmatprep.subr.bf16.mxu0 %v9160_v59  ;;  %9193 = vmatprep.subr.bf16.mxu1 %v9192_v17  ;;  %v5837_v59 = vld [vmem:[%s10554_s1 + $0x768] sm:$0xff]  ;;  %v5822_v17 = vld [vmem:[%s10554_s1 + $0x6f0] sm:$0xff]  ;;  %v9178_v23 = vpack.c.bf16 %v5805_v25, %v5804_v36 }
0x1cdc   :  { %v9210_v30 = vpack.c.bf16 %v5837_v59, %v5836_v6  ;;  %v9180_v60 = vpack.c.bf16 %v5823_v5, %v5822_v17 }
0x1cde   :  { %9163 = vmatpush3.bf16.msra.mxu0 %v9162_v57  ;;  %9195 = vmatpush3.bf16.msra.mxu1 %v9194_v18  ;;  %v5806_v57 = vld [vmem:[%s10554_s1 + $0x670] sm:$0xff]  ;;  %v5919_v18 = vrot.slane %v10808_v21, %v9984_v51  ;;  %v6483_v51 = vadd.f32 %v10810_v19, %v10918_v61  ;;  %v6560_v21 = vadd.f32 %v10812_v14, %v10922_v31 }
0x1cdf   :  { %9165 = vmatprep.subr.bf16.mxu0 %v9164_v2  ;;  %9197 = vmatprep.subr.bf16.mxu1 %v9196_v16  ;;  %v5807_v2 = vld [vmem:[%s10554_s1 + $0x678] sm:$0xff]  ;;  %v5838_v16 = vld [vmem:[%s10554_s1 + $0x770] sm:$0xff] }
0x1ce0   :  { %v9182_v50 = vpack.c.bf16 %v5807_v2, %v5806_v57  ;;  %v9214_v63 = vpack.c.bf16 %v5839_v1, %v5838_v16  ;;  %v6552_v35 = vadd.f32 %v10782_v24, %v5919_v18  ;;  %v6591_v56 = vmax.f32 %v6483_v51, 0.0 }
0x1ce1   :  { %v6593_v4 = vmax.f32 %v6560_v21, 0.0 }
0x1ce2   :  { %9167 = vmatpush3.bf16.msra.mxu0 %v9166_v53  ;;  %9199 = vmatpush3.bf16.msra.mxu1 %v9198_v52  ;;  %v6576_v43 = vmax.f32 %v6552_v35, 0.0  ;;  %v6481_v53 = vadd.f32 %v10801_v46, %v5911_v3  ;;  %v6558_v52 = vadd.f32 %v10803_v29, %v5919_v18  ;;  %v7506_v46 = vld [vmem:[%s7384_s12] ss:$0 sm:$0xff] }
0x1ce3   :  { %9169 = vmatprep.subr.bf16.mxu0 %v9168_v7  ;;  %9201 = vmatprep.subr.bf16.mxu1 %v9200_v12 }
0x1ce4   :  { %v6590_v24 = vmax.f32 %v6481_v53, 0.0  ;;  %v6592_v28 = vmax.f32 %v6558_v52, 0.0 }
0x1ce6   :  { %9171 = vmatpush3.bf16.msra.mxu0 %v9170_v9  ;;  %9203 = vmatpush3.bf16.msra.mxu1 %v9202_v15 }
0x1ce7   :  { %9173 = vmatprep.subr.bf16.mxu0 %v9172_v11  ;;  %9205 = vmatprep.subr.bf16.mxu1 %v9204_v10 }
0x1cea   :  { %9175 = vmatpush3.bf16.msra.mxu0 %v9174_v34  ;;  %9207 = vmatpush3.bf16.msra.mxu1 %v9206_v37 }
0x1ceb   :  { %9177 = vmatprep.subr.bf16.mxu0 %v9176_v26  ;;  %9209 = vmatprep.subr.bf16.mxu1 %v9208_v49 }
0x1cee   :  { %9179 = vmatpush3.bf16.msra.mxu0 %v9178_v23  ;;  %9211 = vmatpush3.bf16.msra.mxu1 %v9210_v30 }
0x1cef   :  { %9181 = vmatprep.subr.bf16.mxu0 %v9180_v60  ;;  %9213 = vmatprep.subr.bf16.mxu1 %v9212_v54 }
0x1cf2   :  { %9183 = vmatpush3.bf16.msra.mxu0 %v9182_v50  ;;  %9215 = vmatpush3.bf16.msra.mxu1 %v9214_v63 }
0x1cf5   :  { %7116 = vmatmul.mubr.f32.vlgmr.msra.gmra.mrb[102].mxu0 %v6574_v27  ;;  %7191 = vmatmul.mubr.f32.vlgmr.msra.gmra.mrb[100].mxu1 %v6576_v43 }
0x1cf6   :  { %7120 = vmatprep.mubr.f32.mxu0 %v6591_v56  ;;  %7195 = vmatprep.mubr.f32.mxu1 %v6593_v4 }
0x1cf9   :  { %7121 = vmatmul.mubr.f32.gmra.mrb[104].mxu0 %v6590_v24  ;;  %7196 = vmatmul.mubr.f32.gmra.mrb[102].mxu1 %v6592_v28 }
0x1d66   :  { %v7964_v19 = vpop.f32.mrb[90].mxu0  ;;  %v8002_v14 = vpop.f32.mrb[88].mxu1 }
0x1d67   :  { %v7965_v61 = vpop.f32.mrb[91].mxu0  ;;  %v8003_v29 = vpop.f32.mrb[89].mxu1 }
0x1d68   :  { %v7966_v31 = vadd.f32 %v7965_v61, %v7964_v19  ;;  %v8004_v7 = vadd.f32 %v8003_v29, %v8002_v14 }
0x1d6a   :  { %v6668_v12 = vadd.f32 %v7966_v31, %v7506_v46 }
0x1d6c   :  { %v6743_v40 = vadd.f32 %v8004_v7, %v6668_v12 }
0x1d6d   :  { %v7967_v62 = vpop.f32.mrb[92].mxu0  ;;  %v8005_v42 = vpop.f32.mrb[90].mxu1 }
0x1d6e   :  { %v7968_v47 = vpop.f32.mrb[93].mxu0  ;;  %v8006_v45 = vpop.f32.mrb[91].mxu1 }
0x1d6f   :  { %v7969_v48 = vadd.f32 %v7968_v47, %v7967_v62  ;;  %v8007_v9 = vadd.f32 %v8006_v45, %v8005_v42  ;;  %v7254_v47 = vld [vmem:[%s7387_s19 + $0x8] sm:$0xff]  ;;  %v7255_v45 = vld [vmem:[%s7387_s19 + $0x10] sm:$0xff] }
0x1d71   :  { %v6673_v15 = vadd.f32 %v7969_v48, %v7506_v46 }
0x1d73   :  { %v6748_v55 = vadd.f32 %v8007_v9, %v6673_v15 }
0x1d86   :  { %v8040_v32 = vpop.f32.mrb[94].mxu0  ;;  %v8078_v11 = vpop.f32.mrb[92].mxu1 }
0x1d87   :  { %v8041_v10 = vpop.f32.mrb[95].mxu0  ;;  %v8079_v39 = vpop.f32.mrb[93].mxu1 }
0x1d88   :  { %v8042_v33 = vadd.f32 %v8041_v10, %v8040_v32  ;;  %v8080_v22 = vadd.f32 %v8079_v39, %v8078_v11 }
0x1d8a   :  { %v6818_v8 = vadd.f32 %v8042_v33, %v6743_v40  ;;  %v8043_v58 = vpop.f32.mrb[96].mxu0  ;;  %v8081_v20 = vpop.f32.mrb[94].mxu1 }
0x1d8b   :  { %v8044_v34 = vpop.f32.mrb[97].mxu0  ;;  %v8082_v37 = vpop.f32.mrb[95].mxu1 }
0x1d8c   :  { %v6893_v36 = vadd.f32 %v8080_v22, %v6818_v8  ;;  %v8045_v25 = vadd.f32 %v8044_v34, %v8043_v58  ;;  %v8083_v26 = vadd.f32 %v8082_v37, %v8081_v20 }
0x1d8e   :  { %v6823_v49 = vadd.f32 %v8045_v25, %v6748_v55 }
0x1d90   :  { %v6898_v6 = vadd.f32 %v8083_v26, %v6823_v49 }
0x1da7   :  { %v8116_v59 = vpop.f32.mrb[98].mxu0  ;;  %v8154_v17 = vpop.f32.mrb[96].mxu1 }
0x1da8   :  { %v8117_v5 = vpop.f32.mrb[99].mxu0  ;;  %v8155_v44 = vpop.f32.mrb[97].mxu1 }
0x1da9   :  { %v8118_v0 = vadd.f32 %v8117_v5, %v8116_v59  ;;  %v8156_v3 = vadd.f32 %v8155_v44, %v8154_v17  ;;  %v7507_v59 = vld [vmem:[%s7385_s10] ss:$0 sm:$0xff] }
0x1daa   :  { %v7508_v5 = vld [vmem:[%s7386_s15] ss:$0 sm:$0xff] }
0x1dab   :  { %v6968_v23 = vadd.f32 %v8118_v0, %v6893_v36  ;;  %v8119_v30 = vpop.f32.mrb[100].mxu0  ;;  %v8157_v57 = vpop.f32.mrb[98].mxu1 }
0x1dac   :  { %v8120_v18 = vpop.f32.mrb[101].mxu0  ;;  %v8158_v60 = vpop.f32.mrb[99].mxu1 }
0x1dad   :  { %v7043_v54 = vadd.f32 %v8156_v3, %v6968_v23  ;;  %v8121_v2 = vadd.f32 %v8120_v18, %v8119_v30  ;;  %v8159_v16 = vadd.f32 %v8158_v60, %v8157_v57  ;;  %v7509_v60 = vld [vmem:[%s7388_s23] ss:$0 sm:$0xff] }
0x1daf   :  { %v6973_v1 = vadd.f32 %v8121_v2, %v6898_v6 }
0x1db1   :  { %v7048_v50 = vadd.f32 %v8159_v16, %v6973_v1 }
0x1dc8   :  { %v8192_v63 = vpop.f32.mrb[102].mxu0  ;;  %v8230_v38 = vpop.f32.mrb[100].mxu1 }
0x1dc9   :  { %v8193_v35 = vpop.f32.mrb[103].mxu0  ;;  %v8231_v51 = vpop.f32.mrb[101].mxu1 }
0x1dca   :  { %v8194_v21 = vadd.f32 %v8193_v35, %v8192_v63  ;;  %v8232_v27 = vadd.f32 %v8231_v51, %v8230_v38 }
0x1dcc   :  { %v7118_v43 = vadd.f32 %v8194_v21, %v7043_v54  ;;  %v8195_v53 = vpop.f32.mrb[104].mxu0  ;;  %v8233_v52 = vpop.f32.mrb[102].mxu1 }
0x1dcd   :  { %v8196_v56 = vpop.f32.mrb[105].mxu0  ;;  %v8234_v4 = vpop.f32.mrb[103].mxu1 }
0x1dce   :  { %v7193_v24 = vadd.f32 %v8232_v27, %v7118_v43  ;;  %v8197_v28 = vadd.f32 %v8196_v56, %v8195_v53  ;;  %v8235_v19 = vadd.f32 %v8234_v4, %v8233_v52 }
0x1dd0   :  { %v7201_v14 = vadd.f32 %v7193_v24, %v10514_v41  ;;  %v7123_v46 = vadd.f32 %v8197_v28, %v7048_v50  ;;  %v7253_v41 = vld [vmem:[%s7387_s19] sm:$0xff] }
0x1dd1   :  { %v9216_v48 = vpack.c.bf16 %v7254_v47, %v7253_v41 }
0x1dd2   :  { %v7198_v61 = vadd.f32 %v8235_v19, %v7123_v46  ;;  %v7203_v29 = vsel %vm272_vm1, %v7201_v14, 0.0  ;;  %v7211_v31 = vmul.f32 %v7201_v14, %v7201_v14 }
0x1dd3   :  { %7204 = vadd.xlane.f32.xlu0 %v7203_v29  ;;  %9217 = vmatprep.subr.bf16.mxu0 %v9216_v48 }
0x1dd4   :  { %v7202_v7 = vadd.f32 %v7198_v61, %v10531_v13  ;;  %v7213_v12 = vsel %vm272_vm1, %v7211_v31, 0.0  ;;  %v7256_v13 = vld [vmem:[%s7387_s19 + $0x18] sm:$0xff]  ;;  %9219 = vmatpush3.bf16.msra.mxu0 %v9216_v48 }
0x1dd5   :  { %v9220_v9 = vpack.c.bf16 %v7256_v13, %v7255_v45 }
0x1dd6   :  { %v7206_v40 = vsel %vm272_vm1, %v7202_v7, 0.0  ;;  %v7212_v62 = vmul.f32 %v7202_v7, %v7202_v7 }
0x1dd7   :  { %7214 = vadd.xlane.f32.xlu0 %v7213_v12  ;;  %7207 = vadd.xlane.f32.xlu1 %v7206_v40 }
0x1dd8   :  { %v7216_v42 = vsel %vm272_vm1, %v7212_v62, 0.0  ;;  %9221 = vmatprep.subr.bf16.mxu0 %v9220_v9 }
0x1dd9   :  { %9223 = vmatpush3.bf16.msra.mxu0 %v9220_v9 }
0x1ddb   :  { %7217 = vadd.xlane.f32.xlu1 %v7216_v42 }
0x1e60   :  { %v7205_v15 = vpop.xlane.xlu0 %7204 }
0x1e61   :  { %v7209_v55 = vmul.f32 0.03125, %v7205_v15 }
0x1e63   :  { %v7221_v10 = vmul.f32 %v7209_v55, %v7209_v55  ;;  %v7227_v49 = vsub.f32 %v7201_v14, %v7209_v55 }
0x1e64   :  { %v7215_v32 = vpop.xlane.xlu0 %7214  ;;  %v7208_v11 = vpop.xlane.xlu1 %7207 }
0x1e65   :  { %v7219_v39 = vmul.f32 0.03125, %v7215_v32  ;;  %v7210_v33 = vmul.f32 0.03125, %v7208_v11 }
0x1e67   :  { %v7223_v22 = vsub.f32 %v7219_v39, %v7221_v10  ;;  %v7222_v20 = vmul.f32 %v7210_v33, %v7210_v33  ;;  %v7228_v44 = vsub.f32 %v7202_v7, %v7210_v33 }
0x1e68   :  { %v7218_v8 = vpop.xlane.xlu1 %7217 }
0x1e69   :  { %v7225_v58 = vmax.f32 %v7223_v22, 0.0  ;;  %v7220_v34 = vmul.f32 0.03125, %v7218_v8 }
0x1e6b   :  { %v7229_v37 = vadd.f32 1e-05, %v7225_v58  ;;  %v7224_v36 = vsub.f32 %v7220_v34, %v7222_v20 }
0x1e6d   :  { %9344 = vrsqrt.f32 %v7229_v37  ;;  %v7226_v25 = vmax.f32 %v7224_v36, 0.0 }
0x1e6f   :  { %v7230_v26 = vadd.f32 1e-05, %v7226_v25 }
0x1e71   :  { %9346 = vrsqrt.f32 %v7230_v26 }
0x1e77   :  { %v9345_v6 = vpop.eup %9344 }
0x1e78   :  { %v7233_v17 = vmul.f32 %v9345_v6, %v7227_v49 }
0x1e7a   :  { %v7242_v0 = vmul.f32 %v7507_v59, %v7233_v17 }
0x1e7b   :  { %v9347_v3 = vpop.eup %9346 }
0x1e7c   :  { %v7234_v23 = vmul.f32 %v9347_v3, %v7228_v44  ;;  %v7251_v30 = vadd.f32 %v7508_v5, %v7242_v0 }
0x1e7e   :  { %v7243_v57 = vmul.f32 %v7507_v59, %v7234_v23  ;;  %8505 = vmatprep.mubr.msk.f32.mxu0 %vm272_vm1, %v7251_v30 }
0x1e80   :  { %v7252_v18 = vadd.f32 %v7508_v5, %v7243_v57 }
0x1e82   :  { %8506 = vmatmul.mubr.msk.f32.vlgmr.msra.gmra.mrb[106].mxu0 %vm272_vm1, %v7252_v18 }
0x1f55   :  { %v8507_v54 = vpop.f32.mrb[106].mxu0 }
0x1f56   :  { %v7342_v2 = vadd.f32 %v8507_v54, %v7509_v60  ;;  %v7336_v16 = vpop.f32.mrb[107].mxu0 }
0x1f57   :  { %v7337_v1 = vadd.f32 %v7509_v60, %v7336_v16 }
0x1f58   :  { %7346 = vst [vmem:[%s7389_s28 + $0x8] sm:$0xff] %v7342_v2 }
0x1f59   :  { %7345 = vst [vmem:[%s7389_s28] sm:$0xff] %v7337_v1 }

</bundles_post_ra>
